<compile_context>
chip_gen: v7x
topology: tpu7x:2x2x1
jax: 0.10.0
libtpu: 0.0.40
codegen_flags: <defaults>
</compile_context>

<pallas_src>
import jax
import jax.numpy as jnp
from jax import lax
from jax.experimental import pallas as pl
from jax.experimental.pallas import tpu as pltpu

VOCAB = 21  # 20 amino acids + 1 (padding/extra)
_HP = lax.Precision.HIGHEST


def _round_up(x, m):
    return (x + m - 1) // m * m


def _choose_btile(batch, hidden):
    """Batch tile: multiple of 8 (f32 sublane), capped so the ~10 carried
    (Bt, H) f32 LSTM states (both interleaved branches) stay vreg-resident."""
    b8 = _round_up(batch, 8)
    cap = (64 * 1024) // (10 * hidden * 4)        # ~quarter of the vreg file
    cap = max(8, (cap // 8) * 8)
    return max(8, min(b8, min(128, cap)))


# -----------------------------------------------------------------------------
# Fused Pallas kernel: interleaved tcr/pep LSTM branches + MLP epilogue
# -----------------------------------------------------------------------------
def _fused_kernel(
    t_xproj_ref, t_whh1_ref, t_wih2_ref, t_whh2_ref, t_b2_ref, t_take_ref,
    p_xproj_ref, p_whh1_ref, p_wih2_ref, p_whh2_ref, p_b2_ref, p_take_ref,
    wa_ref, wb_ref, bh_ref, wo_ref, bo_ref,
    out_ref,
):
    """Per batch-tile of size Bt (grid axis 0 blocks the padded batch).
      xproj: (T, Bt, 4H) = x @ (Wemb^T Wih1^T) + b1   (precomputed, time-major)
      whh1/wih2/whh2: (H, 4H)   b2: (1, 4H)   take: (T, Bt, 1) one-hot at len-1
      MLP: wa/wb (H, H), bh (1, H), wo (H, 1), bo (1, 1).   out: (Bt, 1)
    """
    Bt = out_ref.shape[0]
    H = t_whh1_ref.shape[0]
    Tt = t_xproj_ref.shape[0]
    Tp = p_xproj_ref.shape[0]

    # Lane selector for the g-gate (tanh) inside the fused (Bt, 4H) gate vector.
    lane = lax.broadcasted_iota(jnp.int32, (Bt, 4 * H), 1)
    g_sel = (lane >= 2 * H) & (lane < 3 * H)

    def cell_update(gates, c):
        # Single transcendental per cell:
        #   g lanes      -> tanh(x)
        #   i/f/o lanes  -> sigmoid(x) = 0.5 * tanh(x / 2) + 0.5
        # The extra mul/add ride otherwise-free VALU slots.
        y = jnp.tanh(jnp.where(g_sel, gates, 0.5 * gates))
        act = jnp.where(g_sel, y, 0.5 * y + 0.5)
        i = act[:, 0 * H:1 * H]
        f = act[:, 1 * H:2 * H]
        g = act[:, 2 * H:3 * H]
        o = act[:, 3 * H:4 * H]
        c_new = f * c + i * g
        h_new = o * jnp.tanh(c_new)
        return h_new, c_new

    # Weights / biases loaded & broadcast ONCE, outside the time loop.
    t_whh1, t_wih2, t_whh2 = t_whh1_ref[...], t_wih2_ref[...], t_whh2_ref[...]
    p_whh1, p_wih2, p_whh2 = p_whh1_ref[...], p_wih2_ref[...], p_whh2_ref[...]
    t_b2 = jnp.broadcast_to(t_b2_ref[...], (Bt, 4 * H))
    p_b2 = jnp.broadcast_to(p_b2_ref[...], (Bt, 4 * H))

    def branch_step(t, state, xproj_ref, take_ref, whh1, wih2, whh2, b2):
        h1, c1, h2, c2, acc = state
        # Layer 1: input projection (+ b1) precomputed; only the recurrent dot.
        gates1 = xproj_ref[t] + jnp.dot(h1, whh1,
                                        preferred_element_type=jnp.float32)
        h1, c1 = cell_update(gates1, c1)
        # Layer 2: h2_{t-1} dot depends only on the previous step -> off the
        # critical path once unrolled.
        gates2 = (jnp.dot(h1, wih2, preferred_element_type=jnp.float32)
                  + jnp.dot(h2, whh2, preferred_element_type=jnp.float32)
                  + b2)
        h2, c2 = cell_update(gates2, c2)
        # Snapshot the top-layer hidden at t == len-1 via the (Bt,1) column.
        acc = acc + take_ref[t] * h2
        return (h1, c1, h2, c2, acc)

    z = jnp.zeros((Bt, H), jnp.float32)
    tcr_state = (z, z, z, z, z)
    pep_state = (z, z, z, z, z)
    # Interleave the two independent recurrences so the scheduler can hide one
    # chain's MXU/EUP latency under the other's work (≈2x on the serial part).
    # TODO(synk): for long sequences (T >> 32) cap the unroll (fori_loop with
    # unroll=4..8) to bound code size / vreg live ranges; full unroll is best
    # at the small T used here.
    for t in range(max(Tt, Tp)):
        if t < Tt:
            tcr_state = branch_step(t, tcr_state, t_xproj_ref, t_take_ref,
                                    t_whh1, t_wih2, t_whh2, t_b2)
        if t < Tp:
            pep_state = branch_step(t, pep_state, p_xproj_ref, p_take_ref,
                                    p_whh1, p_wih2, p_whh2, p_b2)
    tcr_last = tcr_state[4]
    pep_last = pep_state[4]

    # MLP epilogue on resident hiddens; concat realized as a split matmul.
    hmid = (jnp.dot(tcr_last, wa_ref[...], preferred_element_type=jnp.float32)
            + jnp.dot(pep_last, wb_ref[...], preferred_element_type=jnp.float32)
            + bh_ref[...])
    hmid = jnp.where(hmid > 0, hmid, 0.01 * hmid)        # LeakyReLU (slope 0.01)
    # TODO(synk): nn.Dropout omitted (eval/inference semantics -> identity).
    logit = (jnp.dot(hmid, wo_ref[...], preferred_element_type=jnp.float32)
             + bo_ref[...])
    out_ref[...] = jax.nn.sigmoid(logit)


# -----------------------------------------------------------------------------
# Wrapper: precompute recurrence-independent tensors, one batch-blocked call
# -----------------------------------------------------------------------------
def _prep_branch(x_btv, lens, emb_t, p, Bp):
    """Per-branch hoisted precompute (plain XLA ops inside the jit)."""
    B, T, _ = x_btv.shape
    # Fold bias-free embedding into layer-1 input projection:
    #   (x @ Wemb^T) @ Wih1^T == x @ (Wemb^T @ Wih1^T)
    w_in = jnp.dot(emb_t, p["wih1_t"], precision=_HP)                # (V, 4H)
    xproj = jnp.einsum("btv,vg->tbg", x_btv.astype(jnp.float32), w_in,
                       precision=_HP) + p["b1"]                       # (T, B, 4H)
    xproj = jnp.pad(xproj, ((0, 0), (0, Bp - B), (0, 0)))
    take = (jnp.arange(T, dtype=jnp.int32)[:, None]
            == (lens.astype(jnp.int32) - 1)[None, :]).astype(jnp.float32)
    take = jnp.pad(take, ((0, 0), (0, Bp - B)))[:, :, None]           # (T, Bp, 1)
    return (xproj, p["whh1_t"], p["wih2_t"], p["whh2_t"], p["b2"], take)


@jax.jit
def double_lstm_classifier(params, tcrs, tcr_lens, peps, pep_lens):
    B = tcrs.shape[0]
    Tt, Tp = tcrs.shape[1], peps.shape[1]
    H = params["tcr_lstm"]["whh1_t"].shape[0]
    G = 4 * H
    Bt = _choose_btile(B, H)
    Bp = _round_up(max(B, Bt), Bt)
    nb = Bp // Bt

    t_in = _prep_branch(tcrs, tcr_lens, params["tcr_emb_t"],
                        params["tcr_lstm"], Bp)
    p_in = _prep_branch(peps, pep_lens, params["pep_emb_t"],
                        params["pep_lstm"], Bp)
    m = params["mlp"]

    def const(shape):          # weights/biases: resident, same block every step
        return pl.BlockSpec(shape, lambda i: (0, 0))

    def branch_specs(T):
        return [
            pl.BlockSpec((T, Bt, G), lambda i: (0, i, 0)),   # xproj (time-major)
            const((H, G)),                                    # whh1
            const((H, G)),                                    # wih2
            const((H, G)),                                    # whh2
            const((1, G)),                                    # b2
            pl.BlockSpec((T, Bt, 1), lambda i: (0, i, 0)),    # take column
        ]

    in_specs = (branch_specs(Tt) + branch_specs(Tp)
                + [const((H, H)), const((H, H)), const((1, H)),
                   const((H, 1)), const((1, 1))])

    out = pl.pallas_call(
        _fused_kernel,
        out_shape=jax.ShapeDtypeStruct((Bp, 1), jnp.float32),
        grid_spec=pltpu.PrefetchScalarGridSpec(
            num_scalar_prefetch=0,
            grid=(nb,),
            in_specs=in_specs,
            out_specs=pl.BlockSpec((Bt, 1), lambda i: (i, 0)),
        ),
        compiler_params=pltpu.CompilerParams(
            dimension_semantics=("parallel",)),   # shards batch tiles over TCs
    )(*t_in, *p_in, m["wa"], m["wb"], m["bh"], m["wo"], m["bo"])
    return out[:B]


# -----------------------------------------------------------------------------
# Deterministic parameter init (synthetic, PyTorch layouts pre-transposed)
# -----------------------------------------------------------------------------
def _init_lstm_params(key, E, H):
    ks = jax.random.split(key, 8)
    s = 0.1

    def n(k, shape):
        return s * jax.random.normal(k, shape, jnp.float32)

    # PyTorch layout: w_ih (4H, in), w_hh (4H, H), biases (4H,); gate order ifgo
    wih1 = n(ks[0], (4 * H, E)); whh1 = n(ks[1], (4 * H, H))
    bih1 = n(ks[2], (4 * H,));   bhh1 = n(ks[3], (4 * H,))
    wih2 = n(ks[4], (4 * H, H)); whh2 = n(ks[5], (4 * H, H))
    bih2 = n(ks[6], (4 * H,));   bhh2 = n(ks[7], (4 * H,))
    return {
        "wih1_t": wih1.T, "whh1_t": whh1.T, "b1": (bih1 + bhh1).reshape(1, -1),
        "wih2_t": wih2.T, "whh2_t": whh2.T, "b2": (bih2 + bhh2).reshape(1, -1),
    }


def init_params(key, embedding_dim, lstm_dim):
    k = jax.random.split(key, 8)
    s = 0.1
    tcr_emb = s * jax.random.normal(k[0], (embedding_dim, VOCAB), jnp.float32)
    pep_emb = s * jax.random.normal(k[1], (embedding_dim, VOCAB), jnp.float32)
    hid_w = s * jax.random.normal(k[2], (lstm_dim, 2 * lstm_dim), jnp.float32)
    hid_b = s * jax.random.normal(k[3], (lstm_dim,), jnp.float32)
    out_w = s * jax.random.normal(k[4], (1, lstm_dim), jnp.float32)
    out_b = s * jax.random.normal(k[5], (1,), jnp.float32)
    return {
        "tcr_emb_t": tcr_emb.T,                       # (21, E)
        "pep_emb_t": pep_emb.T,
        "tcr_lstm": _init_lstm_params(k[6], embedding_dim, lstm_dim),
        "pep_lstm": _init_lstm_params(k[7], embedding_dim, lstm_dim),
        "mlp": {
            "wa": hid_w[:, :lstm_dim].T,              # (H, H)
            "wb": hid_w[:, lstm_dim:].T,              # (H, H)
            "bh": hid_b.reshape(1, -1),               # (1, H)
            "wo": out_w.T,                            # (H, 1)
            "bo": out_b.reshape(1, 1),                # (1, 1)
        },
    }


# -----------------------------------------------------------------------------
# Pure-JAX reference (sanity check, follows the PyTorch dataflow)
# -----------------------------------------------------------------------------
def _ref_lstm_branch(x_btv, lens, emb_t, p):
    B, T, _ = x_btv.shape
    H = p["whh1_t"].shape[0]
    emb = jnp.einsum("btv,ve->bte", x_btv.astype(jnp.float32), emb_t,
                     precision=_HP)

    def cell(xt, h, c, wih_t, whh_t, b):
        g = (jnp.dot(xt, wih_t, precision=_HP)
             + jnp.dot(h, whh_t, precision=_HP) + b)
        i, f, gg, o = jnp.split(g, 4, axis=1)
        c_new = jax.nn.sigmoid(f) * c + jax.nn.sigmoid(i) * jnp.tanh(gg)
        return jax.nn.sigmoid(o) * jnp.tanh(c_new), c_new

    h1 = c1 = h2 = c2 = jnp.zeros((B, H), jnp.float32)
    out = jnp.zeros((B, H), jnp.float32)
    for t in range(T):
        h1, c1 = cell(emb[:, t, :], h1, c1, p["wih1_t"], p["whh1_t"], p["b1"])
        h2, c2 = cell(h1, h2, c2, p["wih2_t"], p["whh2_t"], p["b2"])
        out = jnp.where((lens - 1).reshape(B, 1) == t, h2, out)
    return out


def _ref_forward(params, tcrs, tcr_lens, peps, pep_lens):
    t_last = _ref_lstm_branch(tcrs, tcr_lens, params["tcr_emb_t"],
                              params["tcr_lstm"])
    p_last = _ref_lstm_branch(peps, pep_lens, params["pep_emb_t"],
                              params["pep_lstm"])
    m = params["mlp"]
    h = (jnp.dot(t_last, m["wa"], precision=_HP)
         + jnp.dot(p_last, m["wb"], precision=_HP) + m["bh"])
    h = jnp.where(h > 0, h, 0.01 * h)
    return jax.nn.sigmoid(jnp.dot(h, m["wo"], precision=_HP) + m["bo"])


# -----------------------------------------------------------------------------
if __name__ == "__main__":
    B = 2
    T_TCR, T_PEP = 10, 8
    EMBEDDING_DIM, LSTM_DIM = 16, 32

    key = jax.random.PRNGKey(0)
    k_par, k_tcr, k_pep = jax.random.split(key, 3)
    params = init_params(k_par, EMBEDDING_DIM, LSTM_DIM)

    # One-hot-like amino-acid inputs (the module multiplies them by a Linear).
    tcr_ids = jax.random.randint(k_tcr, (B, T_TCR), 0, VOCAB)
    pep_ids = jax.random.randint(k_pep, (B, T_PEP), 0, VOCAB)
    tcrs = jax.nn.one_hot(tcr_ids, VOCAB, dtype=jnp.float32)  # (B, T_tcr, 21)
    peps = jax.nn.one_hot(pep_ids, VOCAB, dtype=jnp.float32)  # (B, T_pep, 21)
    tcr_lens = jnp.array([T_TCR, 7], dtype=jnp.int32)
    pep_lens = jnp.array([T_PEP, 5], dtype=jnp.int32)

    out = double_lstm_classifier(params, tcrs, tcr_lens, peps, pep_lens)
    out = jax.block_until_ready(out)

    ref = _ref_forward(params, tcrs, tcr_lens, peps, pep_lens)
    assert out.shape == (B, 1)
    assert jnp.allclose(out, ref, atol=1e-4, rtol=1e-4), (out, ref)

    print("KERNEL_OK")
</pallas_src>

<mosaic_0001>
module attributes {stable_mosaic.version = 11 : i64} {
  func.func @_fused_kernel(%arg0: i32, %arg1: memref<10x8x128xf32, #tpu.memory_space<vmem>>, %arg2: memref<32x128xf32, #tpu.memory_space<vmem>>, %arg3: memref<32x128xf32, #tpu.memory_space<vmem>>, %arg4: memref<32x128xf32, #tpu.memory_space<vmem>>, %arg5: memref<1x128xf32, #tpu.memory_space<vmem>>, %arg6: memref<10x8x1xf32, #tpu.memory_space<vmem>>, %arg7: memref<8x8x128xf32, #tpu.memory_space<vmem>>, %arg8: memref<32x128xf32, #tpu.memory_space<vmem>>, %arg9: memref<32x128xf32, #tpu.memory_space<vmem>>, %arg10: memref<32x128xf32, #tpu.memory_space<vmem>>, %arg11: memref<1x128xf32, #tpu.memory_space<vmem>>, %arg12: memref<8x8x1xf32, #tpu.memory_space<vmem>>, %arg13: memref<32x32xf32, #tpu.memory_space<vmem>>, %arg14: memref<32x32xf32, #tpu.memory_space<vmem>>, %arg15: memref<1x32xf32, #tpu.memory_space<vmem>>, %arg16: memref<32x1xf32, #tpu.memory_space<vmem>>, %arg17: memref<1x1xf32, #tpu.memory_space<vmem>>, %arg18: memref<8x1xf32, #tpu.memory_space<vmem>>) attributes {dimension_semantics = [#tpu.dimension_semantics<parallel>], iteration_bounds = array<i64: 1>, scalar_prefetch = 0 : i64, scratch_operands = 0 : i64, tpu.core_type = #tpu.core_type<tc>, window_params = [{transform_indices = @transform_0, window_bounds = array<i64: 10, 8, 128>}, {pipeline_mode = #tpu.pipeline_mode<synchronous>, transform_indices = @transform_1, window_bounds = array<i64: 32, 128>}, {pipeline_mode = #tpu.pipeline_mode<synchronous>, transform_indices = @transform_2, window_bounds = array<i64: 32, 128>}, {pipeline_mode = #tpu.pipeline_mode<synchronous>, transform_indices = @transform_3, window_bounds = array<i64: 32, 128>}, {pipeline_mode = #tpu.pipeline_mode<synchronous>, transform_indices = @transform_4, window_bounds = array<i64: 1, 128>}, {transform_indices = @transform_5, window_bounds = array<i64: 10, 8, 1>}, {transform_indices = @transform_6, window_bounds = array<i64: 8, 8, 128>}, {pipeline_mode = #tpu.pipeline_mode<synchronous>, transform_indices = @transform_7, window_bounds = array<i64: 32, 128>}, {pipeline_mode = #tpu.pipeline_mode<synchronous>, transform_indices = @transform_8, window_bounds = array<i64: 32, 128>}, {pipeline_mode = #tpu.pipeline_mode<synchronous>, transform_indices = @transform_9, window_bounds = array<i64: 32, 128>}, {pipeline_mode = #tpu.pipeline_mode<synchronous>, transform_indices = @transform_10, window_bounds = array<i64: 1, 128>}, {transform_indices = @transform_11, window_bounds = array<i64: 8, 8, 1>}, {pipeline_mode = #tpu.pipeline_mode<synchronous>, transform_indices = @transform_12, window_bounds = array<i64: 32, 32>}, {pipeline_mode = #tpu.pipeline_mode<synchronous>, transform_indices = @transform_13, window_bounds = array<i64: 32, 32>}, {pipeline_mode = #tpu.pipeline_mode<synchronous>, transform_indices = @transform_14, window_bounds = array<i64: 1, 32>}, {pipeline_mode = #tpu.pipeline_mode<synchronous>, transform_indices = @transform_15, window_bounds = array<i64: 32, 1>}, {pipeline_mode = #tpu.pipeline_mode<synchronous>, transform_indices = @transform_16, window_bounds = array<i64: 1, 1>}, {transform_indices = @transform_17, window_bounds = array<i64: 8, 1>}]} {
    %0 = tpu.iota {dimensions = array<i32: 1>} : vector<8x128xi32>
    %c64_i32 = arith.constant 64 : i32
    %1 = vector.broadcast %c64_i32 : i32 to vector<8x128xi32>
    %2 = arith.cmpi sge, %0, %1 : vector<8x128xi32>
    %c96_i32 = arith.constant 96 : i32
    %3 = vector.broadcast %c96_i32 : i32 to vector<8x128xi32>
    %4 = arith.cmpi slt, %0, %3 : vector<8x128xi32>
    %5 = arith.andi %2, %4 : vector<8x128xi1>
    %c0 = arith.constant 0 : index
    %c0_0 = arith.constant 0 : index
    %6 = vector.load %arg2[%c0, %c0_0] : memref<32x128xf32, #tpu.memory_space<vmem>>, vector<32x128xf32>
    %c0_1 = arith.constant 0 : index
    %c0_2 = arith.constant 0 : index
    %7 = vector.load %arg3[%c0_1, %c0_2] : memref<32x128xf32, #tpu.memory_space<vmem>>, vector<32x128xf32>
    %c0_3 = arith.constant 0 : index
    %c0_4 = arith.constant 0 : index
    %8 = vector.load %arg4[%c0_3, %c0_4] : memref<32x128xf32, #tpu.memory_space<vmem>>, vector<32x128xf32>
    %c0_5 = arith.constant 0 : index
    %c0_6 = arith.constant 0 : index
    %9 = vector.load %arg8[%c0_5, %c0_6] : memref<32x128xf32, #tpu.memory_space<vmem>>, vector<32x128xf32>
    %c0_7 = arith.constant 0 : index
    %c0_8 = arith.constant 0 : index
    %10 = vector.load %arg9[%c0_7, %c0_8] : memref<32x128xf32, #tpu.memory_space<vmem>>, vector<32x128xf32>
    %c0_9 = arith.constant 0 : index
    %c0_10 = arith.constant 0 : index
    %11 = vector.load %arg10[%c0_9, %c0_10] : memref<32x128xf32, #tpu.memory_space<vmem>>, vector<32x128xf32>
    %c0_11 = arith.constant 0 : index
    %c0_12 = arith.constant 0 : index
    %12 = vector.load %arg5[%c0_11, %c0_12] : memref<1x128xf32, #tpu.memory_space<vmem>>, vector<1x128xf32>
    %13 = vector.shape_cast %12 : vector<1x128xf32> to vector<1x128xf32>
    %14 = vector.broadcast %13 : vector<1x128xf32> to vector<8x128xf32>
    %c0_13 = arith.constant 0 : index
    %c0_14 = arith.constant 0 : index
    %15 = vector.load %arg11[%c0_13, %c0_14] : memref<1x128xf32, #tpu.memory_space<vmem>>, vector<1x128xf32>
    %16 = vector.shape_cast %15 : vector<1x128xf32> to vector<1x128xf32>
    %17 = vector.broadcast %16 : vector<1x128xf32> to vector<8x128xf32>
    %cst = arith.constant 0.000000e+00 : f32
    %18 = vector.broadcast %cst : f32 to vector<8x32xf32>
    %c0_15 = arith.constant 0 : index
    %c0_16 = arith.constant 0 : index
    %c0_17 = arith.constant 0 : index
    %19 = vector.load %arg1[%c0_15, %c0_16, %c0_17] : memref<10x8x128xf32, #tpu.memory_space<vmem>>, vector<1x8x128xf32>
    %20 = vector.shape_cast %19 : vector<1x8x128xf32> to vector<8x128xf32>
    %cst_18 = arith.constant dense<0.000000e+00> : vector<8x128xf32>
    %21 = tpu.matmul %18, %6, %cst_18 {dimension_numbers = #tpu.dot_dimension_numbers<[1], [0], [0], [1], [0, 0, 1, 1], [], []>} : vector<8x32xf32>, vector<32x128xf32>, vector<8x128xf32> -> vector<8x128xf32>
    %22 = arith.addf %20, %21 : vector<8x128xf32>
    %cst_19 = arith.constant 5.000000e-01 : f32
    %23 = vector.broadcast %cst_19 : f32 to vector<8x128xf32>
    %24 = arith.mulf %23, %22 : vector<8x128xf32>
    %25 = arith.select %5, %22, %24 : vector<8x128xi1>, vector<8x128xf32>
    %26 = math.tanh %25 : vector<8x128xf32>
    %cst_20 = arith.constant 5.000000e-01 : f32
    %27 = vector.broadcast %cst_20 : f32 to vector<8x128xf32>
    %28 = arith.mulf %27, %26 : vector<8x128xf32>
    %cst_21 = arith.constant 5.000000e-01 : f32
    %29 = vector.broadcast %cst_21 : f32 to vector<8x128xf32>
    %30 = arith.addf %28, %29 : vector<8x128xf32>
    %31 = arith.select %5, %26, %30 : vector<8x128xi1>, vector<8x128xf32>
    %32 = vector.extract_strided_slice %31 {offsets = [0, 0], sizes = [8, 32], strides = [1, 1]} : vector<8x128xf32> to vector<8x32xf32>
    %33 = vector.extract_strided_slice %31 {offsets = [0, 32], sizes = [8, 32], strides = [1, 1]} : vector<8x128xf32> to vector<8x32xf32>
    %34 = vector.extract_strided_slice %31 {offsets = [0, 64], sizes = [8, 32], strides = [1, 1]} : vector<8x128xf32> to vector<8x32xf32>
    %35 = vector.extract_strided_slice %31 {offsets = [0, 96], sizes = [8, 32], strides = [1, 1]} : vector<8x128xf32> to vector<8x32xf32>
    %36 = arith.mulf %33, %18 : vector<8x32xf32>
    %37 = arith.mulf %32, %34 : vector<8x32xf32>
    %38 = arith.addf %36, %37 : vector<8x32xf32>
    %39 = math.tanh %38 : vector<8x32xf32>
    %40 = arith.mulf %35, %39 : vector<8x32xf32>
    %cst_22 = arith.constant dense<0.000000e+00> : vector<8x128xf32>
    %41 = tpu.matmul %40, %7, %cst_22 {dimension_numbers = #tpu.dot_dimension_numbers<[1], [0], [0], [1], [0, 0, 1, 1], [], []>} : vector<8x32xf32>, vector<32x128xf32>, vector<8x128xf32> -> vector<8x128xf32>
    %cst_23 = arith.constant dense<0.000000e+00> : vector<8x128xf32>
    %42 = tpu.matmul %18, %8, %cst_23 {dimension_numbers = #tpu.dot_dimension_numbers<[1], [0], [0], [1], [0, 0, 1, 1], [], []>} : vector<8x32xf32>, vector<32x128xf32>, vector<8x128xf32> -> vector<8x128xf32>
    %43 = arith.addf %41, %42 : vector<8x128xf32>
    %44 = arith.addf %43, %14 : vector<8x128xf32>
    %cst_24 = arith.constant 5.000000e-01 : f32
    %45 = vector.broadcast %cst_24 : f32 to vector<8x128xf32>
    %46 = arith.mulf %45, %44 : vector<8x128xf32>
    %47 = arith.select %5, %44, %46 : vector<8x128xi1>, vector<8x128xf32>
    %48 = math.tanh %47 : vector<8x128xf32>
    %cst_25 = arith.constant 5.000000e-01 : f32
    %49 = vector.broadcast %cst_25 : f32 to vector<8x128xf32>
    %50 = arith.mulf %49, %48 : vector<8x128xf32>
    %cst_26 = arith.constant 5.000000e-01 : f32
    %51 = vector.broadcast %cst_26 : f32 to vector<8x128xf32>
    %52 = arith.addf %50, %51 : vector<8x128xf32>
    %53 = arith.select %5, %48, %52 : vector<8x128xi1>, vector<8x128xf32>
    %54 = vector.extract_strided_slice %53 {offsets = [0, 0], sizes = [8, 32], strides = [1, 1]} : vector<8x128xf32> to vector<8x32xf32>
    %55 = vector.extract_strided_slice %53 {offsets = [0, 32], sizes = [8, 32], strides = [1, 1]} : vector<8x128xf32> to vector<8x32xf32>
    %56 = vector.extract_strided_slice %53 {offsets = [0, 64], sizes = [8, 32], strides = [1, 1]} : vector<8x128xf32> to vector<8x32xf32>
    %57 = vector.extract_strided_slice %53 {offsets = [0, 96], sizes = [8, 32], strides = [1, 1]} : vector<8x128xf32> to vector<8x32xf32>
    %58 = arith.mulf %55, %18 : vector<8x32xf32>
    %59 = arith.mulf %54, %56 : vector<8x32xf32>
    %60 = arith.addf %58, %59 : vector<8x32xf32>
    %61 = math.tanh %60 : vector<8x32xf32>
    %62 = arith.mulf %57, %61 : vector<8x32xf32>
    %c0_27 = arith.constant 0 : index
    %c0_28 = arith.constant 0 : index
    %c0_29 = arith.constant 0 : index
    %63 = vector.load %arg6[%c0_27, %c0_28, %c0_29] : memref<10x8x1xf32, #tpu.memory_space<vmem>>, vector<1x8x1xf32>
    %64 = vector.shape_cast %63 : vector<1x8x1xf32> to vector<8x1xf32>
    %65 = vector.broadcast %64 : vector<8x1xf32> to vector<8x32xf32>
    %66 = arith.mulf %65, %62 : vector<8x32xf32>
    %67 = arith.addf %18, %66 : vector<8x32xf32>
    %c0_30 = arith.constant 0 : index
    %c0_31 = arith.constant 0 : index
    %c0_32 = arith.constant 0 : index
    %68 = vector.load %arg7[%c0_30, %c0_31, %c0_32] : memref<8x8x128xf32, #tpu.memory_space<vmem>>, vector<1x8x128xf32>
    %69 = vector.shape_cast %68 : vector<1x8x128xf32> to vector<8x128xf32>
    %cst_33 = arith.constant dense<0.000000e+00> : vector<8x128xf32>
    %70 = tpu.matmul %18, %9, %cst_33 {dimension_numbers = #tpu.dot_dimension_numbers<[1], [0], [0], [1], [0, 0, 1, 1], [], []>} : vector<8x32xf32>, vector<32x128xf32>, vector<8x128xf32> -> vector<8x128xf32>
    %71 = arith.addf %69, %70 : vector<8x128xf32>
    %cst_34 = arith.constant 5.000000e-01 : f32
    %72 = vector.broadcast %cst_34 : f32 to vector<8x128xf32>
    %73 = arith.mulf %72, %71 : vector<8x128xf32>
    %74 = arith.select %5, %71, %73 : vector<8x128xi1>, vector<8x128xf32>
    %75 = math.tanh %74 : vector<8x128xf32>
    %cst_35 = arith.constant 5.000000e-01 : f32
    %76 = vector.broadcast %cst_35 : f32 to vector<8x128xf32>
    %77 = arith.mulf %76, %75 : vector<8x128xf32>
    %cst_36 = arith.constant 5.000000e-01 : f32
    %78 = vector.broadcast %cst_36 : f32 to vector<8x128xf32>
    %79 = arith.addf %77, %78 : vector<8x128xf32>
    %80 = arith.select %5, %75, %79 : vector<8x128xi1>, vector<8x128xf32>
    %81 = vector.extract_strided_slice %80 {offsets = [0, 0], sizes = [8, 32], strides = [1, 1]} : vector<8x128xf32> to vector<8x32xf32>
    %82 = vector.extract_strided_slice %80 {offsets = [0, 32], sizes = [8, 32], strides = [1, 1]} : vector<8x128xf32> to vector<8x32xf32>
    %83 = vector.extract_strided_slice %80 {offsets = [0, 64], sizes = [8, 32], strides = [1, 1]} : vector<8x128xf32> to vector<8x32xf32>
    %84 = vector.extract_strided_slice %80 {offsets = [0, 96], sizes = [8, 32], strides = [1, 1]} : vector<8x128xf32> to vector<8x32xf32>
    %85 = arith.mulf %82, %18 : vector<8x32xf32>
    %86 = arith.mulf %81, %83 : vector<8x32xf32>
    %87 = arith.addf %85, %86 : vector<8x32xf32>
    %88 = math.tanh %87 : vector<8x32xf32>
    %89 = arith.mulf %84, %88 : vector<8x32xf32>
    %cst_37 = arith.constant dense<0.000000e+00> : vector<8x128xf32>
    %90 = tpu.matmul %89, %10, %cst_37 {dimension_numbers = #tpu.dot_dimension_numbers<[1], [0], [0], [1], [0, 0, 1, 1], [], []>} : vector<8x32xf32>, vector<32x128xf32>, vector<8x128xf32> -> vector<8x128xf32>
    %cst_38 = arith.constant dense<0.000000e+00> : vector<8x128xf32>
    %91 = tpu.matmul %18, %11, %cst_38 {dimension_numbers = #tpu.dot_dimension_numbers<[1], [0], [0], [1], [0, 0, 1, 1], [], []>} : vector<8x32xf32>, vector<32x128xf32>, vector<8x128xf32> -> vector<8x128xf32>
    %92 = arith.addf %90, %91 : vector<8x128xf32>
    %93 = arith.addf %92, %17 : vector<8x128xf32>
    %cst_39 = arith.constant 5.000000e-01 : f32
    %94 = vector.broadcast %cst_39 : f32 to vector<8x128xf32>
    %95 = arith.mulf %94, %93 : vector<8x128xf32>
    %96 = arith.select %5, %93, %95 : vector<8x128xi1>, vector<8x128xf32>
    %97 = math.tanh %96 : vector<8x128xf32>
    %cst_40 = arith.constant 5.000000e-01 : f32
    %98 = vector.broadcast %cst_40 : f32 to vector<8x128xf32>
    %99 = arith.mulf %98, %97 : vector<8x128xf32>
    %cst_41 = arith.constant 5.000000e-01 : f32
    %100 = vector.broadcast %cst_41 : f32 to vector<8x128xf32>
    %101 = arith.addf %99, %100 : vector<8x128xf32>
    %102 = arith.select %5, %97, %101 : vector<8x128xi1>, vector<8x128xf32>
    %103 = vector.extract_strided_slice %102 {offsets = [0, 0], sizes = [8, 32], strides = [1, 1]} : vector<8x128xf32> to vector<8x32xf32>
    %104 = vector.extract_strided_slice %102 {offsets = [0, 32], sizes = [8, 32], strides = [1, 1]} : vector<8x128xf32> to vector<8x32xf32>
    %105 = vector.extract_strided_slice %102 {offsets = [0, 64], sizes = [8, 32], strides = [1, 1]} : vector<8x128xf32> to vector<8x32xf32>
    %106 = vector.extract_strided_slice %102 {offsets = [0, 96], sizes = [8, 32], strides = [1, 1]} : vector<8x128xf32> to vector<8x32xf32>
    %107 = arith.mulf %104, %18 : vector<8x32xf32>
    %108 = arith.mulf %103, %105 : vector<8x32xf32>
    %109 = arith.addf %107, %108 : vector<8x32xf32>
    %110 = math.tanh %109 : vector<8x32xf32>
    %111 = arith.mulf %106, %110 : vector<8x32xf32>
    %c0_42 = arith.constant 0 : index
    %c0_43 = arith.constant 0 : index
    %c0_44 = arith.constant 0 : index
    %112 = vector.load %arg12[%c0_42, %c0_43, %c0_44] : memref<8x8x1xf32, #tpu.memory_space<vmem>>, vector<1x8x1xf32>
    %113 = vector.shape_cast %112 : vector<1x8x1xf32> to vector<8x1xf32>
    %114 = vector.broadcast %113 : vector<8x1xf32> to vector<8x32xf32>
    %115 = arith.mulf %114, %111 : vector<8x32xf32>
    %116 = arith.addf %18, %115 : vector<8x32xf32>
    %c1 = arith.constant 1 : index
    %c0_45 = arith.constant 0 : index
    %c0_46 = arith.constant 0 : index
    %117 = vector.load %arg1[%c1, %c0_45, %c0_46] : memref<10x8x128xf32, #tpu.memory_space<vmem>>, vector<1x8x128xf32>
    %118 = vector.shape_cast %117 : vector<1x8x128xf32> to vector<8x128xf32>
    %cst_47 = arith.constant dense<0.000000e+00> : vector<8x128xf32>
    %119 = tpu.matmul %40, %6, %cst_47 {dimension_numbers = #tpu.dot_dimension_numbers<[1], [0], [0], [1], [0, 0, 1, 1], [], []>} : vector<8x32xf32>, vector<32x128xf32>, vector<8x128xf32> -> vector<8x128xf32>
    %120 = arith.addf %118, %119 : vector<8x128xf32>
    %cst_48 = arith.constant 5.000000e-01 : f32
    %121 = vector.broadcast %cst_48 : f32 to vector<8x128xf32>
    %122 = arith.mulf %121, %120 : vector<8x128xf32>
    %123 = arith.select %5, %120, %122 : vector<8x128xi1>, vector<8x128xf32>
    %124 = math.tanh %123 : vector<8x128xf32>
    %cst_49 = arith.constant 5.000000e-01 : f32
    %125 = vector.broadcast %cst_49 : f32 to vector<8x128xf32>
    %126 = arith.mulf %125, %124 : vector<8x128xf32>
    %cst_50 = arith.constant 5.000000e-01 : f32
    %127 = vector.broadcast %cst_50 : f32 to vector<8x128xf32>
    %128 = arith.addf %126, %127 : vector<8x128xf32>
    %129 = arith.select %5, %124, %128 : vector<8x128xi1>, vector<8x128xf32>
    %130 = vector.extract_strided_slice %129 {offsets = [0, 0], sizes = [8, 32], strides = [1, 1]} : vector<8x128xf32> to vector<8x32xf32>
    %131 = vector.extract_strided_slice %129 {offsets = [0, 32], sizes = [8, 32], strides = [1, 1]} : vector<8x128xf32> to vector<8x32xf32>
    %132 = vector.extract_strided_slice %129 {offsets = [0, 64], sizes = [8, 32], strides = [1, 1]} : vector<8x128xf32> to vector<8x32xf32>
    %133 = vector.extract_strided_slice %129 {offsets = [0, 96], sizes = [8, 32], strides = [1, 1]} : vector<8x128xf32> to vector<8x32xf32>
    %134 = arith.mulf %131, %38 : vector<8x32xf32>
    %135 = arith.mulf %130, %132 : vector<8x32xf32>
    %136 = arith.addf %134, %135 : vector<8x32xf32>
    %137 = math.tanh %136 : vector<8x32xf32>
    %138 = arith.mulf %133, %137 : vector<8x32xf32>
    %cst_51 = arith.constant dense<0.000000e+00> : vector<8x128xf32>
    %139 = tpu.matmul %138, %7, %cst_51 {dimension_numbers = #tpu.dot_dimension_numbers<[1], [0], [0], [1], [0, 0, 1, 1], [], []>} : vector<8x32xf32>, vector<32x128xf32>, vector<8x128xf32> -> vector<8x128xf32>
    %cst_52 = arith.constant dense<0.000000e+00> : vector<8x128xf32>
    %140 = tpu.matmul %62, %8, %cst_52 {dimension_numbers = #tpu.dot_dimension_numbers<[1], [0], [0], [1], [0, 0, 1, 1], [], []>} : vector<8x32xf32>, vector<32x128xf32>, vector<8x128xf32> -> vector<8x128xf32>
    %141 = arith.addf %139, %140 : vector<8x128xf32>
    %142 = arith.addf %141, %14 : vector<8x128xf32>
    %cst_53 = arith.constant 5.000000e-01 : f32
    %143 = vector.broadcast %cst_53 : f32 to vector<8x128xf32>
    %144 = arith.mulf %143, %142 : vector<8x128xf32>
    %145 = arith.select %5, %142, %144 : vector<8x128xi1>, vector<8x128xf32>
    %146 = math.tanh %145 : vector<8x128xf32>
    %cst_54 = arith.constant 5.000000e-01 : f32
    %147 = vector.broadcast %cst_54 : f32 to vector<8x128xf32>
    %148 = arith.mulf %147, %146 : vector<8x128xf32>
    %cst_55 = arith.constant 5.000000e-01 : f32
    %149 = vector.broadcast %cst_55 : f32 to vector<8x128xf32>
    %150 = arith.addf %148, %149 : vector<8x128xf32>
    %151 = arith.select %5, %146, %150 : vector<8x128xi1>, vector<8x128xf32>
    %152 = vector.extract_strided_slice %151 {offsets = [0, 0], sizes = [8, 32], strides = [1, 1]} : vector<8x128xf32> to vector<8x32xf32>
    %153 = vector.extract_strided_slice %151 {offsets = [0, 32], sizes = [8, 32], strides = [1, 1]} : vector<8x128xf32> to vector<8x32xf32>
    %154 = vector.extract_strided_slice %151 {offsets = [0, 64], sizes = [8, 32], strides = [1, 1]} : vector<8x128xf32> to vector<8x32xf32>
    %155 = vector.extract_strided_slice %151 {offsets = [0, 96], sizes = [8, 32], strides = [1, 1]} : vector<8x128xf32> to vector<8x32xf32>
    %156 = arith.mulf %153, %60 : vector<8x32xf32>
    %157 = arith.mulf %152, %154 : vector<8x32xf32>
    %158 = arith.addf %156, %157 : vector<8x32xf32>
    %159 = math.tanh %158 : vector<8x32xf32>
    %160 = arith.mulf %155, %159 : vector<8x32xf32>
    %c1_56 = arith.constant 1 : index
    %c0_57 = arith.constant 0 : index
    %c0_58 = arith.constant 0 : index
    %161 = vector.load %arg6[%c1_56, %c0_57, %c0_58] : memref<10x8x1xf32, #tpu.memory_space<vmem>>, vector<1x8x1xf32>
    %162 = vector.shape_cast %161 : vector<1x8x1xf32> to vector<8x1xf32>
    %163 = vector.broadcast %162 : vector<8x1xf32> to vector<8x32xf32>
    %164 = arith.mulf %163, %160 : vector<8x32xf32>
    %165 = arith.addf %67, %164 : vector<8x32xf32>
    %c1_59 = arith.constant 1 : index
    %c0_60 = arith.constant 0 : index
    %c0_61 = arith.constant 0 : index
    %166 = vector.load %arg7[%c1_59, %c0_60, %c0_61] : memref<8x8x128xf32, #tpu.memory_space<vmem>>, vector<1x8x128xf32>
    %167 = vector.shape_cast %166 : vector<1x8x128xf32> to vector<8x128xf32>
    %cst_62 = arith.constant dense<0.000000e+00> : vector<8x128xf32>
    %168 = tpu.matmul %89, %9, %cst_62 {dimension_numbers = #tpu.dot_dimension_numbers<[1], [0], [0], [1], [0, 0, 1, 1], [], []>} : vector<8x32xf32>, vector<32x128xf32>, vector<8x128xf32> -> vector<8x128xf32>
    %169 = arith.addf %167, %168 : vector<8x128xf32>
    %cst_63 = arith.constant 5.000000e-01 : f32
    %170 = vector.broadcast %cst_63 : f32 to vector<8x128xf32>
    %171 = arith.mulf %170, %169 : vector<8x128xf32>
    %172 = arith.select %5, %169, %171 : vector<8x128xi1>, vector<8x128xf32>
    %173 = math.tanh %172 : vector<8x128xf32>
    %cst_64 = arith.constant 5.000000e-01 : f32
    %174 = vector.broadcast %cst_64 : f32 to vector<8x128xf32>
    %175 = arith.mulf %174, %173 : vector<8x128xf32>
    %cst_65 = arith.constant 5.000000e-01 : f32
    %176 = vector.broadcast %cst_65 : f32 to vector<8x128xf32>
    %177 = arith.addf %175, %176 : vector<8x128xf32>
    %178 = arith.select %5, %173, %177 : vector<8x128xi1>, vector<8x128xf32>
    %179 = vector.extract_strided_slice %178 {offsets = [0, 0], sizes = [8, 32], strides = [1, 1]} : vector<8x128xf32> to vector<8x32xf32>
    %180 = vector.extract_strided_slice %178 {offsets = [0, 32], sizes = [8, 32], strides = [1, 1]} : vector<8x128xf32> to vector<8x32xf32>
    %181 = vector.extract_strided_slice %178 {offsets = [0, 64], sizes = [8, 32], strides = [1, 1]} : vector<8x128xf32> to vector<8x32xf32>
    %182 = vector.extract_strided_slice %178 {offsets = [0, 96], sizes = [8, 32], strides = [1, 1]} : vector<8x128xf32> to vector<8x32xf32>
    %183 = arith.mulf %180, %87 : vector<8x32xf32>
    %184 = arith.mulf %179, %181 : vector<8x32xf32>
    %185 = arith.addf %183, %184 : vector<8x32xf32>
    %186 = math.tanh %185 : vector<8x32xf32>
    %187 = arith.mulf %182, %186 : vector<8x32xf32>
    %cst_66 = arith.constant dense<0.000000e+00> : vector<8x128xf32>
    %188 = tpu.matmul %187, %10, %cst_66 {dimension_numbers = #tpu.dot_dimension_numbers<[1], [0], [0], [1], [0, 0, 1, 1], [], []>} : vector<8x32xf32>, vector<32x128xf32>, vector<8x128xf32> -> vector<8x128xf32>
    %cst_67 = arith.constant dense<0.000000e+00> : vector<8x128xf32>
    %189 = tpu.matmul %111, %11, %cst_67 {dimension_numbers = #tpu.dot_dimension_numbers<[1], [0], [0], [1], [0, 0, 1, 1], [], []>} : vector<8x32xf32>, vector<32x128xf32>, vector<8x128xf32> -> vector<8x128xf32>
    %190 = arith.addf %188, %189 : vector<8x128xf32>
    %191 = arith.addf %190, %17 : vector<8x128xf32>
    %cst_68 = arith.constant 5.000000e-01 : f32
    %192 = vector.broadcast %cst_68 : f32 to vector<8x128xf32>
    %193 = arith.mulf %192, %191 : vector<8x128xf32>
    %194 = arith.select %5, %191, %193 : vector<8x128xi1>, vector<8x128xf32>
    %195 = math.tanh %194 : vector<8x128xf32>
    %cst_69 = arith.constant 5.000000e-01 : f32
    %196 = vector.broadcast %cst_69 : f32 to vector<8x128xf32>
    %197 = arith.mulf %196, %195 : vector<8x128xf32>
    %cst_70 = arith.constant 5.000000e-01 : f32
    %198 = vector.broadcast %cst_70 : f32 to vector<8x128xf32>
    %199 = arith.addf %197, %198 : vector<8x128xf32>
    %200 = arith.select %5, %195, %199 : vector<8x128xi1>, vector<8x128xf32>
    %201 = vector.extract_strided_slice %200 {offsets = [0, 0], sizes = [8, 32], strides = [1, 1]} : vector<8x128xf32> to vector<8x32xf32>
    %202 = vector.extract_strided_slice %200 {offsets = [0, 32], sizes = [8, 32], strides = [1, 1]} : vector<8x128xf32> to vector<8x32xf32>
    %203 = vector.extract_strided_slice %200 {offsets = [0, 64], sizes = [8, 32], strides = [1, 1]} : vector<8x128xf32> to vector<8x32xf32>
    %204 = vector.extract_strided_slice %200 {offsets = [0, 96], sizes = [8, 32], strides = [1, 1]} : vector<8x128xf32> to vector<8x32xf32>
    %205 = arith.mulf %202, %109 : vector<8x32xf32>
    %206 = arith.mulf %201, %203 : vector<8x32xf32>
    %207 = arith.addf %205, %206 : vector<8x32xf32>
    %208 = math.tanh %207 : vector<8x32xf32>
    %209 = arith.mulf %204, %208 : vector<8x32xf32>
    %c1_71 = arith.constant 1 : index
    %c0_72 = arith.constant 0 : index
    %c0_73 = arith.constant 0 : index
    %210 = vector.load %arg12[%c1_71, %c0_72, %c0_73] : memref<8x8x1xf32, #tpu.memory_space<vmem>>, vector<1x8x1xf32>
    %211 = vector.shape_cast %210 : vector<1x8x1xf32> to vector<8x1xf32>
    %212 = vector.broadcast %211 : vector<8x1xf32> to vector<8x32xf32>
    %213 = arith.mulf %212, %209 : vector<8x32xf32>
    %214 = arith.addf %116, %213 : vector<8x32xf32>
    %c2 = arith.constant 2 : index
    %c0_74 = arith.constant 0 : index
    %c0_75 = arith.constant 0 : index
    %215 = vector.load %arg1[%c2, %c0_74, %c0_75] : memref<10x8x128xf32, #tpu.memory_space<vmem>>, vector<1x8x128xf32>
    %216 = vector.shape_cast %215 : vector<1x8x128xf32> to vector<8x128xf32>
    %cst_76 = arith.constant dense<0.000000e+00> : vector<8x128xf32>
    %217 = tpu.matmul %138, %6, %cst_76 {dimension_numbers = #tpu.dot_dimension_numbers<[1], [0], [0], [1], [0, 0, 1, 1], [], []>} : vector<8x32xf32>, vector<32x128xf32>, vector<8x128xf32> -> vector<8x128xf32>
    %218 = arith.addf %216, %217 : vector<8x128xf32>
    %cst_77 = arith.constant 5.000000e-01 : f32
    %219 = vector.broadcast %cst_77 : f32 to vector<8x128xf32>
    %220 = arith.mulf %219, %218 : vector<8x128xf32>
    %221 = arith.select %5, %218, %220 : vector<8x128xi1>, vector<8x128xf32>
    %222 = math.tanh %221 : vector<8x128xf32>
    %cst_78 = arith.constant 5.000000e-01 : f32
    %223 = vector.broadcast %cst_78 : f32 to vector<8x128xf32>
    %224 = arith.mulf %223, %222 : vector<8x128xf32>
    %cst_79 = arith.constant 5.000000e-01 : f32
    %225 = vector.broadcast %cst_79 : f32 to vector<8x128xf32>
    %226 = arith.addf %224, %225 : vector<8x128xf32>
    %227 = arith.select %5, %222, %226 : vector<8x128xi1>, vector<8x128xf32>
    %228 = vector.extract_strided_slice %227 {offsets = [0, 0], sizes = [8, 32], strides = [1, 1]} : vector<8x128xf32> to vector<8x32xf32>
    %229 = vector.extract_strided_slice %227 {offsets = [0, 32], sizes = [8, 32], strides = [1, 1]} : vector<8x128xf32> to vector<8x32xf32>
    %230 = vector.extract_strided_slice %227 {offsets = [0, 64], sizes = [8, 32], strides = [1, 1]} : vector<8x128xf32> to vector<8x32xf32>
    %231 = vector.extract_strided_slice %227 {offsets = [0, 96], sizes = [8, 32], strides = [1, 1]} : vector<8x128xf32> to vector<8x32xf32>
    %232 = arith.mulf %229, %136 : vector<8x32xf32>
    %233 = arith.mulf %228, %230 : vector<8x32xf32>
    %234 = arith.addf %232, %233 : vector<8x32xf32>
    %235 = math.tanh %234 : vector<8x32xf32>
    %236 = arith.mulf %231, %235 : vector<8x32xf32>
    %cst_80 = arith.constant dense<0.000000e+00> : vector<8x128xf32>
    %237 = tpu.matmul %236, %7, %cst_80 {dimension_numbers = #tpu.dot_dimension_numbers<[1], [0], [0], [1], [0, 0, 1, 1], [], []>} : vector<8x32xf32>, vector<32x128xf32>, vector<8x128xf32> -> vector<8x128xf32>
    %cst_81 = arith.constant dense<0.000000e+00> : vector<8x128xf32>
    %238 = tpu.matmul %160, %8, %cst_81 {dimension_numbers = #tpu.dot_dimension_numbers<[1], [0], [0], [1], [0, 0, 1, 1], [], []>} : vector<8x32xf32>, vector<32x128xf32>, vector<8x128xf32> -> vector<8x128xf32>
    %239 = arith.addf %237, %238 : vector<8x128xf32>
    %240 = arith.addf %239, %14 : vector<8x128xf32>
    %cst_82 = arith.constant 5.000000e-01 : f32
    %241 = vector.broadcast %cst_82 : f32 to vector<8x128xf32>
    %242 = arith.mulf %241, %240 : vector<8x128xf32>
    %243 = arith.select %5, %240, %242 : vector<8x128xi1>, vector<8x128xf32>
    %244 = math.tanh %243 : vector<8x128xf32>
    %cst_83 = arith.constant 5.000000e-01 : f32
    %245 = vector.broadcast %cst_83 : f32 to vector<8x128xf32>
    %246 = arith.mulf %245, %244 : vector<8x128xf32>
    %cst_84 = arith.constant 5.000000e-01 : f32
    %247 = vector.broadcast %cst_84 : f32 to vector<8x128xf32>
    %248 = arith.addf %246, %247 : vector<8x128xf32>
    %249 = arith.select %5, %244, %248 : vector<8x128xi1>, vector<8x128xf32>
    %250 = vector.extract_strided_slice %249 {offsets = [0, 0], sizes = [8, 32], strides = [1, 1]} : vector<8x128xf32> to vector<8x32xf32>
    %251 = vector.extract_strided_slice %249 {offsets = [0, 32], sizes = [8, 32], strides = [1, 1]} : vector<8x128xf32> to vector<8x32xf32>
    %252 = vector.extract_strided_slice %249 {offsets = [0, 64], sizes = [8, 32], strides = [1, 1]} : vector<8x128xf32> to vector<8x32xf32>
    %253 = vector.extract_strided_slice %249 {offsets = [0, 96], sizes = [8, 32], strides = [1, 1]} : vector<8x128xf32> to vector<8x32xf32>
    %254 = arith.mulf %251, %158 : vector<8x32xf32>
    %255 = arith.mulf %250, %252 : vector<8x32xf32>
    %256 = arith.addf %254, %255 : vector<8x32xf32>
    %257 = math.tanh %256 : vector<8x32xf32>
    %258 = arith.mulf %253, %257 : vector<8x32xf32>
    %c2_85 = arith.constant 2 : index
    %c0_86 = arith.constant 0 : index
    %c0_87 = arith.constant 0 : index
    %259 = vector.load %arg6[%c2_85, %c0_86, %c0_87] : memref<10x8x1xf32, #tpu.memory_space<vmem>>, vector<1x8x1xf32>
    %260 = vector.shape_cast %259 : vector<1x8x1xf32> to vector<8x1xf32>
    %261 = vector.broadcast %260 : vector<8x1xf32> to vector<8x32xf32>
    %262 = arith.mulf %261, %258 : vector<8x32xf32>
    %263 = arith.addf %165, %262 : vector<8x32xf32>
    %c2_88 = arith.constant 2 : index
    %c0_89 = arith.constant 0 : index
    %c0_90 = arith.constant 0 : index
    %264 = vector.load %arg7[%c2_88, %c0_89, %c0_90] : memref<8x8x128xf32, #tpu.memory_space<vmem>>, vector<1x8x128xf32>
    %265 = vector.shape_cast %264 : vector<1x8x128xf32> to vector<8x128xf32>
    %cst_91 = arith.constant dense<0.000000e+00> : vector<8x128xf32>
    %266 = tpu.matmul %187, %9, %cst_91 {dimension_numbers = #tpu.dot_dimension_numbers<[1], [0], [0], [1], [0, 0, 1, 1], [], []>} : vector<8x32xf32>, vector<32x128xf32>, vector<8x128xf32> -> vector<8x128xf32>
    %267 = arith.addf %265, %266 : vector<8x128xf32>
    %cst_92 = arith.constant 5.000000e-01 : f32
    %268 = vector.broadcast %cst_92 : f32 to vector<8x128xf32>
    %269 = arith.mulf %268, %267 : vector<8x128xf32>
    %270 = arith.select %5, %267, %269 : vector<8x128xi1>, vector<8x128xf32>
    %271 = math.tanh %270 : vector<8x128xf32>
    %cst_93 = arith.constant 5.000000e-01 : f32
    %272 = vector.broadcast %cst_93 : f32 to vector<8x128xf32>
    %273 = arith.mulf %272, %271 : vector<8x128xf32>
    %cst_94 = arith.constant 5.000000e-01 : f32
    %274 = vector.broadcast %cst_94 : f32 to vector<8x128xf32>
    %275 = arith.addf %273, %274 : vector<8x128xf32>
    %276 = arith.select %5, %271, %275 : vector<8x128xi1>, vector<8x128xf32>
    %277 = vector.extract_strided_slice %276 {offsets = [0, 0], sizes = [8, 32], strides = [1, 1]} : vector<8x128xf32> to vector<8x32xf32>
    %278 = vector.extract_strided_slice %276 {offsets = [0, 32], sizes = [8, 32], strides = [1, 1]} : vector<8x128xf32> to vector<8x32xf32>
    %279 = vector.extract_strided_slice %276 {offsets = [0, 64], sizes = [8, 32], strides = [1, 1]} : vector<8x128xf32> to vector<8x32xf32>
    %280 = vector.extract_strided_slice %276 {offsets = [0, 96], sizes = [8, 32], strides = [1, 1]} : vector<8x128xf32> to vector<8x32xf32>
    %281 = arith.mulf %278, %185 : vector<8x32xf32>
    %282 = arith.mulf %277, %279 : vector<8x32xf32>
    %283 = arith.addf %281, %282 : vector<8x32xf32>
    %284 = math.tanh %283 : vector<8x32xf32>
    %285 = arith.mulf %280, %284 : vector<8x32xf32>
    %cst_95 = arith.constant dense<0.000000e+00> : vector<8x128xf32>
    %286 = tpu.matmul %285, %10, %cst_95 {dimension_numbers = #tpu.dot_dimension_numbers<[1], [0], [0], [1], [0, 0, 1, 1], [], []>} : vector<8x32xf32>, vector<32x128xf32>, vector<8x128xf32> -> vector<8x128xf32>
    %cst_96 = arith.constant dense<0.000000e+00> : vector<8x128xf32>
    %287 = tpu.matmul %209, %11, %cst_96 {dimension_numbers = #tpu.dot_dimension_numbers<[1], [0], [0], [1], [0, 0, 1, 1], [], []>} : vector<8x32xf32>, vector<32x128xf32>, vector<8x128xf32> -> vector<8x128xf32>
    %288 = arith.addf %286, %287 : vector<8x128xf32>
    %289 = arith.addf %288, %17 : vector<8x128xf32>
    %cst_97 = arith.constant 5.000000e-01 : f32
    %290 = vector.broadcast %cst_97 : f32 to vector<8x128xf32>
    %291 = arith.mulf %290, %289 : vector<8x128xf32>
    %292 = arith.select %5, %289, %291 : vector<8x128xi1>, vector<8x128xf32>
    %293 = math.tanh %292 : vector<8x128xf32>
    %cst_98 = arith.constant 5.000000e-01 : f32
    %294 = vector.broadcast %cst_98 : f32 to vector<8x128xf32>
    %295 = arith.mulf %294, %293 : vector<8x128xf32>
    %cst_99 = arith.constant 5.000000e-01 : f32
    %296 = vector.broadcast %cst_99 : f32 to vector<8x128xf32>
    %297 = arith.addf %295, %296 : vector<8x128xf32>
    %298 = arith.select %5, %293, %297 : vector<8x128xi1>, vector<8x128xf32>
    %299 = vector.extract_strided_slice %298 {offsets = [0, 0], sizes = [8, 32], strides = [1, 1]} : vector<8x128xf32> to vector<8x32xf32>
    %300 = vector.extract_strided_slice %298 {offsets = [0, 32], sizes = [8, 32], strides = [1, 1]} : vector<8x128xf32> to vector<8x32xf32>
    %301 = vector.extract_strided_slice %298 {offsets = [0, 64], sizes = [8, 32], strides = [1, 1]} : vector<8x128xf32> to vector<8x32xf32>
    %302 = vector.extract_strided_slice %298 {offsets = [0, 96], sizes = [8, 32], strides = [1, 1]} : vector<8x128xf32> to vector<8x32xf32>
    %303 = arith.mulf %300, %207 : vector<8x32xf32>
    %304 = arith.mulf %299, %301 : vector<8x32xf32>
    %305 = arith.addf %303, %304 : vector<8x32xf32>
    %306 = math.tanh %305 : vector<8x32xf32>
    %307 = arith.mulf %302, %306 : vector<8x32xf32>
    %c2_100 = arith.constant 2 : index
    %c0_101 = arith.constant 0 : index
    %c0_102 = arith.constant 0 : index
    %308 = vector.load %arg12[%c2_100, %c0_101, %c0_102] : memref<8x8x1xf32, #tpu.memory_space<vmem>>, vector<1x8x1xf32>
    %309 = vector.shape_cast %308 : vector<1x8x1xf32> to vector<8x1xf32>
    %310 = vector.broadcast %309 : vector<8x1xf32> to vector<8x32xf32>
    %311 = arith.mulf %310, %307 : vector<8x32xf32>
    %312 = arith.addf %214, %311 : vector<8x32xf32>
    %c3 = arith.constant 3 : index
    %c0_103 = arith.constant 0 : index
    %c0_104 = arith.constant 0 : index
    %313 = vector.load %arg1[%c3, %c0_103, %c0_104] : memref<10x8x128xf32, #tpu.memory_space<vmem>>, vector<1x8x128xf32>
    %314 = vector.shape_cast %313 : vector<1x8x128xf32> to vector<8x128xf32>
    %cst_105 = arith.constant dense<0.000000e+00> : vector<8x128xf32>
    %315 = tpu.matmul %236, %6, %cst_105 {dimension_numbers = #tpu.dot_dimension_numbers<[1], [0], [0], [1], [0, 0, 1, 1], [], []>} : vector<8x32xf32>, vector<32x128xf32>, vector<8x128xf32> -> vector<8x128xf32>
    %316 = arith.addf %314, %315 : vector<8x128xf32>
    %cst_106 = arith.constant 5.000000e-01 : f32
    %317 = vector.broadcast %cst_106 : f32 to vector<8x128xf32>
    %318 = arith.mulf %317, %316 : vector<8x128xf32>
    %319 = arith.select %5, %316, %318 : vector<8x128xi1>, vector<8x128xf32>
    %320 = math.tanh %319 : vector<8x128xf32>
    %cst_107 = arith.constant 5.000000e-01 : f32
    %321 = vector.broadcast %cst_107 : f32 to vector<8x128xf32>
    %322 = arith.mulf %321, %320 : vector<8x128xf32>
    %cst_108 = arith.constant 5.000000e-01 : f32
    %323 = vector.broadcast %cst_108 : f32 to vector<8x128xf32>
    %324 = arith.addf %322, %323 : vector<8x128xf32>
    %325 = arith.select %5, %320, %324 : vector<8x128xi1>, vector<8x128xf32>
    %326 = vector.extract_strided_slice %325 {offsets = [0, 0], sizes = [8, 32], strides = [1, 1]} : vector<8x128xf32> to vector<8x32xf32>
    %327 = vector.extract_strided_slice %325 {offsets = [0, 32], sizes = [8, 32], strides = [1, 1]} : vector<8x128xf32> to vector<8x32xf32>
    %328 = vector.extract_strided_slice %325 {offsets = [0, 64], sizes = [8, 32], strides = [1, 1]} : vector<8x128xf32> to vector<8x32xf32>
    %329 = vector.extract_strided_slice %325 {offsets = [0, 96], sizes = [8, 32], strides = [1, 1]} : vector<8x128xf32> to vector<8x32xf32>
    %330 = arith.mulf %327, %234 : vector<8x32xf32>
    %331 = arith.mulf %326, %328 : vector<8x32xf32>
    %332 = arith.addf %330, %331 : vector<8x32xf32>
    %333 = math.tanh %332 : vector<8x32xf32>
    %334 = arith.mulf %329, %333 : vector<8x32xf32>
    %cst_109 = arith.constant dense<0.000000e+00> : vector<8x128xf32>
    %335 = tpu.matmul %334, %7, %cst_109 {dimension_numbers = #tpu.dot_dimension_numbers<[1], [0], [0], [1], [0, 0, 1, 1], [], []>} : vector<8x32xf32>, vector<32x128xf32>, vector<8x128xf32> -> vector<8x128xf32>
    %cst_110 = arith.constant dense<0.000000e+00> : vector<8x128xf32>
    %336 = tpu.matmul %258, %8, %cst_110 {dimension_numbers = #tpu.dot_dimension_numbers<[1], [0], [0], [1], [0, 0, 1, 1], [], []>} : vector<8x32xf32>, vector<32x128xf32>, vector<8x128xf32> -> vector<8x128xf32>
    %337 = arith.addf %335, %336 : vector<8x128xf32>
    %338 = arith.addf %337, %14 : vector<8x128xf32>
    %cst_111 = arith.constant 5.000000e-01 : f32
    %339 = vector.broadcast %cst_111 : f32 to vector<8x128xf32>
    %340 = arith.mulf %339, %338 : vector<8x128xf32>
    %341 = arith.select %5, %338, %340 : vector<8x128xi1>, vector<8x128xf32>
    %342 = math.tanh %341 : vector<8x128xf32>
    %cst_112 = arith.constant 5.000000e-01 : f32
    %343 = vector.broadcast %cst_112 : f32 to vector<8x128xf32>
    %344 = arith.mulf %343, %342 : vector<8x128xf32>
    %cst_113 = arith.constant 5.000000e-01 : f32
    %345 = vector.broadcast %cst_113 : f32 to vector<8x128xf32>
    %346 = arith.addf %344, %345 : vector<8x128xf32>
    %347 = arith.select %5, %342, %346 : vector<8x128xi1>, vector<8x128xf32>
    %348 = vector.extract_strided_slice %347 {offsets = [0, 0], sizes = [8, 32], strides = [1, 1]} : vector<8x128xf32> to vector<8x32xf32>
    %349 = vector.extract_strided_slice %347 {offsets = [0, 32], sizes = [8, 32], strides = [1, 1]} : vector<8x128xf32> to vector<8x32xf32>
    %350 = vector.extract_strided_slice %347 {offsets = [0, 64], sizes = [8, 32], strides = [1, 1]} : vector<8x128xf32> to vector<8x32xf32>
    %351 = vector.extract_strided_slice %347 {offsets = [0, 96], sizes = [8, 32], strides = [1, 1]} : vector<8x128xf32> to vector<8x32xf32>
    %352 = arith.mulf %349, %256 : vector<8x32xf32>
    %353 = arith.mulf %348, %350 : vector<8x32xf32>
    %354 = arith.addf %352, %353 : vector<8x32xf32>
    %355 = math.tanh %354 : vector<8x32xf32>
    %356 = arith.mulf %351, %355 : vector<8x32xf32>
    %c3_114 = arith.constant 3 : index
    %c0_115 = arith.constant 0 : index
    %c0_116 = arith.constant 0 : index
    %357 = vector.load %arg6[%c3_114, %c0_115, %c0_116] : memref<10x8x1xf32, #tpu.memory_space<vmem>>, vector<1x8x1xf32>
    %358 = vector.shape_cast %357 : vector<1x8x1xf32> to vector<8x1xf32>
    %359 = vector.broadcast %358 : vector<8x1xf32> to vector<8x32xf32>
    %360 = arith.mulf %359, %356 : vector<8x32xf32>
    %361 = arith.addf %263, %360 : vector<8x32xf32>
    %c3_117 = arith.constant 3 : index
    %c0_118 = arith.constant 0 : index
    %c0_119 = arith.constant 0 : index
    %362 = vector.load %arg7[%c3_117, %c0_118, %c0_119] : memref<8x8x128xf32, #tpu.memory_space<vmem>>, vector<1x8x128xf32>
    %363 = vector.shape_cast %362 : vector<1x8x128xf32> to vector<8x128xf32>
    %cst_120 = arith.constant dense<0.000000e+00> : vector<8x128xf32>
    %364 = tpu.matmul %285, %9, %cst_120 {dimension_numbers = #tpu.dot_dimension_numbers<[1], [0], [0], [1], [0, 0, 1, 1], [], []>} : vector<8x32xf32>, vector<32x128xf32>, vector<8x128xf32> -> vector<8x128xf32>
    %365 = arith.addf %363, %364 : vector<8x128xf32>
    %cst_121 = arith.constant 5.000000e-01 : f32
    %366 = vector.broadcast %cst_121 : f32 to vector<8x128xf32>
    %367 = arith.mulf %366, %365 : vector<8x128xf32>
    %368 = arith.select %5, %365, %367 : vector<8x128xi1>, vector<8x128xf32>
    %369 = math.tanh %368 : vector<8x128xf32>
    %cst_122 = arith.constant 5.000000e-01 : f32
    %370 = vector.broadcast %cst_122 : f32 to vector<8x128xf32>
    %371 = arith.mulf %370, %369 : vector<8x128xf32>
    %cst_123 = arith.constant 5.000000e-01 : f32
    %372 = vector.broadcast %cst_123 : f32 to vector<8x128xf32>
    %373 = arith.addf %371, %372 : vector<8x128xf32>
    %374 = arith.select %5, %369, %373 : vector<8x128xi1>, vector<8x128xf32>
    %375 = vector.extract_strided_slice %374 {offsets = [0, 0], sizes = [8, 32], strides = [1, 1]} : vector<8x128xf32> to vector<8x32xf32>
    %376 = vector.extract_strided_slice %374 {offsets = [0, 32], sizes = [8, 32], strides = [1, 1]} : vector<8x128xf32> to vector<8x32xf32>
    %377 = vector.extract_strided_slice %374 {offsets = [0, 64], sizes = [8, 32], strides = [1, 1]} : vector<8x128xf32> to vector<8x32xf32>
    %378 = vector.extract_strided_slice %374 {offsets = [0, 96], sizes = [8, 32], strides = [1, 1]} : vector<8x128xf32> to vector<8x32xf32>
    %379 = arith.mulf %376, %283 : vector<8x32xf32>
    %380 = arith.mulf %375, %377 : vector<8x32xf32>
    %381 = arith.addf %379, %380 : vector<8x32xf32>
    %382 = math.tanh %381 : vector<8x32xf32>
    %383 = arith.mulf %378, %382 : vector<8x32xf32>
    %cst_124 = arith.constant dense<0.000000e+00> : vector<8x128xf32>
    %384 = tpu.matmul %383, %10, %cst_124 {dimension_numbers = #tpu.dot_dimension_numbers<[1], [0], [0], [1], [0, 0, 1, 1], [], []>} : vector<8x32xf32>, vector<32x128xf32>, vector<8x128xf32> -> vector<8x128xf32>
    %cst_125 = arith.constant dense<0.000000e+00> : vector<8x128xf32>
    %385 = tpu.matmul %307, %11, %cst_125 {dimension_numbers = #tpu.dot_dimension_numbers<[1], [0], [0], [1], [0, 0, 1, 1], [], []>} : vector<8x32xf32>, vector<32x128xf32>, vector<8x128xf32> -> vector<8x128xf32>
    %386 = arith.addf %384, %385 : vector<8x128xf32>
    %387 = arith.addf %386, %17 : vector<8x128xf32>
    %cst_126 = arith.constant 5.000000e-01 : f32
    %388 = vector.broadcast %cst_126 : f32 to vector<8x128xf32>
    %389 = arith.mulf %388, %387 : vector<8x128xf32>
    %390 = arith.select %5, %387, %389 : vector<8x128xi1>, vector<8x128xf32>
    %391 = math.tanh %390 : vector<8x128xf32>
    %cst_127 = arith.constant 5.000000e-01 : f32
    %392 = vector.broadcast %cst_127 : f32 to vector<8x128xf32>
    %393 = arith.mulf %392, %391 : vector<8x128xf32>
    %cst_128 = arith.constant 5.000000e-01 : f32
    %394 = vector.broadcast %cst_128 : f32 to vector<8x128xf32>
    %395 = arith.addf %393, %394 : vector<8x128xf32>
    %396 = arith.select %5, %391, %395 : vector<8x128xi1>, vector<8x128xf32>
    %397 = vector.extract_strided_slice %396 {offsets = [0, 0], sizes = [8, 32], strides = [1, 1]} : vector<8x128xf32> to vector<8x32xf32>
    %398 = vector.extract_strided_slice %396 {offsets = [0, 32], sizes = [8, 32], strides = [1, 1]} : vector<8x128xf32> to vector<8x32xf32>
    %399 = vector.extract_strided_slice %396 {offsets = [0, 64], sizes = [8, 32], strides = [1, 1]} : vector<8x128xf32> to vector<8x32xf32>
    %400 = vector.extract_strided_slice %396 {offsets = [0, 96], sizes = [8, 32], strides = [1, 1]} : vector<8x128xf32> to vector<8x32xf32>
    %401 = arith.mulf %398, %305 : vector<8x32xf32>
    %402 = arith.mulf %397, %399 : vector<8x32xf32>
    %403 = arith.addf %401, %402 : vector<8x32xf32>
    %404 = math.tanh %403 : vector<8x32xf32>
    %405 = arith.mulf %400, %404 : vector<8x32xf32>
    %c3_129 = arith.constant 3 : index
    %c0_130 = arith.constant 0 : index
    %c0_131 = arith.constant 0 : index
    %406 = vector.load %arg12[%c3_129, %c0_130, %c0_131] : memref<8x8x1xf32, #tpu.memory_space<vmem>>, vector<1x8x1xf32>
    %407 = vector.shape_cast %406 : vector<1x8x1xf32> to vector<8x1xf32>
    %408 = vector.broadcast %407 : vector<8x1xf32> to vector<8x32xf32>
    %409 = arith.mulf %408, %405 : vector<8x32xf32>
    %410 = arith.addf %312, %409 : vector<8x32xf32>
    %c4 = arith.constant 4 : index
    %c0_132 = arith.constant 0 : index
    %c0_133 = arith.constant 0 : index
    %411 = vector.load %arg1[%c4, %c0_132, %c0_133] : memref<10x8x128xf32, #tpu.memory_space<vmem>>, vector<1x8x128xf32>
    %412 = vector.shape_cast %411 : vector<1x8x128xf32> to vector<8x128xf32>
    %cst_134 = arith.constant dense<0.000000e+00> : vector<8x128xf32>
    %413 = tpu.matmul %334, %6, %cst_134 {dimension_numbers = #tpu.dot_dimension_numbers<[1], [0], [0], [1], [0, 0, 1, 1], [], []>} : vector<8x32xf32>, vector<32x128xf32>, vector<8x128xf32> -> vector<8x128xf32>
    %414 = arith.addf %412, %413 : vector<8x128xf32>
    %cst_135 = arith.constant 5.000000e-01 : f32
    %415 = vector.broadcast %cst_135 : f32 to vector<8x128xf32>
    %416 = arith.mulf %415, %414 : vector<8x128xf32>
    %417 = arith.select %5, %414, %416 : vector<8x128xi1>, vector<8x128xf32>
    %418 = math.tanh %417 : vector<8x128xf32>
    %cst_136 = arith.constant 5.000000e-01 : f32
    %419 = vector.broadcast %cst_136 : f32 to vector<8x128xf32>
    %420 = arith.mulf %419, %418 : vector<8x128xf32>
    %cst_137 = arith.constant 5.000000e-01 : f32
    %421 = vector.broadcast %cst_137 : f32 to vector<8x128xf32>
    %422 = arith.addf %420, %421 : vector<8x128xf32>
    %423 = arith.select %5, %418, %422 : vector<8x128xi1>, vector<8x128xf32>
    %424 = vector.extract_strided_slice %423 {offsets = [0, 0], sizes = [8, 32], strides = [1, 1]} : vector<8x128xf32> to vector<8x32xf32>
    %425 = vector.extract_strided_slice %423 {offsets = [0, 32], sizes = [8, 32], strides = [1, 1]} : vector<8x128xf32> to vector<8x32xf32>
    %426 = vector.extract_strided_slice %423 {offsets = [0, 64], sizes = [8, 32], strides = [1, 1]} : vector<8x128xf32> to vector<8x32xf32>
    %427 = vector.extract_strided_slice %423 {offsets = [0, 96], sizes = [8, 32], strides = [1, 1]} : vector<8x128xf32> to vector<8x32xf32>
    %428 = arith.mulf %425, %332 : vector<8x32xf32>
    %429 = arith.mulf %424, %426 : vector<8x32xf32>
    %430 = arith.addf %428, %429 : vector<8x32xf32>
    %431 = math.tanh %430 : vector<8x32xf32>
    %432 = arith.mulf %427, %431 : vector<8x32xf32>
    %cst_138 = arith.constant dense<0.000000e+00> : vector<8x128xf32>
    %433 = tpu.matmul %432, %7, %cst_138 {dimension_numbers = #tpu.dot_dimension_numbers<[1], [0], [0], [1], [0, 0, 1, 1], [], []>} : vector<8x32xf32>, vector<32x128xf32>, vector<8x128xf32> -> vector<8x128xf32>
    %cst_139 = arith.constant dense<0.000000e+00> : vector<8x128xf32>
    %434 = tpu.matmul %356, %8, %cst_139 {dimension_numbers = #tpu.dot_dimension_numbers<[1], [0], [0], [1], [0, 0, 1, 1], [], []>} : vector<8x32xf32>, vector<32x128xf32>, vector<8x128xf32> -> vector<8x128xf32>
    %435 = arith.addf %433, %434 : vector<8x128xf32>
    %436 = arith.addf %435, %14 : vector<8x128xf32>
    %cst_140 = arith.constant 5.000000e-01 : f32
    %437 = vector.broadcast %cst_140 : f32 to vector<8x128xf32>
    %438 = arith.mulf %437, %436 : vector<8x128xf32>
    %439 = arith.select %5, %436, %438 : vector<8x128xi1>, vector<8x128xf32>
    %440 = math.tanh %439 : vector<8x128xf32>
    %cst_141 = arith.constant 5.000000e-01 : f32
    %441 = vector.broadcast %cst_141 : f32 to vector<8x128xf32>
    %442 = arith.mulf %441, %440 : vector<8x128xf32>
    %cst_142 = arith.constant 5.000000e-01 : f32
    %443 = vector.broadcast %cst_142 : f32 to vector<8x128xf32>
    %444 = arith.addf %442, %443 : vector<8x128xf32>
    %445 = arith.select %5, %440, %444 : vector<8x128xi1>, vector<8x128xf32>
    %446 = vector.extract_strided_slice %445 {offsets = [0, 0], sizes = [8, 32], strides = [1, 1]} : vector<8x128xf32> to vector<8x32xf32>
    %447 = vector.extract_strided_slice %445 {offsets = [0, 32], sizes = [8, 32], strides = [1, 1]} : vector<8x128xf32> to vector<8x32xf32>
    %448 = vector.extract_strided_slice %445 {offsets = [0, 64], sizes = [8, 32], strides = [1, 1]} : vector<8x128xf32> to vector<8x32xf32>
    %449 = vector.extract_strided_slice %445 {offsets = [0, 96], sizes = [8, 32], strides = [1, 1]} : vector<8x128xf32> to vector<8x32xf32>
    %450 = arith.mulf %447, %354 : vector<8x32xf32>
    %451 = arith.mulf %446, %448 : vector<8x32xf32>
    %452 = arith.addf %450, %451 : vector<8x32xf32>
    %453 = math.tanh %452 : vector<8x32xf32>
    %454 = arith.mulf %449, %453 : vector<8x32xf32>
    %c4_143 = arith.constant 4 : index
    %c0_144 = arith.constant 0 : index
    %c0_145 = arith.constant 0 : index
    %455 = vector.load %arg6[%c4_143, %c0_144, %c0_145] : memref<10x8x1xf32, #tpu.memory_space<vmem>>, vector<1x8x1xf32>
    %456 = vector.shape_cast %455 : vector<1x8x1xf32> to vector<8x1xf32>
    %457 = vector.broadcast %456 : vector<8x1xf32> to vector<8x32xf32>
    %458 = arith.mulf %457, %454 : vector<8x32xf32>
    %459 = arith.addf %361, %458 : vector<8x32xf32>
    %c4_146 = arith.constant 4 : index
    %c0_147 = arith.constant 0 : index
    %c0_148 = arith.constant 0 : index
    %460 = vector.load %arg7[%c4_146, %c0_147, %c0_148] : memref<8x8x128xf32, #tpu.memory_space<vmem>>, vector<1x8x128xf32>
    %461 = vector.shape_cast %460 : vector<1x8x128xf32> to vector<8x128xf32>
    %cst_149 = arith.constant dense<0.000000e+00> : vector<8x128xf32>
    %462 = tpu.matmul %383, %9, %cst_149 {dimension_numbers = #tpu.dot_dimension_numbers<[1], [0], [0], [1], [0, 0, 1, 1], [], []>} : vector<8x32xf32>, vector<32x128xf32>, vector<8x128xf32> -> vector<8x128xf32>
    %463 = arith.addf %461, %462 : vector<8x128xf32>
    %cst_150 = arith.constant 5.000000e-01 : f32
    %464 = vector.broadcast %cst_150 : f32 to vector<8x128xf32>
    %465 = arith.mulf %464, %463 : vector<8x128xf32>
    %466 = arith.select %5, %463, %465 : vector<8x128xi1>, vector<8x128xf32>
    %467 = math.tanh %466 : vector<8x128xf32>
    %cst_151 = arith.constant 5.000000e-01 : f32
    %468 = vector.broadcast %cst_151 : f32 to vector<8x128xf32>
    %469 = arith.mulf %468, %467 : vector<8x128xf32>
    %cst_152 = arith.constant 5.000000e-01 : f32
    %470 = vector.broadcast %cst_152 : f32 to vector<8x128xf32>
    %471 = arith.addf %469, %470 : vector<8x128xf32>
    %472 = arith.select %5, %467, %471 : vector<8x128xi1>, vector<8x128xf32>
    %473 = vector.extract_strided_slice %472 {offsets = [0, 0], sizes = [8, 32], strides = [1, 1]} : vector<8x128xf32> to vector<8x32xf32>
    %474 = vector.extract_strided_slice %472 {offsets = [0, 32], sizes = [8, 32], strides = [1, 1]} : vector<8x128xf32> to vector<8x32xf32>
    %475 = vector.extract_strided_slice %472 {offsets = [0, 64], sizes = [8, 32], strides = [1, 1]} : vector<8x128xf32> to vector<8x32xf32>
    %476 = vector.extract_strided_slice %472 {offsets = [0, 96], sizes = [8, 32], strides = [1, 1]} : vector<8x128xf32> to vector<8x32xf32>
    %477 = arith.mulf %474, %381 : vector<8x32xf32>
    %478 = arith.mulf %473, %475 : vector<8x32xf32>
    %479 = arith.addf %477, %478 : vector<8x32xf32>
    %480 = math.tanh %479 : vector<8x32xf32>
    %481 = arith.mulf %476, %480 : vector<8x32xf32>
    %cst_153 = arith.constant dense<0.000000e+00> : vector<8x128xf32>
    %482 = tpu.matmul %481, %10, %cst_153 {dimension_numbers = #tpu.dot_dimension_numbers<[1], [0], [0], [1], [0, 0, 1, 1], [], []>} : vector<8x32xf32>, vector<32x128xf32>, vector<8x128xf32> -> vector<8x128xf32>
    %cst_154 = arith.constant dense<0.000000e+00> : vector<8x128xf32>
    %483 = tpu.matmul %405, %11, %cst_154 {dimension_numbers = #tpu.dot_dimension_numbers<[1], [0], [0], [1], [0, 0, 1, 1], [], []>} : vector<8x32xf32>, vector<32x128xf32>, vector<8x128xf32> -> vector<8x128xf32>
    %484 = arith.addf %482, %483 : vector<8x128xf32>
    %485 = arith.addf %484, %17 : vector<8x128xf32>
    %cst_155 = arith.constant 5.000000e-01 : f32
    %486 = vector.broadcast %cst_155 : f32 to vector<8x128xf32>
    %487 = arith.mulf %486, %485 : vector<8x128xf32>
    %488 = arith.select %5, %485, %487 : vector<8x128xi1>, vector<8x128xf32>
    %489 = math.tanh %488 : vector<8x128xf32>
    %cst_156 = arith.constant 5.000000e-01 : f32
    %490 = vector.broadcast %cst_156 : f32 to vector<8x128xf32>
    %491 = arith.mulf %490, %489 : vector<8x128xf32>
    %cst_157 = arith.constant 5.000000e-01 : f32
    %492 = vector.broadcast %cst_157 : f32 to vector<8x128xf32>
    %493 = arith.addf %491, %492 : vector<8x128xf32>
    %494 = arith.select %5, %489, %493 : vector<8x128xi1>, vector<8x128xf32>
    %495 = vector.extract_strided_slice %494 {offsets = [0, 0], sizes = [8, 32], strides = [1, 1]} : vector<8x128xf32> to vector<8x32xf32>
    %496 = vector.extract_strided_slice %494 {offsets = [0, 32], sizes = [8, 32], strides = [1, 1]} : vector<8x128xf32> to vector<8x32xf32>
    %497 = vector.extract_strided_slice %494 {offsets = [0, 64], sizes = [8, 32], strides = [1, 1]} : vector<8x128xf32> to vector<8x32xf32>
    %498 = vector.extract_strided_slice %494 {offsets = [0, 96], sizes = [8, 32], strides = [1, 1]} : vector<8x128xf32> to vector<8x32xf32>
    %499 = arith.mulf %496, %403 : vector<8x32xf32>
    %500 = arith.mulf %495, %497 : vector<8x32xf32>
    %501 = arith.addf %499, %500 : vector<8x32xf32>
    %502 = math.tanh %501 : vector<8x32xf32>
    %503 = arith.mulf %498, %502 : vector<8x32xf32>
    %c4_158 = arith.constant 4 : index
    %c0_159 = arith.constant 0 : index
    %c0_160 = arith.constant 0 : index
    %504 = vector.load %arg12[%c4_158, %c0_159, %c0_160] : memref<8x8x1xf32, #tpu.memory_space<vmem>>, vector<1x8x1xf32>
    %505 = vector.shape_cast %504 : vector<1x8x1xf32> to vector<8x1xf32>
    %506 = vector.broadcast %505 : vector<8x1xf32> to vector<8x32xf32>
    %507 = arith.mulf %506, %503 : vector<8x32xf32>
    %508 = arith.addf %410, %507 : vector<8x32xf32>
    %c5 = arith.constant 5 : index
    %c0_161 = arith.constant 0 : index
    %c0_162 = arith.constant 0 : index
    %509 = vector.load %arg1[%c5, %c0_161, %c0_162] : memref<10x8x128xf32, #tpu.memory_space<vmem>>, vector<1x8x128xf32>
    %510 = vector.shape_cast %509 : vector<1x8x128xf32> to vector<8x128xf32>
    %cst_163 = arith.constant dense<0.000000e+00> : vector<8x128xf32>
    %511 = tpu.matmul %432, %6, %cst_163 {dimension_numbers = #tpu.dot_dimension_numbers<[1], [0], [0], [1], [0, 0, 1, 1], [], []>} : vector<8x32xf32>, vector<32x128xf32>, vector<8x128xf32> -> vector<8x128xf32>
    %512 = arith.addf %510, %511 : vector<8x128xf32>
    %cst_164 = arith.constant 5.000000e-01 : f32
    %513 = vector.broadcast %cst_164 : f32 to vector<8x128xf32>
    %514 = arith.mulf %513, %512 : vector<8x128xf32>
    %515 = arith.select %5, %512, %514 : vector<8x128xi1>, vector<8x128xf32>
    %516 = math.tanh %515 : vector<8x128xf32>
    %cst_165 = arith.constant 5.000000e-01 : f32
    %517 = vector.broadcast %cst_165 : f32 to vector<8x128xf32>
    %518 = arith.mulf %517, %516 : vector<8x128xf32>
    %cst_166 = arith.constant 5.000000e-01 : f32
    %519 = vector.broadcast %cst_166 : f32 to vector<8x128xf32>
    %520 = arith.addf %518, %519 : vector<8x128xf32>
    %521 = arith.select %5, %516, %520 : vector<8x128xi1>, vector<8x128xf32>
    %522 = vector.extract_strided_slice %521 {offsets = [0, 0], sizes = [8, 32], strides = [1, 1]} : vector<8x128xf32> to vector<8x32xf32>
    %523 = vector.extract_strided_slice %521 {offsets = [0, 32], sizes = [8, 32], strides = [1, 1]} : vector<8x128xf32> to vector<8x32xf32>
    %524 = vector.extract_strided_slice %521 {offsets = [0, 64], sizes = [8, 32], strides = [1, 1]} : vector<8x128xf32> to vector<8x32xf32>
    %525 = vector.extract_strided_slice %521 {offsets = [0, 96], sizes = [8, 32], strides = [1, 1]} : vector<8x128xf32> to vector<8x32xf32>
    %526 = arith.mulf %523, %430 : vector<8x32xf32>
    %527 = arith.mulf %522, %524 : vector<8x32xf32>
    %528 = arith.addf %526, %527 : vector<8x32xf32>
    %529 = math.tanh %528 : vector<8x32xf32>
    %530 = arith.mulf %525, %529 : vector<8x32xf32>
    %cst_167 = arith.constant dense<0.000000e+00> : vector<8x128xf32>
    %531 = tpu.matmul %530, %7, %cst_167 {dimension_numbers = #tpu.dot_dimension_numbers<[1], [0], [0], [1], [0, 0, 1, 1], [], []>} : vector<8x32xf32>, vector<32x128xf32>, vector<8x128xf32> -> vector<8x128xf32>
    %cst_168 = arith.constant dense<0.000000e+00> : vector<8x128xf32>
    %532 = tpu.matmul %454, %8, %cst_168 {dimension_numbers = #tpu.dot_dimension_numbers<[1], [0], [0], [1], [0, 0, 1, 1], [], []>} : vector<8x32xf32>, vector<32x128xf32>, vector<8x128xf32> -> vector<8x128xf32>
    %533 = arith.addf %531, %532 : vector<8x128xf32>
    %534 = arith.addf %533, %14 : vector<8x128xf32>
    %cst_169 = arith.constant 5.000000e-01 : f32
    %535 = vector.broadcast %cst_169 : f32 to vector<8x128xf32>
    %536 = arith.mulf %535, %534 : vector<8x128xf32>
    %537 = arith.select %5, %534, %536 : vector<8x128xi1>, vector<8x128xf32>
    %538 = math.tanh %537 : vector<8x128xf32>
    %cst_170 = arith.constant 5.000000e-01 : f32
    %539 = vector.broadcast %cst_170 : f32 to vector<8x128xf32>
    %540 = arith.mulf %539, %538 : vector<8x128xf32>
    %cst_171 = arith.constant 5.000000e-01 : f32
    %541 = vector.broadcast %cst_171 : f32 to vector<8x128xf32>
    %542 = arith.addf %540, %541 : vector<8x128xf32>
    %543 = arith.select %5, %538, %542 : vector<8x128xi1>, vector<8x128xf32>
    %544 = vector.extract_strided_slice %543 {offsets = [0, 0], sizes = [8, 32], strides = [1, 1]} : vector<8x128xf32> to vector<8x32xf32>
    %545 = vector.extract_strided_slice %543 {offsets = [0, 32], sizes = [8, 32], strides = [1, 1]} : vector<8x128xf32> to vector<8x32xf32>
    %546 = vector.extract_strided_slice %543 {offsets = [0, 64], sizes = [8, 32], strides = [1, 1]} : vector<8x128xf32> to vector<8x32xf32>
    %547 = vector.extract_strided_slice %543 {offsets = [0, 96], sizes = [8, 32], strides = [1, 1]} : vector<8x128xf32> to vector<8x32xf32>
    %548 = arith.mulf %545, %452 : vector<8x32xf32>
    %549 = arith.mulf %544, %546 : vector<8x32xf32>
    %550 = arith.addf %548, %549 : vector<8x32xf32>
    %551 = math.tanh %550 : vector<8x32xf32>
    %552 = arith.mulf %547, %551 : vector<8x32xf32>
    %c5_172 = arith.constant 5 : index
    %c0_173 = arith.constant 0 : index
    %c0_174 = arith.constant 0 : index
    %553 = vector.load %arg6[%c5_172, %c0_173, %c0_174] : memref<10x8x1xf32, #tpu.memory_space<vmem>>, vector<1x8x1xf32>
    %554 = vector.shape_cast %553 : vector<1x8x1xf32> to vector<8x1xf32>
    %555 = vector.broadcast %554 : vector<8x1xf32> to vector<8x32xf32>
    %556 = arith.mulf %555, %552 : vector<8x32xf32>
    %557 = arith.addf %459, %556 : vector<8x32xf32>
    %c5_175 = arith.constant 5 : index
    %c0_176 = arith.constant 0 : index
    %c0_177 = arith.constant 0 : index
    %558 = vector.load %arg7[%c5_175, %c0_176, %c0_177] : memref<8x8x128xf32, #tpu.memory_space<vmem>>, vector<1x8x128xf32>
    %559 = vector.shape_cast %558 : vector<1x8x128xf32> to vector<8x128xf32>
    %cst_178 = arith.constant dense<0.000000e+00> : vector<8x128xf32>
    %560 = tpu.matmul %481, %9, %cst_178 {dimension_numbers = #tpu.dot_dimension_numbers<[1], [0], [0], [1], [0, 0, 1, 1], [], []>} : vector<8x32xf32>, vector<32x128xf32>, vector<8x128xf32> -> vector<8x128xf32>
    %561 = arith.addf %559, %560 : vector<8x128xf32>
    %cst_179 = arith.constant 5.000000e-01 : f32
    %562 = vector.broadcast %cst_179 : f32 to vector<8x128xf32>
    %563 = arith.mulf %562, %561 : vector<8x128xf32>
    %564 = arith.select %5, %561, %563 : vector<8x128xi1>, vector<8x128xf32>
    %565 = math.tanh %564 : vector<8x128xf32>
    %cst_180 = arith.constant 5.000000e-01 : f32
    %566 = vector.broadcast %cst_180 : f32 to vector<8x128xf32>
    %567 = arith.mulf %566, %565 : vector<8x128xf32>
    %cst_181 = arith.constant 5.000000e-01 : f32
    %568 = vector.broadcast %cst_181 : f32 to vector<8x128xf32>
    %569 = arith.addf %567, %568 : vector<8x128xf32>
    %570 = arith.select %5, %565, %569 : vector<8x128xi1>, vector<8x128xf32>
    %571 = vector.extract_strided_slice %570 {offsets = [0, 0], sizes = [8, 32], strides = [1, 1]} : vector<8x128xf32> to vector<8x32xf32>
    %572 = vector.extract_strided_slice %570 {offsets = [0, 32], sizes = [8, 32], strides = [1, 1]} : vector<8x128xf32> to vector<8x32xf32>
    %573 = vector.extract_strided_slice %570 {offsets = [0, 64], sizes = [8, 32], strides = [1, 1]} : vector<8x128xf32> to vector<8x32xf32>
    %574 = vector.extract_strided_slice %570 {offsets = [0, 96], sizes = [8, 32], strides = [1, 1]} : vector<8x128xf32> to vector<8x32xf32>
    %575 = arith.mulf %572, %479 : vector<8x32xf32>
    %576 = arith.mulf %571, %573 : vector<8x32xf32>
    %577 = arith.addf %575, %576 : vector<8x32xf32>
    %578 = math.tanh %577 : vector<8x32xf32>
    %579 = arith.mulf %574, %578 : vector<8x32xf32>
    %cst_182 = arith.constant dense<0.000000e+00> : vector<8x128xf32>
    %580 = tpu.matmul %579, %10, %cst_182 {dimension_numbers = #tpu.dot_dimension_numbers<[1], [0], [0], [1], [0, 0, 1, 1], [], []>} : vector<8x32xf32>, vector<32x128xf32>, vector<8x128xf32> -> vector<8x128xf32>
    %cst_183 = arith.constant dense<0.000000e+00> : vector<8x128xf32>
    %581 = tpu.matmul %503, %11, %cst_183 {dimension_numbers = #tpu.dot_dimension_numbers<[1], [0], [0], [1], [0, 0, 1, 1], [], []>} : vector<8x32xf32>, vector<32x128xf32>, vector<8x128xf32> -> vector<8x128xf32>
    %582 = arith.addf %580, %581 : vector<8x128xf32>
    %583 = arith.addf %582, %17 : vector<8x128xf32>
    %cst_184 = arith.constant 5.000000e-01 : f32
    %584 = vector.broadcast %cst_184 : f32 to vector<8x128xf32>
    %585 = arith.mulf %584, %583 : vector<8x128xf32>
    %586 = arith.select %5, %583, %585 : vector<8x128xi1>, vector<8x128xf32>
    %587 = math.tanh %586 : vector<8x128xf32>
    %cst_185 = arith.constant 5.000000e-01 : f32
    %588 = vector.broadcast %cst_185 : f32 to vector<8x128xf32>
    %589 = arith.mulf %588, %587 : vector<8x128xf32>
    %cst_186 = arith.constant 5.000000e-01 : f32
    %590 = vector.broadcast %cst_186 : f32 to vector<8x128xf32>
    %591 = arith.addf %589, %590 : vector<8x128xf32>
    %592 = arith.select %5, %587, %591 : vector<8x128xi1>, vector<8x128xf32>
    %593 = vector.extract_strided_slice %592 {offsets = [0, 0], sizes = [8, 32], strides = [1, 1]} : vector<8x128xf32> to vector<8x32xf32>
    %594 = vector.extract_strided_slice %592 {offsets = [0, 32], sizes = [8, 32], strides = [1, 1]} : vector<8x128xf32> to vector<8x32xf32>
    %595 = vector.extract_strided_slice %592 {offsets = [0, 64], sizes = [8, 32], strides = [1, 1]} : vector<8x128xf32> to vector<8x32xf32>
    %596 = vector.extract_strided_slice %592 {offsets = [0, 96], sizes = [8, 32], strides = [1, 1]} : vector<8x128xf32> to vector<8x32xf32>
    %597 = arith.mulf %594, %501 : vector<8x32xf32>
    %598 = arith.mulf %593, %595 : vector<8x32xf32>
    %599 = arith.addf %597, %598 : vector<8x32xf32>
    %600 = math.tanh %599 : vector<8x32xf32>
    %601 = arith.mulf %596, %600 : vector<8x32xf32>
    %c5_187 = arith.constant 5 : index
    %c0_188 = arith.constant 0 : index
    %c0_189 = arith.constant 0 : index
    %602 = vector.load %arg12[%c5_187, %c0_188, %c0_189] : memref<8x8x1xf32, #tpu.memory_space<vmem>>, vector<1x8x1xf32>
    %603 = vector.shape_cast %602 : vector<1x8x1xf32> to vector<8x1xf32>
    %604 = vector.broadcast %603 : vector<8x1xf32> to vector<8x32xf32>
    %605 = arith.mulf %604, %601 : vector<8x32xf32>
    %606 = arith.addf %508, %605 : vector<8x32xf32>
    %c6 = arith.constant 6 : index
    %c0_190 = arith.constant 0 : index
    %c0_191 = arith.constant 0 : index
    %607 = vector.load %arg1[%c6, %c0_190, %c0_191] : memref<10x8x128xf32, #tpu.memory_space<vmem>>, vector<1x8x128xf32>
    %608 = vector.shape_cast %607 : vector<1x8x128xf32> to vector<8x128xf32>
    %cst_192 = arith.constant dense<0.000000e+00> : vector<8x128xf32>
    %609 = tpu.matmul %530, %6, %cst_192 {dimension_numbers = #tpu.dot_dimension_numbers<[1], [0], [0], [1], [0, 0, 1, 1], [], []>} : vector<8x32xf32>, vector<32x128xf32>, vector<8x128xf32> -> vector<8x128xf32>
    %610 = arith.addf %608, %609 : vector<8x128xf32>
    %cst_193 = arith.constant 5.000000e-01 : f32
    %611 = vector.broadcast %cst_193 : f32 to vector<8x128xf32>
    %612 = arith.mulf %611, %610 : vector<8x128xf32>
    %613 = arith.select %5, %610, %612 : vector<8x128xi1>, vector<8x128xf32>
    %614 = math.tanh %613 : vector<8x128xf32>
    %cst_194 = arith.constant 5.000000e-01 : f32
    %615 = vector.broadcast %cst_194 : f32 to vector<8x128xf32>
    %616 = arith.mulf %615, %614 : vector<8x128xf32>
    %cst_195 = arith.constant 5.000000e-01 : f32
    %617 = vector.broadcast %cst_195 : f32 to vector<8x128xf32>
    %618 = arith.addf %616, %617 : vector<8x128xf32>
    %619 = arith.select %5, %614, %618 : vector<8x128xi1>, vector<8x128xf32>
    %620 = vector.extract_strided_slice %619 {offsets = [0, 0], sizes = [8, 32], strides = [1, 1]} : vector<8x128xf32> to vector<8x32xf32>
    %621 = vector.extract_strided_slice %619 {offsets = [0, 32], sizes = [8, 32], strides = [1, 1]} : vector<8x128xf32> to vector<8x32xf32>
    %622 = vector.extract_strided_slice %619 {offsets = [0, 64], sizes = [8, 32], strides = [1, 1]} : vector<8x128xf32> to vector<8x32xf32>
    %623 = vector.extract_strided_slice %619 {offsets = [0, 96], sizes = [8, 32], strides = [1, 1]} : vector<8x128xf32> to vector<8x32xf32>
    %624 = arith.mulf %621, %528 : vector<8x32xf32>
    %625 = arith.mulf %620, %622 : vector<8x32xf32>
    %626 = arith.addf %624, %625 : vector<8x32xf32>
    %627 = math.tanh %626 : vector<8x32xf32>
    %628 = arith.mulf %623, %627 : vector<8x32xf32>
    %cst_196 = arith.constant dense<0.000000e+00> : vector<8x128xf32>
    %629 = tpu.matmul %628, %7, %cst_196 {dimension_numbers = #tpu.dot_dimension_numbers<[1], [0], [0], [1], [0, 0, 1, 1], [], []>} : vector<8x32xf32>, vector<32x128xf32>, vector<8x128xf32> -> vector<8x128xf32>
    %cst_197 = arith.constant dense<0.000000e+00> : vector<8x128xf32>
    %630 = tpu.matmul %552, %8, %cst_197 {dimension_numbers = #tpu.dot_dimension_numbers<[1], [0], [0], [1], [0, 0, 1, 1], [], []>} : vector<8x32xf32>, vector<32x128xf32>, vector<8x128xf32> -> vector<8x128xf32>
    %631 = arith.addf %629, %630 : vector<8x128xf32>
    %632 = arith.addf %631, %14 : vector<8x128xf32>
    %cst_198 = arith.constant 5.000000e-01 : f32
    %633 = vector.broadcast %cst_198 : f32 to vector<8x128xf32>
    %634 = arith.mulf %633, %632 : vector<8x128xf32>
    %635 = arith.select %5, %632, %634 : vector<8x128xi1>, vector<8x128xf32>
    %636 = math.tanh %635 : vector<8x128xf32>
    %cst_199 = arith.constant 5.000000e-01 : f32
    %637 = vector.broadcast %cst_199 : f32 to vector<8x128xf32>
    %638 = arith.mulf %637, %636 : vector<8x128xf32>
    %cst_200 = arith.constant 5.000000e-01 : f32
    %639 = vector.broadcast %cst_200 : f32 to vector<8x128xf32>
    %640 = arith.addf %638, %639 : vector<8x128xf32>
    %641 = arith.select %5, %636, %640 : vector<8x128xi1>, vector<8x128xf32>
    %642 = vector.extract_strided_slice %641 {offsets = [0, 0], sizes = [8, 32], strides = [1, 1]} : vector<8x128xf32> to vector<8x32xf32>
    %643 = vector.extract_strided_slice %641 {offsets = [0, 32], sizes = [8, 32], strides = [1, 1]} : vector<8x128xf32> to vector<8x32xf32>
    %644 = vector.extract_strided_slice %641 {offsets = [0, 64], sizes = [8, 32], strides = [1, 1]} : vector<8x128xf32> to vector<8x32xf32>
    %645 = vector.extract_strided_slice %641 {offsets = [0, 96], sizes = [8, 32], strides = [1, 1]} : vector<8x128xf32> to vector<8x32xf32>
    %646 = arith.mulf %643, %550 : vector<8x32xf32>
    %647 = arith.mulf %642, %644 : vector<8x32xf32>
    %648 = arith.addf %646, %647 : vector<8x32xf32>
    %649 = math.tanh %648 : vector<8x32xf32>
    %650 = arith.mulf %645, %649 : vector<8x32xf32>
    %c6_201 = arith.constant 6 : index
    %c0_202 = arith.constant 0 : index
    %c0_203 = arith.constant 0 : index
    %651 = vector.load %arg6[%c6_201, %c0_202, %c0_203] : memref<10x8x1xf32, #tpu.memory_space<vmem>>, vector<1x8x1xf32>
    %652 = vector.shape_cast %651 : vector<1x8x1xf32> to vector<8x1xf32>
    %653 = vector.broadcast %652 : vector<8x1xf32> to vector<8x32xf32>
    %654 = arith.mulf %653, %650 : vector<8x32xf32>
    %655 = arith.addf %557, %654 : vector<8x32xf32>
    %c6_204 = arith.constant 6 : index
    %c0_205 = arith.constant 0 : index
    %c0_206 = arith.constant 0 : index
    %656 = vector.load %arg7[%c6_204, %c0_205, %c0_206] : memref<8x8x128xf32, #tpu.memory_space<vmem>>, vector<1x8x128xf32>
    %657 = vector.shape_cast %656 : vector<1x8x128xf32> to vector<8x128xf32>
    %cst_207 = arith.constant dense<0.000000e+00> : vector<8x128xf32>
    %658 = tpu.matmul %579, %9, %cst_207 {dimension_numbers = #tpu.dot_dimension_numbers<[1], [0], [0], [1], [0, 0, 1, 1], [], []>} : vector<8x32xf32>, vector<32x128xf32>, vector<8x128xf32> -> vector<8x128xf32>
    %659 = arith.addf %657, %658 : vector<8x128xf32>
    %cst_208 = arith.constant 5.000000e-01 : f32
    %660 = vector.broadcast %cst_208 : f32 to vector<8x128xf32>
    %661 = arith.mulf %660, %659 : vector<8x128xf32>
    %662 = arith.select %5, %659, %661 : vector<8x128xi1>, vector<8x128xf32>
    %663 = math.tanh %662 : vector<8x128xf32>
    %cst_209 = arith.constant 5.000000e-01 : f32
    %664 = vector.broadcast %cst_209 : f32 to vector<8x128xf32>
    %665 = arith.mulf %664, %663 : vector<8x128xf32>
    %cst_210 = arith.constant 5.000000e-01 : f32
    %666 = vector.broadcast %cst_210 : f32 to vector<8x128xf32>
    %667 = arith.addf %665, %666 : vector<8x128xf32>
    %668 = arith.select %5, %663, %667 : vector<8x128xi1>, vector<8x128xf32>
    %669 = vector.extract_strided_slice %668 {offsets = [0, 0], sizes = [8, 32], strides = [1, 1]} : vector<8x128xf32> to vector<8x32xf32>
    %670 = vector.extract_strided_slice %668 {offsets = [0, 32], sizes = [8, 32], strides = [1, 1]} : vector<8x128xf32> to vector<8x32xf32>
    %671 = vector.extract_strided_slice %668 {offsets = [0, 64], sizes = [8, 32], strides = [1, 1]} : vector<8x128xf32> to vector<8x32xf32>
    %672 = vector.extract_strided_slice %668 {offsets = [0, 96], sizes = [8, 32], strides = [1, 1]} : vector<8x128xf32> to vector<8x32xf32>
    %673 = arith.mulf %670, %577 : vector<8x32xf32>
    %674 = arith.mulf %669, %671 : vector<8x32xf32>
    %675 = arith.addf %673, %674 : vector<8x32xf32>
    %676 = math.tanh %675 : vector<8x32xf32>
    %677 = arith.mulf %672, %676 : vector<8x32xf32>
    %cst_211 = arith.constant dense<0.000000e+00> : vector<8x128xf32>
    %678 = tpu.matmul %677, %10, %cst_211 {dimension_numbers = #tpu.dot_dimension_numbers<[1], [0], [0], [1], [0, 0, 1, 1], [], []>} : vector<8x32xf32>, vector<32x128xf32>, vector<8x128xf32> -> vector<8x128xf32>
    %cst_212 = arith.constant dense<0.000000e+00> : vector<8x128xf32>
    %679 = tpu.matmul %601, %11, %cst_212 {dimension_numbers = #tpu.dot_dimension_numbers<[1], [0], [0], [1], [0, 0, 1, 1], [], []>} : vector<8x32xf32>, vector<32x128xf32>, vector<8x128xf32> -> vector<8x128xf32>
    %680 = arith.addf %678, %679 : vector<8x128xf32>
    %681 = arith.addf %680, %17 : vector<8x128xf32>
    %cst_213 = arith.constant 5.000000e-01 : f32
    %682 = vector.broadcast %cst_213 : f32 to vector<8x128xf32>
    %683 = arith.mulf %682, %681 : vector<8x128xf32>
    %684 = arith.select %5, %681, %683 : vector<8x128xi1>, vector<8x128xf32>
    %685 = math.tanh %684 : vector<8x128xf32>
    %cst_214 = arith.constant 5.000000e-01 : f32
    %686 = vector.broadcast %cst_214 : f32 to vector<8x128xf32>
    %687 = arith.mulf %686, %685 : vector<8x128xf32>
    %cst_215 = arith.constant 5.000000e-01 : f32
    %688 = vector.broadcast %cst_215 : f32 to vector<8x128xf32>
    %689 = arith.addf %687, %688 : vector<8x128xf32>
    %690 = arith.select %5, %685, %689 : vector<8x128xi1>, vector<8x128xf32>
    %691 = vector.extract_strided_slice %690 {offsets = [0, 0], sizes = [8, 32], strides = [1, 1]} : vector<8x128xf32> to vector<8x32xf32>
    %692 = vector.extract_strided_slice %690 {offsets = [0, 32], sizes = [8, 32], strides = [1, 1]} : vector<8x128xf32> to vector<8x32xf32>
    %693 = vector.extract_strided_slice %690 {offsets = [0, 64], sizes = [8, 32], strides = [1, 1]} : vector<8x128xf32> to vector<8x32xf32>
    %694 = vector.extract_strided_slice %690 {offsets = [0, 96], sizes = [8, 32], strides = [1, 1]} : vector<8x128xf32> to vector<8x32xf32>
    %695 = arith.mulf %692, %599 : vector<8x32xf32>
    %696 = arith.mulf %691, %693 : vector<8x32xf32>
    %697 = arith.addf %695, %696 : vector<8x32xf32>
    %698 = math.tanh %697 : vector<8x32xf32>
    %699 = arith.mulf %694, %698 : vector<8x32xf32>
    %c6_216 = arith.constant 6 : index
    %c0_217 = arith.constant 0 : index
    %c0_218 = arith.constant 0 : index
    %700 = vector.load %arg12[%c6_216, %c0_217, %c0_218] : memref<8x8x1xf32, #tpu.memory_space<vmem>>, vector<1x8x1xf32>
    %701 = vector.shape_cast %700 : vector<1x8x1xf32> to vector<8x1xf32>
    %702 = vector.broadcast %701 : vector<8x1xf32> to vector<8x32xf32>
    %703 = arith.mulf %702, %699 : vector<8x32xf32>
    %704 = arith.addf %606, %703 : vector<8x32xf32>
    %c7 = arith.constant 7 : index
    %c0_219 = arith.constant 0 : index
    %c0_220 = arith.constant 0 : index
    %705 = vector.load %arg1[%c7, %c0_219, %c0_220] : memref<10x8x128xf32, #tpu.memory_space<vmem>>, vector<1x8x128xf32>
    %706 = vector.shape_cast %705 : vector<1x8x128xf32> to vector<8x128xf32>
    %cst_221 = arith.constant dense<0.000000e+00> : vector<8x128xf32>
    %707 = tpu.matmul %628, %6, %cst_221 {dimension_numbers = #tpu.dot_dimension_numbers<[1], [0], [0], [1], [0, 0, 1, 1], [], []>} : vector<8x32xf32>, vector<32x128xf32>, vector<8x128xf32> -> vector<8x128xf32>
    %708 = arith.addf %706, %707 : vector<8x128xf32>
    %cst_222 = arith.constant 5.000000e-01 : f32
    %709 = vector.broadcast %cst_222 : f32 to vector<8x128xf32>
    %710 = arith.mulf %709, %708 : vector<8x128xf32>
    %711 = arith.select %5, %708, %710 : vector<8x128xi1>, vector<8x128xf32>
    %712 = math.tanh %711 : vector<8x128xf32>
    %cst_223 = arith.constant 5.000000e-01 : f32
    %713 = vector.broadcast %cst_223 : f32 to vector<8x128xf32>
    %714 = arith.mulf %713, %712 : vector<8x128xf32>
    %cst_224 = arith.constant 5.000000e-01 : f32
    %715 = vector.broadcast %cst_224 : f32 to vector<8x128xf32>
    %716 = arith.addf %714, %715 : vector<8x128xf32>
    %717 = arith.select %5, %712, %716 : vector<8x128xi1>, vector<8x128xf32>
    %718 = vector.extract_strided_slice %717 {offsets = [0, 0], sizes = [8, 32], strides = [1, 1]} : vector<8x128xf32> to vector<8x32xf32>
    %719 = vector.extract_strided_slice %717 {offsets = [0, 32], sizes = [8, 32], strides = [1, 1]} : vector<8x128xf32> to vector<8x32xf32>
    %720 = vector.extract_strided_slice %717 {offsets = [0, 64], sizes = [8, 32], strides = [1, 1]} : vector<8x128xf32> to vector<8x32xf32>
    %721 = vector.extract_strided_slice %717 {offsets = [0, 96], sizes = [8, 32], strides = [1, 1]} : vector<8x128xf32> to vector<8x32xf32>
    %722 = arith.mulf %719, %626 : vector<8x32xf32>
    %723 = arith.mulf %718, %720 : vector<8x32xf32>
    %724 = arith.addf %722, %723 : vector<8x32xf32>
    %725 = math.tanh %724 : vector<8x32xf32>
    %726 = arith.mulf %721, %725 : vector<8x32xf32>
    %cst_225 = arith.constant dense<0.000000e+00> : vector<8x128xf32>
    %727 = tpu.matmul %726, %7, %cst_225 {dimension_numbers = #tpu.dot_dimension_numbers<[1], [0], [0], [1], [0, 0, 1, 1], [], []>} : vector<8x32xf32>, vector<32x128xf32>, vector<8x128xf32> -> vector<8x128xf32>
    %cst_226 = arith.constant dense<0.000000e+00> : vector<8x128xf32>
    %728 = tpu.matmul %650, %8, %cst_226 {dimension_numbers = #tpu.dot_dimension_numbers<[1], [0], [0], [1], [0, 0, 1, 1], [], []>} : vector<8x32xf32>, vector<32x128xf32>, vector<8x128xf32> -> vector<8x128xf32>
    %729 = arith.addf %727, %728 : vector<8x128xf32>
    %730 = arith.addf %729, %14 : vector<8x128xf32>
    %cst_227 = arith.constant 5.000000e-01 : f32
    %731 = vector.broadcast %cst_227 : f32 to vector<8x128xf32>
    %732 = arith.mulf %731, %730 : vector<8x128xf32>
    %733 = arith.select %5, %730, %732 : vector<8x128xi1>, vector<8x128xf32>
    %734 = math.tanh %733 : vector<8x128xf32>
    %cst_228 = arith.constant 5.000000e-01 : f32
    %735 = vector.broadcast %cst_228 : f32 to vector<8x128xf32>
    %736 = arith.mulf %735, %734 : vector<8x128xf32>
    %cst_229 = arith.constant 5.000000e-01 : f32
    %737 = vector.broadcast %cst_229 : f32 to vector<8x128xf32>
    %738 = arith.addf %736, %737 : vector<8x128xf32>
    %739 = arith.select %5, %734, %738 : vector<8x128xi1>, vector<8x128xf32>
    %740 = vector.extract_strided_slice %739 {offsets = [0, 0], sizes = [8, 32], strides = [1, 1]} : vector<8x128xf32> to vector<8x32xf32>
    %741 = vector.extract_strided_slice %739 {offsets = [0, 32], sizes = [8, 32], strides = [1, 1]} : vector<8x128xf32> to vector<8x32xf32>
    %742 = vector.extract_strided_slice %739 {offsets = [0, 64], sizes = [8, 32], strides = [1, 1]} : vector<8x128xf32> to vector<8x32xf32>
    %743 = vector.extract_strided_slice %739 {offsets = [0, 96], sizes = [8, 32], strides = [1, 1]} : vector<8x128xf32> to vector<8x32xf32>
    %744 = arith.mulf %741, %648 : vector<8x32xf32>
    %745 = arith.mulf %740, %742 : vector<8x32xf32>
    %746 = arith.addf %744, %745 : vector<8x32xf32>
    %747 = math.tanh %746 : vector<8x32xf32>
    %748 = arith.mulf %743, %747 : vector<8x32xf32>
    %c7_230 = arith.constant 7 : index
    %c0_231 = arith.constant 0 : index
    %c0_232 = arith.constant 0 : index
    %749 = vector.load %arg6[%c7_230, %c0_231, %c0_232] : memref<10x8x1xf32, #tpu.memory_space<vmem>>, vector<1x8x1xf32>
    %750 = vector.shape_cast %749 : vector<1x8x1xf32> to vector<8x1xf32>
    %751 = vector.broadcast %750 : vector<8x1xf32> to vector<8x32xf32>
    %752 = arith.mulf %751, %748 : vector<8x32xf32>
    %753 = arith.addf %655, %752 : vector<8x32xf32>
    %c7_233 = arith.constant 7 : index
    %c0_234 = arith.constant 0 : index
    %c0_235 = arith.constant 0 : index
    %754 = vector.load %arg7[%c7_233, %c0_234, %c0_235] : memref<8x8x128xf32, #tpu.memory_space<vmem>>, vector<1x8x128xf32>
    %755 = vector.shape_cast %754 : vector<1x8x128xf32> to vector<8x128xf32>
    %cst_236 = arith.constant dense<0.000000e+00> : vector<8x128xf32>
    %756 = tpu.matmul %677, %9, %cst_236 {dimension_numbers = #tpu.dot_dimension_numbers<[1], [0], [0], [1], [0, 0, 1, 1], [], []>} : vector<8x32xf32>, vector<32x128xf32>, vector<8x128xf32> -> vector<8x128xf32>
    %757 = arith.addf %755, %756 : vector<8x128xf32>
    %cst_237 = arith.constant 5.000000e-01 : f32
    %758 = vector.broadcast %cst_237 : f32 to vector<8x128xf32>
    %759 = arith.mulf %758, %757 : vector<8x128xf32>
    %760 = arith.select %5, %757, %759 : vector<8x128xi1>, vector<8x128xf32>
    %761 = math.tanh %760 : vector<8x128xf32>
    %cst_238 = arith.constant 5.000000e-01 : f32
    %762 = vector.broadcast %cst_238 : f32 to vector<8x128xf32>
    %763 = arith.mulf %762, %761 : vector<8x128xf32>
    %cst_239 = arith.constant 5.000000e-01 : f32
    %764 = vector.broadcast %cst_239 : f32 to vector<8x128xf32>
    %765 = arith.addf %763, %764 : vector<8x128xf32>
    %766 = arith.select %5, %761, %765 : vector<8x128xi1>, vector<8x128xf32>
    %767 = vector.extract_strided_slice %766 {offsets = [0, 0], sizes = [8, 32], strides = [1, 1]} : vector<8x128xf32> to vector<8x32xf32>
    %768 = vector.extract_strided_slice %766 {offsets = [0, 32], sizes = [8, 32], strides = [1, 1]} : vector<8x128xf32> to vector<8x32xf32>
    %769 = vector.extract_strided_slice %766 {offsets = [0, 64], sizes = [8, 32], strides = [1, 1]} : vector<8x128xf32> to vector<8x32xf32>
    %770 = vector.extract_strided_slice %766 {offsets = [0, 96], sizes = [8, 32], strides = [1, 1]} : vector<8x128xf32> to vector<8x32xf32>
    %771 = arith.mulf %768, %675 : vector<8x32xf32>
    %772 = arith.mulf %767, %769 : vector<8x32xf32>
    %773 = arith.addf %771, %772 : vector<8x32xf32>
    %774 = math.tanh %773 : vector<8x32xf32>
    %775 = arith.mulf %770, %774 : vector<8x32xf32>
    %cst_240 = arith.constant dense<0.000000e+00> : vector<8x128xf32>
    %776 = tpu.matmul %775, %10, %cst_240 {dimension_numbers = #tpu.dot_dimension_numbers<[1], [0], [0], [1], [0, 0, 1, 1], [], []>} : vector<8x32xf32>, vector<32x128xf32>, vector<8x128xf32> -> vector<8x128xf32>
    %cst_241 = arith.constant dense<0.000000e+00> : vector<8x128xf32>
    %777 = tpu.matmul %699, %11, %cst_241 {dimension_numbers = #tpu.dot_dimension_numbers<[1], [0], [0], [1], [0, 0, 1, 1], [], []>} : vector<8x32xf32>, vector<32x128xf32>, vector<8x128xf32> -> vector<8x128xf32>
    %778 = arith.addf %776, %777 : vector<8x128xf32>
    %779 = arith.addf %778, %17 : vector<8x128xf32>
    %cst_242 = arith.constant 5.000000e-01 : f32
    %780 = vector.broadcast %cst_242 : f32 to vector<8x128xf32>
    %781 = arith.mulf %780, %779 : vector<8x128xf32>
    %782 = arith.select %5, %779, %781 : vector<8x128xi1>, vector<8x128xf32>
    %783 = math.tanh %782 : vector<8x128xf32>
    %cst_243 = arith.constant 5.000000e-01 : f32
    %784 = vector.broadcast %cst_243 : f32 to vector<8x128xf32>
    %785 = arith.mulf %784, %783 : vector<8x128xf32>
    %cst_244 = arith.constant 5.000000e-01 : f32
    %786 = vector.broadcast %cst_244 : f32 to vector<8x128xf32>
    %787 = arith.addf %785, %786 : vector<8x128xf32>
    %788 = arith.select %5, %783, %787 : vector<8x128xi1>, vector<8x128xf32>
    %789 = vector.extract_strided_slice %788 {offsets = [0, 0], sizes = [8, 32], strides = [1, 1]} : vector<8x128xf32> to vector<8x32xf32>
    %790 = vector.extract_strided_slice %788 {offsets = [0, 32], sizes = [8, 32], strides = [1, 1]} : vector<8x128xf32> to vector<8x32xf32>
    %791 = vector.extract_strided_slice %788 {offsets = [0, 64], sizes = [8, 32], strides = [1, 1]} : vector<8x128xf32> to vector<8x32xf32>
    %792 = vector.extract_strided_slice %788 {offsets = [0, 96], sizes = [8, 32], strides = [1, 1]} : vector<8x128xf32> to vector<8x32xf32>
    %793 = arith.mulf %790, %697 : vector<8x32xf32>
    %794 = arith.mulf %789, %791 : vector<8x32xf32>
    %795 = arith.addf %793, %794 : vector<8x32xf32>
    %796 = math.tanh %795 : vector<8x32xf32>
    %797 = arith.mulf %792, %796 : vector<8x32xf32>
    %c7_245 = arith.constant 7 : index
    %c0_246 = arith.constant 0 : index
    %c0_247 = arith.constant 0 : index
    %798 = vector.load %arg12[%c7_245, %c0_246, %c0_247] : memref<8x8x1xf32, #tpu.memory_space<vmem>>, vector<1x8x1xf32>
    %799 = vector.shape_cast %798 : vector<1x8x1xf32> to vector<8x1xf32>
    %800 = vector.broadcast %799 : vector<8x1xf32> to vector<8x32xf32>
    %801 = arith.mulf %800, %797 : vector<8x32xf32>
    %802 = arith.addf %704, %801 : vector<8x32xf32>
    %c8 = arith.constant 8 : index
    %c0_248 = arith.constant 0 : index
    %c0_249 = arith.constant 0 : index
    %803 = vector.load %arg1[%c8, %c0_248, %c0_249] : memref<10x8x128xf32, #tpu.memory_space<vmem>>, vector<1x8x128xf32>
    %804 = vector.shape_cast %803 : vector<1x8x128xf32> to vector<8x128xf32>
    %cst_250 = arith.constant dense<0.000000e+00> : vector<8x128xf32>
    %805 = tpu.matmul %726, %6, %cst_250 {dimension_numbers = #tpu.dot_dimension_numbers<[1], [0], [0], [1], [0, 0, 1, 1], [], []>} : vector<8x32xf32>, vector<32x128xf32>, vector<8x128xf32> -> vector<8x128xf32>
    %806 = arith.addf %804, %805 : vector<8x128xf32>
    %cst_251 = arith.constant 5.000000e-01 : f32
    %807 = vector.broadcast %cst_251 : f32 to vector<8x128xf32>
    %808 = arith.mulf %807, %806 : vector<8x128xf32>
    %809 = arith.select %5, %806, %808 : vector<8x128xi1>, vector<8x128xf32>
    %810 = math.tanh %809 : vector<8x128xf32>
    %cst_252 = arith.constant 5.000000e-01 : f32
    %811 = vector.broadcast %cst_252 : f32 to vector<8x128xf32>
    %812 = arith.mulf %811, %810 : vector<8x128xf32>
    %cst_253 = arith.constant 5.000000e-01 : f32
    %813 = vector.broadcast %cst_253 : f32 to vector<8x128xf32>
    %814 = arith.addf %812, %813 : vector<8x128xf32>
    %815 = arith.select %5, %810, %814 : vector<8x128xi1>, vector<8x128xf32>
    %816 = vector.extract_strided_slice %815 {offsets = [0, 0], sizes = [8, 32], strides = [1, 1]} : vector<8x128xf32> to vector<8x32xf32>
    %817 = vector.extract_strided_slice %815 {offsets = [0, 32], sizes = [8, 32], strides = [1, 1]} : vector<8x128xf32> to vector<8x32xf32>
    %818 = vector.extract_strided_slice %815 {offsets = [0, 64], sizes = [8, 32], strides = [1, 1]} : vector<8x128xf32> to vector<8x32xf32>
    %819 = vector.extract_strided_slice %815 {offsets = [0, 96], sizes = [8, 32], strides = [1, 1]} : vector<8x128xf32> to vector<8x32xf32>
    %820 = arith.mulf %817, %724 : vector<8x32xf32>
    %821 = arith.mulf %816, %818 : vector<8x32xf32>
    %822 = arith.addf %820, %821 : vector<8x32xf32>
    %823 = math.tanh %822 : vector<8x32xf32>
    %824 = arith.mulf %819, %823 : vector<8x32xf32>
    %cst_254 = arith.constant dense<0.000000e+00> : vector<8x128xf32>
    %825 = tpu.matmul %824, %7, %cst_254 {dimension_numbers = #tpu.dot_dimension_numbers<[1], [0], [0], [1], [0, 0, 1, 1], [], []>} : vector<8x32xf32>, vector<32x128xf32>, vector<8x128xf32> -> vector<8x128xf32>
    %cst_255 = arith.constant dense<0.000000e+00> : vector<8x128xf32>
    %826 = tpu.matmul %748, %8, %cst_255 {dimension_numbers = #tpu.dot_dimension_numbers<[1], [0], [0], [1], [0, 0, 1, 1], [], []>} : vector<8x32xf32>, vector<32x128xf32>, vector<8x128xf32> -> vector<8x128xf32>
    %827 = arith.addf %825, %826 : vector<8x128xf32>
    %828 = arith.addf %827, %14 : vector<8x128xf32>
    %cst_256 = arith.constant 5.000000e-01 : f32
    %829 = vector.broadcast %cst_256 : f32 to vector<8x128xf32>
    %830 = arith.mulf %829, %828 : vector<8x128xf32>
    %831 = arith.select %5, %828, %830 : vector<8x128xi1>, vector<8x128xf32>
    %832 = math.tanh %831 : vector<8x128xf32>
    %cst_257 = arith.constant 5.000000e-01 : f32
    %833 = vector.broadcast %cst_257 : f32 to vector<8x128xf32>
    %834 = arith.mulf %833, %832 : vector<8x128xf32>
    %cst_258 = arith.constant 5.000000e-01 : f32
    %835 = vector.broadcast %cst_258 : f32 to vector<8x128xf32>
    %836 = arith.addf %834, %835 : vector<8x128xf32>
    %837 = arith.select %5, %832, %836 : vector<8x128xi1>, vector<8x128xf32>
    %838 = vector.extract_strided_slice %837 {offsets = [0, 0], sizes = [8, 32], strides = [1, 1]} : vector<8x128xf32> to vector<8x32xf32>
    %839 = vector.extract_strided_slice %837 {offsets = [0, 32], sizes = [8, 32], strides = [1, 1]} : vector<8x128xf32> to vector<8x32xf32>
    %840 = vector.extract_strided_slice %837 {offsets = [0, 64], sizes = [8, 32], strides = [1, 1]} : vector<8x128xf32> to vector<8x32xf32>
    %841 = vector.extract_strided_slice %837 {offsets = [0, 96], sizes = [8, 32], strides = [1, 1]} : vector<8x128xf32> to vector<8x32xf32>
    %842 = arith.mulf %839, %746 : vector<8x32xf32>
    %843 = arith.mulf %838, %840 : vector<8x32xf32>
    %844 = arith.addf %842, %843 : vector<8x32xf32>
    %845 = math.tanh %844 : vector<8x32xf32>
    %846 = arith.mulf %841, %845 : vector<8x32xf32>
    %c8_259 = arith.constant 8 : index
    %c0_260 = arith.constant 0 : index
    %c0_261 = arith.constant 0 : index
    %847 = vector.load %arg6[%c8_259, %c0_260, %c0_261] : memref<10x8x1xf32, #tpu.memory_space<vmem>>, vector<1x8x1xf32>
    %848 = vector.shape_cast %847 : vector<1x8x1xf32> to vector<8x1xf32>
    %849 = vector.broadcast %848 : vector<8x1xf32> to vector<8x32xf32>
    %850 = arith.mulf %849, %846 : vector<8x32xf32>
    %851 = arith.addf %753, %850 : vector<8x32xf32>
    %c9 = arith.constant 9 : index
    %c0_262 = arith.constant 0 : index
    %c0_263 = arith.constant 0 : index
    %852 = vector.load %arg1[%c9, %c0_262, %c0_263] : memref<10x8x128xf32, #tpu.memory_space<vmem>>, vector<1x8x128xf32>
    %853 = vector.shape_cast %852 : vector<1x8x128xf32> to vector<8x128xf32>
    %cst_264 = arith.constant dense<0.000000e+00> : vector<8x128xf32>
    %854 = tpu.matmul %824, %6, %cst_264 {dimension_numbers = #tpu.dot_dimension_numbers<[1], [0], [0], [1], [0, 0, 1, 1], [], []>} : vector<8x32xf32>, vector<32x128xf32>, vector<8x128xf32> -> vector<8x128xf32>
    %855 = arith.addf %853, %854 : vector<8x128xf32>
    %cst_265 = arith.constant 5.000000e-01 : f32
    %856 = vector.broadcast %cst_265 : f32 to vector<8x128xf32>
    %857 = arith.mulf %856, %855 : vector<8x128xf32>
    %858 = arith.select %5, %855, %857 : vector<8x128xi1>, vector<8x128xf32>
    %859 = math.tanh %858 : vector<8x128xf32>
    %cst_266 = arith.constant 5.000000e-01 : f32
    %860 = vector.broadcast %cst_266 : f32 to vector<8x128xf32>
    %861 = arith.mulf %860, %859 : vector<8x128xf32>
    %cst_267 = arith.constant 5.000000e-01 : f32
    %862 = vector.broadcast %cst_267 : f32 to vector<8x128xf32>
    %863 = arith.addf %861, %862 : vector<8x128xf32>
    %864 = arith.select %5, %859, %863 : vector<8x128xi1>, vector<8x128xf32>
    %865 = vector.extract_strided_slice %864 {offsets = [0, 0], sizes = [8, 32], strides = [1, 1]} : vector<8x128xf32> to vector<8x32xf32>
    %866 = vector.extract_strided_slice %864 {offsets = [0, 32], sizes = [8, 32], strides = [1, 1]} : vector<8x128xf32> to vector<8x32xf32>
    %867 = vector.extract_strided_slice %864 {offsets = [0, 64], sizes = [8, 32], strides = [1, 1]} : vector<8x128xf32> to vector<8x32xf32>
    %868 = vector.extract_strided_slice %864 {offsets = [0, 96], sizes = [8, 32], strides = [1, 1]} : vector<8x128xf32> to vector<8x32xf32>
    %869 = arith.mulf %866, %822 : vector<8x32xf32>
    %870 = arith.mulf %865, %867 : vector<8x32xf32>
    %871 = arith.addf %869, %870 : vector<8x32xf32>
    %872 = math.tanh %871 : vector<8x32xf32>
    %873 = arith.mulf %868, %872 : vector<8x32xf32>
    %cst_268 = arith.constant dense<0.000000e+00> : vector<8x128xf32>
    %874 = tpu.matmul %873, %7, %cst_268 {dimension_numbers = #tpu.dot_dimension_numbers<[1], [0], [0], [1], [0, 0, 1, 1], [], []>} : vector<8x32xf32>, vector<32x128xf32>, vector<8x128xf32> -> vector<8x128xf32>
    %cst_269 = arith.constant dense<0.000000e+00> : vector<8x128xf32>
    %875 = tpu.matmul %846, %8, %cst_269 {dimension_numbers = #tpu.dot_dimension_numbers<[1], [0], [0], [1], [0, 0, 1, 1], [], []>} : vector<8x32xf32>, vector<32x128xf32>, vector<8x128xf32> -> vector<8x128xf32>
    %876 = arith.addf %874, %875 : vector<8x128xf32>
    %877 = arith.addf %876, %14 : vector<8x128xf32>
    %cst_270 = arith.constant 5.000000e-01 : f32
    %878 = vector.broadcast %cst_270 : f32 to vector<8x128xf32>
    %879 = arith.mulf %878, %877 : vector<8x128xf32>
    %880 = arith.select %5, %877, %879 : vector<8x128xi1>, vector<8x128xf32>
    %881 = math.tanh %880 : vector<8x128xf32>
    %cst_271 = arith.constant 5.000000e-01 : f32
    %882 = vector.broadcast %cst_271 : f32 to vector<8x128xf32>
    %883 = arith.mulf %882, %881 : vector<8x128xf32>
    %cst_272 = arith.constant 5.000000e-01 : f32
    %884 = vector.broadcast %cst_272 : f32 to vector<8x128xf32>
    %885 = arith.addf %883, %884 : vector<8x128xf32>
    %886 = arith.select %5, %881, %885 : vector<8x128xi1>, vector<8x128xf32>
    %887 = vector.extract_strided_slice %886 {offsets = [0, 0], sizes = [8, 32], strides = [1, 1]} : vector<8x128xf32> to vector<8x32xf32>
    %888 = vector.extract_strided_slice %886 {offsets = [0, 32], sizes = [8, 32], strides = [1, 1]} : vector<8x128xf32> to vector<8x32xf32>
    %889 = vector.extract_strided_slice %886 {offsets = [0, 64], sizes = [8, 32], strides = [1, 1]} : vector<8x128xf32> to vector<8x32xf32>
    %890 = vector.extract_strided_slice %886 {offsets = [0, 96], sizes = [8, 32], strides = [1, 1]} : vector<8x128xf32> to vector<8x32xf32>
    %891 = arith.mulf %888, %844 : vector<8x32xf32>
    %892 = arith.mulf %887, %889 : vector<8x32xf32>
    %893 = arith.addf %891, %892 : vector<8x32xf32>
    %894 = math.tanh %893 : vector<8x32xf32>
    %895 = arith.mulf %890, %894 : vector<8x32xf32>
    %c9_273 = arith.constant 9 : index
    %c0_274 = arith.constant 0 : index
    %c0_275 = arith.constant 0 : index
    %896 = vector.load %arg6[%c9_273, %c0_274, %c0_275] : memref<10x8x1xf32, #tpu.memory_space<vmem>>, vector<1x8x1xf32>
    %897 = vector.shape_cast %896 : vector<1x8x1xf32> to vector<8x1xf32>
    %898 = vector.broadcast %897 : vector<8x1xf32> to vector<8x32xf32>
    %899 = arith.mulf %898, %895 : vector<8x32xf32>
    %900 = arith.addf %851, %899 : vector<8x32xf32>
    %c0_276 = arith.constant 0 : index
    %c0_277 = arith.constant 0 : index
    %901 = vector.load %arg13[%c0_276, %c0_277] : memref<32x32xf32, #tpu.memory_space<vmem>>, vector<32x32xf32>
    %cst_278 = arith.constant dense<0.000000e+00> : vector<8x32xf32>
    %902 = tpu.matmul %900, %901, %cst_278 {dimension_numbers = #tpu.dot_dimension_numbers<[1], [0], [0], [1], [0, 0, 1, 1], [], []>} : vector<8x32xf32>, vector<32x32xf32>, vector<8x32xf32> -> vector<8x32xf32>
    %c0_279 = arith.constant 0 : index
    %c0_280 = arith.constant 0 : index
    %903 = vector.load %arg14[%c0_279, %c0_280] : memref<32x32xf32, #tpu.memory_space<vmem>>, vector<32x32xf32>
    %cst_281 = arith.constant dense<0.000000e+00> : vector<8x32xf32>
    %904 = tpu.matmul %802, %903, %cst_281 {dimension_numbers = #tpu.dot_dimension_numbers<[1], [0], [0], [1], [0, 0, 1, 1], [], []>} : vector<8x32xf32>, vector<32x32xf32>, vector<8x32xf32> -> vector<8x32xf32>
    %905 = arith.addf %902, %904 : vector<8x32xf32>
    %c0_282 = arith.constant 0 : index
    %c0_283 = arith.constant 0 : index
    %906 = vector.load %arg15[%c0_282, %c0_283] : memref<1x32xf32, #tpu.memory_space<vmem>>, vector<1x32xf32>
    %907 = vector.broadcast %906 : vector<1x32xf32> to vector<8x32xf32>
    %908 = arith.addf %905, %907 : vector<8x32xf32>
    %cst_284 = arith.constant 0.000000e+00 : f32
    %909 = vector.broadcast %cst_284 : f32 to vector<8x32xf32>
    %910 = arith.cmpf ogt, %908, %909 : vector<8x32xf32>
    %cst_285 = arith.constant 0.00999999977 : f32
    %911 = vector.broadcast %cst_285 : f32 to vector<8x32xf32>
    %912 = arith.mulf %911, %908 : vector<8x32xf32>
    %913 = arith.select %910, %908, %912 : vector<8x32xi1>, vector<8x32xf32>
    %c0_286 = arith.constant 0 : index
    %c0_287 = arith.constant 0 : index
    %914 = vector.load %arg16[%c0_286, %c0_287] : memref<32x1xf32, #tpu.memory_space<vmem>>, vector<32x1xf32>
    %cst_288 = arith.constant dense<0.000000e+00> : vector<8x1xf32>
    %915 = tpu.matmul %913, %914, %cst_288 {dimension_numbers = #tpu.dot_dimension_numbers<[1], [0], [0], [1], [0, 0, 1, 1], [], []>} : vector<8x32xf32>, vector<32x1xf32>, vector<8x1xf32> -> vector<8x1xf32>
    %c0_289 = arith.constant 0 : index
    %c0_290 = arith.constant 0 : index
    %916 = vector.load %arg17[%c0_289, %c0_290] : memref<1x1xf32, #tpu.memory_space<vmem>>, vector<1x1xf32>
    %917 = vector.broadcast %916 : vector<1x1xf32> to vector<8x1xf32>
    %918 = arith.addf %915, %917 : vector<8x1xf32>
    %919 = arith.negf %918 : vector<8x1xf32>
    %920 = math.exp %919 : vector<8x1xf32>
    %cst_291 = arith.constant 1.000000e+00 : f32
    %921 = vector.broadcast %cst_291 : f32 to vector<8x1xf32>
    %922 = arith.addf %921, %920 : vector<8x1xf32>
    %923 = arith.divf %921, %922 : vector<8x1xf32>
    %c0_292 = arith.constant 0 : index
    %c0_293 = arith.constant 0 : index
    %924 = vector.load %arg18[%c0_292, %c0_293] : memref<8x1xf32, #tpu.memory_space<vmem>>, vector<8x1xf32>
    tpu.vector_store %arg18[%c0_292, %c0_293], %923 {strides = array<i32>} : memref<8x1xf32, #tpu.memory_space<vmem>>, vector<8x1xf32>,
    return
  }
  func.func @transform_0(%arg0: i32) -> (i32, i32, i32) {
    %c0_i32 = arith.constant 0 : i32
    %c0_i32_0 = arith.constant 0 : i32
    %c0_i32_1 = arith.constant 0 : i32
    return %c0_i32, %arg0, %c0_i32_0 : i32, i32, i32
  }
  func.func @transform_1(%arg0: i32) -> (i32, i32) {
    %c0_i32 = arith.constant 0 : i32
    %c0_i32_0 = arith.constant 0 : i32
    %c0_i32_1 = arith.constant 0 : i32
    return %c0_i32, %c0_i32_0 : i32, i32
  }
  func.func @transform_2(%arg0: i32) -> (i32, i32) {
    %c0_i32 = arith.constant 0 : i32
    %c0_i32_0 = arith.constant 0 : i32
    %c0_i32_1 = arith.constant 0 : i32
    return %c0_i32, %c0_i32_0 : i32, i32
  }
  func.func @transform_3(%arg0: i32) -> (i32, i32) {
    %c0_i32 = arith.constant 0 : i32
    %c0_i32_0 = arith.constant 0 : i32
    %c0_i32_1 = arith.constant 0 : i32
    return %c0_i32, %c0_i32_0 : i32, i32
  }
  func.func @transform_4(%arg0: i32) -> (i32, i32) {
    %c0_i32 = arith.constant 0 : i32
    %c0_i32_0 = arith.constant 0 : i32
    %c0_i32_1 = arith.constant 0 : i32
    return %c0_i32, %c0_i32_0 : i32, i32
  }
  func.func @transform_5(%arg0: i32) -> (i32, i32, i32) {
    %c0_i32 = arith.constant 0 : i32
    %c0_i32_0 = arith.constant 0 : i32
    %c0_i32_1 = arith.constant 0 : i32
    return %c0_i32, %arg0, %c0_i32_0 : i32, i32, i32
  }
  func.func @transform_6(%arg0: i32) -> (i32, i32, i32) {
    %c0_i32 = arith.constant 0 : i32
    %c0_i32_0 = arith.constant 0 : i32
    %c0_i32_1 = arith.constant 0 : i32
    return %c0_i32, %arg0, %c0_i32_0 : i32, i32, i32
  }
  func.func @transform_7(%arg0: i32) -> (i32, i32) {
    %c0_i32 = arith.constant 0 : i32
    %c0_i32_0 = arith.constant 0 : i32
    %c0_i32_1 = arith.constant 0 : i32
    return %c0_i32, %c0_i32_0 : i32, i32
  }
  func.func @transform_8(%arg0: i32) -> (i32, i32) {
    %c0_i32 = arith.constant 0 : i32
    %c0_i32_0 = arith.constant 0 : i32
    %c0_i32_1 = arith.constant 0 : i32
    return %c0_i32, %c0_i32_0 : i32, i32
  }
  func.func @transform_9(%arg0: i32) -> (i32, i32) {
    %c0_i32 = arith.constant 0 : i32
    %c0_i32_0 = arith.constant 0 : i32
    %c0_i32_1 = arith.constant 0 : i32
    return %c0_i32, %c0_i32_0 : i32, i32
  }
  func.func @transform_10(%arg0: i32) -> (i32, i32) {
    %c0_i32 = arith.constant 0 : i32
    %c0_i32_0 = arith.constant 0 : i32
    %c0_i32_1 = arith.constant 0 : i32
    return %c0_i32, %c0_i32_0 : i32, i32
  }
  func.func @transform_11(%arg0: i32) -> (i32, i32, i32) {
    %c0_i32 = arith.constant 0 : i32
    %c0_i32_0 = arith.constant 0 : i32
    %c0_i32_1 = arith.constant 0 : i32
    return %c0_i32, %arg0, %c0_i32_0 : i32, i32, i32
  }
  func.func @transform_12(%arg0: i32) -> (i32, i32) {
    %c0_i32 = arith.constant 0 : i32
    %c0_i32_0 = arith.constant 0 : i32
    %c0_i32_1 = arith.constant 0 : i32
    return %c0_i32, %c0_i32_0 : i32, i32
  }
  func.func @transform_13(%arg0: i32) -> (i32, i32) {
    %c0_i32 = arith.constant 0 : i32
    %c0_i32_0 = arith.constant 0 : i32
    %c0_i32_1 = arith.constant 0 : i32
    return %c0_i32, %c0_i32_0 : i32, i32
  }
  func.func @transform_14(%arg0: i32) -> (i32, i32) {
    %c0_i32 = arith.constant 0 : i32
    %c0_i32_0 = arith.constant 0 : i32
    %c0_i32_1 = arith.constant 0 : i32
    return %c0_i32, %c0_i32_0 : i32, i32
  }
  func.func @transform_15(%arg0: i32) -> (i32, i32) {
    %c0_i32 = arith.constant 0 : i32
    %c0_i32_0 = arith.constant 0 : i32
    %c0_i32_1 = arith.constant 0 : i32
    return %c0_i32, %c0_i32_0 : i32, i32
  }
  func.func @transform_16(%arg0: i32) -> (i32, i32) {
    %c0_i32 = arith.constant 0 : i32
    %c0_i32_0 = arith.constant 0 : i32
    %c0_i32_1 = arith.constant 0 : i32
    return %c0_i32, %c0_i32_0 : i32, i32
  }
  func.func @transform_17(%arg0: i32) -> (i32, i32) {
    %c0_i32 = arith.constant 0 : i32
    %c0_i32_0 = arith.constant 0 : i32
    return %arg0, %c0_i32 : i32, i32
  }
}

</mosaic_0001>

<bundles_post_ra>
// kernel: double_lstm_classifier.1
= control target key start
LH: loop header
LB: loop body
LE: loop exit
PB: predicated region body
PF: predicated region fallthrough
CT: control target
= control target key end

     0   :  { %v6881_v0 = vmov 0.0|0.0   ;;  %vm6882_vm0 = vmmov 0   ;;  %v6883_v8 = vmov 0.0   ;;  %v58_v20 = vlaneseq  ;;  %s6884_s23 = smov 64   ;;  %s6885_s24 = smov 32   ;;  %s8196_s1 = inlined_call_operand.vmem [shape: f32[32,128], index: 1, kind: input, shape index: {}]   ;;  %s8197_s3 = inlined_call_operand.vmem [shape: f32[32,128], index: 3, kind: input, shape index: {}]   ;;  %s8198_s7 = inlined_call_operand.vmem [shape: f32[32,128], index: 7, kind: input, shape index: {}]   ;;  %s8199_s0 = inlined_call_operand.vmem [shape: f32[10,8,128], index: 0, kind: input, shape index: {}]   ;;  %s8200_s6 = inlined_call_operand.vmem [shape: f32[8,8,128], index: 6, kind: input, shape index: {}]   ;;  %s8201_s2 = inlined_call_operand.vmem [shape: f32[32,128], index: 2, kind: input, shape index: {}]   ;;  %s8202_s8 = inlined_call_operand.vmem [shape: f32[32,128], index: 8, kind: input, shape index: {}]   ;;  %s8203_s9 = inlined_call_operand.vmem [shape: f32[32,128], index: 9, kind: input, shape index: {}]   ;;  %s8204_s4 = inlined_call_operand.vmem [shape: f32[1,128], index: 4, kind: input, shape index: {}]   ;;  %s8205_s10 = inlined_call_operand.vmem [shape: f32[1,128], index: 10, kind: input, shape index: {}]   ;;  %s8206_s5 = inlined_call_operand.vmem [shape: f32[10,8,1], index: 5, kind: input, shape index: {}]   ;;  %s8207_s11 = inlined_call_operand.vmem [shape: f32[8,8,1], index: 11, kind: input, shape index: {}]   ;;  %s8208_s13 = inlined_call_operand.vmem [shape: f32[32,32], index: 13, kind: input, shape index: {}]   ;;  %s8209_s12 = inlined_call_operand.vmem [shape: f32[32,32], index: 12, kind: input, shape index: {}]   ;;  %s8210_s15 = inlined_call_operand.vmem [shape: f32[32,1], index: 15, kind: input, shape index: {}]   ;;  %s8211_s16 = inlined_call_operand.<no memory space> [shape: f32[1,1], index: 16, kind: input, shape index: {}]   ;;  %s8212_s14 = inlined_call_operand.vmem [shape: f32[1,32], index: 14, kind: input, shape index: {}]   ;;  %s8213_s17 = inlined_call_operand.vmem [shape: f32[8,1], index: 17, kind: output, shape index: {}]  }
   0x1   :  { %8216 = sst [smem:[#allocation3_spill]] %s8196_s1  ;;  %6380 = vmatprep.subr.bf16.mxu0 %v6881_v0  ;;  %6386 = vmatprep.subr.bf16.mxu1 %v6881_v0  ;;  %v75_v14 = vld [vmem:[%s8198_s7] sm:$0xff]  ;;  %v76_v15 = vld [vmem:[%s8198_s7 + $0x8] sm:$0xff]  ;;  %v77_v17 = vld [vmem:[%s8198_s7 + $0x10] sm:$0xff]  ;;  %vm102_vm4 = vcmask 261120   ;;  %vm5372_vm6 = vcmask 7168  }
   0x2   :  { %8217 = sst [smem:[#allocation4_spill]] %s8197_s3  ;;  %s8218_s26 = sld [smem:[#allocation3_spill]]  ;;  %5761 = vmatprep.mubr.msk.f32.mxu0 %vm6882_vm0, %v6883_v8  ;;  %5772 = vmatprep.mubr.msk.f32.mxu1 %vm6882_vm0, %v6883_v8  ;;  %v7027_v16 = vpack.c.bf16 %v76_v15, %v75_v14  ;;  %v78_v18 = vld [vmem:[%s8198_s7 + $0x18] sm:$0xff]  ;;  %v59_v21 = vand.u32 127, %v58_v20  ;;  %v101_v22 = vld [vmem:[%s8199_s0] sm:$0xff]  ;;  %v68_v57 = vld [vmem:[%s8201_s2 + $0x8] sm:$0xff] }
   0x3   :  { %s8219_s30 = sld [smem:[#allocation4_spill]]  ;;  %v7042_v19 = vpack.c.bf16 %v78_v18, %v77_v17  ;;  %v377_v31 = vld [vmem:[%s8200_s6] sm:$0xff]  ;;  %v69_v58 = vld [vmem:[%s8201_s2 + $0x10] sm:$0xff]  ;;  %v70_v60 = vld [vmem:[%s8201_s2 + $0x18] sm:$0xff] }
   0x4   :  { %vm60_vm1 = vcmp.ge.s32.totalorder %v59_v21, 64  ;;  %vm61_vm2 = vcmp.lt.s32.totalorder %v59_v21, 96  ;;  %v67_v56 = vld [vmem:[%s8201_s2] sm:$0xff]  ;;  %v7098_v61 = vpack.c.bf16 %v70_v60, %v69_v58  ;;  %v84_v17 = vld [vmem:[%s8203_s9 + $0x8] sm:$0xff]  ;;  %v85_v20 = vld [vmem:[%s8203_s9 + $0x10] sm:$0xff] }
   0x5   :  { %vm7057_vm3 = vmand %vm60_vm1, %vm61_vm2  ;;  %v7092_v59 = vpack.c.bf16 %v68_v57, %v67_v56  ;;  %v79_v63 = vld [vmem:[%s8202_s8] sm:$0xff]  ;;  %v86_v21 = vld [vmem:[%s8203_s9 + $0x18] sm:$0xff] }
   0x6   :  { %v83_v15 = vld [vmem:[%s8203_s9] sm:$0xff]  ;;  %v5396_v27 = vld [vmem:[%s8206_s5 + $0x10] sm:$0xff] }
   0x7   :  { %v7132_v18 = vpack.c.bf16 %v84_v17, %v83_v15 }
   0x8   :  { %v63_v1 = vld [vmem:[%s8218_s26] sm:$0xff]  ;;  %v64_v2 = vld [vmem:[%s8218_s26 + $0x8] sm:$0xff]  ;;  %v65_v6 = vld [vmem:[%s8218_s26 + $0x10] sm:$0xff] }
   0x9   :  { %v71_v3 = vld [vmem:[%s8219_s30] sm:$0xff]  ;;  %v6988_v4 = vpack.c.bf16 %v64_v2, %v63_v1  ;;  %v72_v5 = vld [vmem:[%s8219_s30 + $0x8] sm:$0xff]  ;;  %v66_v7 = vld [vmem:[%s8218_s26 + $0x18] sm:$0xff] }
   0xa   :  { %v7003_v9 = vpack.c.bf16 %v72_v5, %v71_v3  ;;  %v73_v10 = vld [vmem:[%s8219_s30 + $0x10] sm:$0xff]  ;;  %v74_v11 = vld [vmem:[%s8219_s30 + $0x18] sm:$0xff]  ;;  %v7012_v12 = vpack.c.bf16 %v66_v7, %v65_v6  ;;  %v80_v1 = vld [vmem:[%s8202_s8 + $0x8] sm:$0xff] }
   0xb   :  { %6382 = vmatpush3.bf16.msra.mxu0 %v6988_v4  ;;  %v7016_v13 = vpack.c.bf16 %v74_v11, %v73_v10  ;;  %v7110_v2 = vpack.c.bf16 %v80_v1, %v79_v63  ;;  %v81_v3 = vld [vmem:[%s8202_s8 + $0x10] sm:$0xff]  ;;  %v82_v5 = vld [vmem:[%s8202_s8 + $0x18] sm:$0xff] }
   0xc   :  { %6388 = vmatpush3.bf16.msra.mxu1 %v7003_v9  ;;  %6383 = vmatprep.subr.bf16.mxu0 %v6881_v0  ;;  %v7120_v6 = vpack.c.bf16 %v82_v5, %v81_v3 }
   0xd   :  { %6389 = vmatprep.subr.bf16.mxu1 %v6881_v0 }
   0xf   :  { %6385 = vmatpush3.bf16.msra.mxu0 %v7012_v12 }
  0x10   :  { %6391 = vmatpush3.bf16.msra.mxu1 %v7016_v13  ;;  %6392 = vmatprep.subr.bf16.mxu0 %v6881_v0 }
  0x11   :  { %6398 = vmatprep.subr.bf16.mxu1 %v6881_v0 }
  0x12   :  { %5762 = vmatmul.mubr.f32.vlgmr.msra.gmra.mrb[0].mxu0 %v6883_v8 }
  0x13   :  { %5773 = vmatmul.mubr.f32.vlgmr.msra.gmra.mrb[0].mxu1 %v6883_v8  ;;  %5783 = vmatprep.mubr.msk.f32.mxu0 %vm6882_vm0, %v6883_v8 }
  0x14   :  { %6400 = vmatpush3.bf16.msra.mxu1 %v7027_v16  ;;  %5794 = vmatprep.mubr.msk.f32.mxu1 %vm6882_vm0, %v6883_v8 }
  0x15   :  { %6401 = vmatprep.subr.bf16.mxu1 %v6881_v0  ;;  %6394 = vmatpush3.bf16.msra.mxu0 %v7092_v59 }
  0x16   :  { %6395 = vmatprep.subr.bf16.mxu0 %v6881_v0 }
  0x18   :  { %6403 = vmatpush3.bf16.msra.mxu1 %v7042_v19 }
  0x19   :  { %6410 = vmatprep.subr.bf16.mxu1 %v6881_v0  ;;  %6397 = vmatpush3.bf16.msra.mxu0 %v7098_v61 }
  0x1a   :  { %6404 = vmatprep.subr.bf16.mxu0 %v6881_v0 }
  0x1b   :  { %5795 = vmatmul.mubr.f32.vlgmr.msra.gmra.mrb[2].mxu1 %v6883_v8 }
  0x1c   :  { %5816 = vmatprep.mubr.msk.f32.mxu1 %vm6882_vm0, %v6883_v8  ;;  %6412 = vmatpush3.bf16.msra.mxu1 %v7110_v2 }
  0x1d   :  { %6413 = vmatprep.subr.bf16.mxu1 %v6881_v0 }
  0x20   :  { %6415 = vmatpush3.bf16.msra.mxu1 %v7120_v6 }
  0x21   :  { %6422 = vmatprep.subr.bf16.mxu1 %v6881_v0 }
  0xe5   :  { %v172_v23 = vpop.f32.mrb[0].mxu0 }
  0xe6   :  { %v176_v24 = vadd.f32 %v172_v23, %v101_v22  ;;  %v5763_v25 = vpop.f32.mrb[1].mxu0  ;;  %v7055_v26 = vpop.f32.mrb[0].mxu1  ;;  %v7142_v23 = vpack.c.bf16 %v86_v21, %v85_v20 }
  0xe7   :  { %v5774_v28 = vpop.f32.mrb[1].mxu1  ;;  %v7176_v25 = vld [vmem:[%s8204_s4] ss:$0 sm:$0xff] }
  0xe8   :  { %v177_v29 = vmul.f32 0.5, %v176_v24 }
  0xea   :  { %v178_v30 = vsel %vm7057_vm3, %v176_v24, %v177_v29 }
  0xeb   :  { %6730 = vtanh.f32 %v178_v30 }
  0xee   :  { %v444_v32 = vpop.f32.mrb[2].mxu1 }
  0xef   :  { %v448_v33 = vadd.f32 %v444_v32, %v377_v31  ;;  %v5796_v34 = vpop.f32.mrb[3].mxu1 }
  0xf1   :  { %v449_v35 = vmul.f32 0.5, %v448_v33 }
  0xf3   :  { %v450_v36 = vsel %vm7057_vm3, %v448_v33, %v449_v35 }
  0xf4   :  { %6732 = vtanh.f32 %v450_v36  ;;  %v7185_v36 = vld [vmem:[%s8205_s10] ss:$0 sm:$0xff] }
  0xf5   :  { %v6731_v37 = vpop.eup %6730 }
  0xf6   :  { %v180_v38 = vmul.f32 0.5, %v6731_v37 }
  0xf8   :  { %v181_v39 = vadd.f32 0.5, %v180_v38 }
  0xfa   :  { %v182_v40 = vsel %vm7057_vm3, %v6731_v37, %v181_v39 }
  0xfb   :  { %185 = vrot.lane.b32.xlu0 %v182_v40, %s6884_s23  ;;  %v183_v49 = vmul.f32 0.0, %v182_v40 }
  0xfe   :  { %v6733_v41 = vpop.eup %6732 }
  0xff   :  { %v452_v42 = vmul.f32 0.5, %v6733_v41 }
 0x101   :  { %v453_v43 = vadd.f32 0.5, %v452_v42 }
 0x103   :  { %v454_v44 = vsel %vm7057_vm3, %v6733_v41, %v453_v43  ;;  %v5382_v41 = vld [vmem:[%s8199_s0 + $0x8] sm:$0xff] }
 0x104   :  { %457 = vrot.lane.b32.xlu0 %v454_v44, %s6884_s23  ;;  %v455_v52 = vmul.f32 0.0, %v454_v44 }
 0x16d   :  { %v186_v45 = vpop.permute.xlu0 %185 }
 0x16e   :  { %v188_v46 = vmul.f32 %v186_v45, %v182_v40 }
 0x170   :  { %190 = vrot.lane.b32.xlu1 %v188_v46, %s6885_s24 }
 0x176   :  { %v458_v47 = vpop.permute.xlu0 %457 }
 0x177   :  { %v460_v48 = vmul.f32 %v458_v47, %v454_v44 }
 0x179   :  { %462 = vrot.lane.b32.xlu1 %v460_v48, %s6885_s24 }
 0x1e2   :  { %v191_v50 = vpop.permute.xlu1 %190 }
 0x1e3   :  { %v7076_v51 = vadd.f32 %v191_v50, %v183_v49 }
 0x1e5   :  { %6734 = vtanh.f32 %v7076_v51 }
 0x1eb   :  { %v463_v53 = vpop.permute.xlu1 %462 }
 0x1ec   :  { %v7079_v54 = vadd.f32 %v463_v53, %v455_v52 }
 0x1ee   :  { %6736 = vtanh.f32 %v7079_v54 }
 0x1ef   :  { %v6735_v55 = vpop.eup %6734 }
 0x1f0   :  { %196 = vrot.lane.b32.xlu0 %v6735_v55, %s6884_s23 }
 0x1f8   :  { %v6737_v62 = vpop.eup %6736 }
 0x1f9   :  { %468 = vrot.lane.b32.xlu1 %v6737_v62, %s6884_s23 }
 0x262   :  { %v197_v7 = vpop.permute.xlu0 %196 }
 0x263   :  { %v199_v10 = vmul.f32 %v197_v7, %v182_v40 }
 0x265   :  { %271 = vrot.lane.b32.xlu0 %v199_v10, %s6885_s24 }
 0x26b   :  { %v469_v11 = vpop.permute.xlu1 %468 }
 0x26c   :  { %v471_v14 = vmul.f32 %v469_v11, %v454_v44 }
 0x26e   :  { %543 = vrot.lane.b32.xlu1 %v471_v14, %s6885_s24 }
 0x2d7   :  { %v272_v22 = vpop.permute.xlu0 %271 }
 0x2d8   :  { %5784 = vmatmul.mubr.msk.f32.vlgmr.msra.gmra.mrb[2].mxu0 %vm102_vm4, %v272_v22 }
 0x2d9   :  { %6406 = vmatpush3.bf16.msra.mxu0 %v7132_v18  ;;  %5805 = vmatprep.mubr.msk.f32.mxu0 %vm6882_vm0, %v6883_v8 }
 0x2da   :  { %6407 = vmatprep.subr.bf16.mxu0 %v6881_v0 }
 0x2dd   :  { %6409 = vmatpush3.bf16.msra.mxu0 %v7142_v23 }
 0x2de   :  { %6416 = vmatprep.subr.bf16.mxu0 %v6881_v0 }
 0x2e0   :  { %v7149_v24 = vpop.permute.xlu1 %543  ;;  %5806 = vmatmul.mubr.f32.vlgmr.msra.gmra.mrb[4].mxu0 %v6883_v8 }
 0x2e1   :  { %5817 = vmatmul.mubr.msk.f32.vlgmr.msra.gmra.mrb[4].mxu1 %vm102_vm4, %v7149_v24  ;;  %6418 = vmatpush3.bf16.msra.mxu0 %v6988_v4 }
 0x2e2   :  { %6419 = vmatprep.subr.bf16.mxu0 %v6881_v0  ;;  %5827 = vmatprep.mubr.msk.f32.mxu0 %vm6882_vm0, %v6883_v8 }
 0x2e3   :  { %6424 = vmatpush3.bf16.msra.mxu1 %v7003_v9  ;;  %5838 = vmatprep.mubr.msk.f32.mxu1 %vm6882_vm0, %v6883_v8 }
 0x2e4   :  { %6425 = vmatprep.subr.bf16.mxu1 %v6881_v0 }
 0x2e5   :  { %6421 = vmatpush3.bf16.msra.mxu0 %v7012_v12 }
 0x2e6   :  { %6428 = vmatprep.subr.bf16.mxu0 %v6881_v0 }
 0x2e7   :  { %6427 = vmatpush3.bf16.msra.mxu1 %v7016_v13 }
 0x2e8   :  { %5828 = vmatmul.mubr.msk.f32.vlgmr.msra.gmra.mrb[6].mxu0 %vm102_vm4, %v272_v22  ;;  %6434 = vmatprep.subr.bf16.mxu1 %v6881_v0 }
 0x2e9   :  { %6430 = vmatpush3.bf16.msra.mxu0 %v7092_v59  ;;  %5849 = vmatprep.mubr.msk.f32.mxu0 %vm6882_vm0, %v6883_v8 }
 0x2ea   :  { %6431 = vmatprep.subr.bf16.mxu0 %v6881_v0 }
 0x2ed   :  { %6433 = vmatpush3.bf16.msra.mxu0 %v7098_v61 }
 0x2ee   :  { %6440 = vmatprep.subr.bf16.mxu0 %v6881_v0 }
 0x3ab   :  { %v341_v28 = vpop.f32.mrb[2].mxu0 }
 0x3ac   :  { %v342_v29 = vadd.f32 %v341_v28, %v7055_v26  ;;  %v5785_v30 = vpop.f32.mrb[3].mxu0 }
 0x3ae   :  { %v345_v31 = vadd.f32 %v7176_v25, %v342_v29 }
 0x3b0   :  { %v346_v32 = vmul.f32 0.5, %v345_v31 }
 0x3b2   :  { %v347_v33 = vsel %vm7057_vm3, %v345_v31, %v346_v32 }
 0x3b3   :  { %6738 = vtanh.f32 %v347_v33  ;;  %v538_v34 = vpop.f32.mrb[4].mxu0 }
 0x3b4   :  { %v5807_v35 = vpop.f32.mrb[5].mxu0  ;;  %v613_v37 = vpop.f32.mrb[4].mxu1 }
 0x3b5   :  { %v614_v38 = vadd.f32 %v613_v37, %v538_v34  ;;  %v5818_v39 = vpop.f32.mrb[5].mxu1 }
 0x3b7   :  { %v617_v26 = vadd.f32 %v7185_v36, %v614_v38 }
 0x3b9   :  { %v618_v40 = vmul.f32 0.5, %v617_v26 }
 0x3bb   :  { %v619_v42 = vsel %vm7057_vm3, %v617_v26, %v618_v40  ;;  %v717_v43 = vpop.f32.mrb[6].mxu0 }
 0x3bc   :  { %6740 = vtanh.f32 %v619_v42  ;;  %v721_v44 = vadd.f32 %v5382_v41, %v717_v43  ;;  %v5829_v45 = vpop.f32.mrb[7].mxu0  ;;  %v5387_v43 = vld [vmem:[%s8200_s6 + $0x8] sm:$0xff] }
 0x3bd   :  { %v6739_v46 = vpop.eup %6738 }
 0x3be   :  { %v722_v47 = vmul.f32 0.5, %v721_v44  ;;  %v349_v48 = vmul.f32 0.5, %v6739_v46 }
 0x3c0   :  { %v723_v49 = vsel %vm7057_vm3, %v721_v44, %v722_v47  ;;  %v350_v50 = vadd.f32 0.5, %v349_v48 }
 0x3c1   :  { %6742 = vtanh.f32 %v723_v49 }
 0x3c2   :  { %v351_v52 = vsel %vm7057_vm3, %v6739_v46, %v350_v50 }
 0x3c3   :  { %354 = vrot.lane.b32.xlu0 %v351_v52, %s6884_s23  ;;  %v352_v14 = vmul.f32 0.0, %v351_v52 }
 0x3c6   :  { %v6741_v53 = vpop.eup %6740 }
 0x3c7   :  { %v621_v55 = vmul.f32 0.5, %v6741_v53 }
 0x3c9   :  { %v622_v56 = vadd.f32 0.5, %v621_v55 }
 0x3cb   :  { %v6743_v57 = vpop.eup %6742  ;;  %v623_v58 = vsel %vm7057_vm3, %v6741_v53, %v622_v56 }
 0x3cc   :  { %626 = vrot.lane.b32.xlu0 %v623_v58, %s6884_s23  ;;  %v725_v60 = vmul.f32 0.5, %v6743_v57  ;;  %v624_v20 = vmul.f32 0.0, %v623_v58 }
 0x3ce   :  { %v726_v62 = vadd.f32 0.5, %v725_v60 }
 0x3d0   :  { %v727_v63 = vsel %vm7057_vm3, %v6743_v57, %v726_v62 }
 0x3d1   :  { %730 = vrot.lane.b32.xlu1 %v727_v63, %s6884_s23  ;;  %v728_v29 = vmul.f32 %v727_v63, %v7076_v51 }
 0x435   :  { %v355_v1 = vpop.permute.xlu0 %354 }
 0x436   :  { %v357_v3 = vmul.f32 %v355_v1, %v351_v52  ;;  %v5392_v1 = vld [vmem:[%s8199_s0 + $0x10] sm:$0xff] }
 0x438   :  { %359 = vrot.lane.b32.xlu1 %v357_v3, %s6885_s24 }
 0x43e   :  { %v627_v5 = vpop.permute.xlu0 %626 }
 0x43f   :  { %v629_v7 = vmul.f32 %v627_v5, %v623_v58 }
 0x441   :  { %631 = vrot.lane.b32.xlu1 %v629_v7, %s6885_s24 }
 0x443   :  { %v731_v10 = vpop.permute.xlu1 %730 }
 0x444   :  { %v733_v11 = vmul.f32 %v731_v10, %v727_v63 }
 0x446   :  { %735 = vrot.lane.b32.xlu0 %v733_v11, %s6885_s24 }
 0x4aa   :  { %v360_v15 = vpop.permute.xlu1 %359 }
 0x4ab   :  { %v7207_v17 = vadd.f32 %v360_v15, %v352_v14 }
 0x4ad   :  { %6744 = vtanh.f32 %v7207_v17 }
 0x4b3   :  { %v632_v21 = vpop.permute.xlu1 %631 }
 0x4b4   :  { %v7210_v22 = vadd.f32 %v632_v21, %v624_v20 }
 0x4b6   :  { %6746 = vtanh.f32 %v7210_v22 }
 0x4b7   :  { %v6745_v28 = vpop.eup %6744 }
 0x4b8   :  { %v736_v30 = vpop.permute.xlu0 %735  ;;  %365 = vrot.lane.b32.xlu0 %v6745_v28, %s6884_s23 }
 0x4b9   :  { %v7215_v31 = vadd.f32 %v736_v30, %v728_v29 }
 0x4bb   :  { %6748 = vtanh.f32 %v7215_v31 }
 0x4c0   :  { %v6747_v32 = vpop.eup %6746 }
 0x4c1   :  { %637 = vrot.lane.b32.xlu0 %v6747_v32, %s6884_s23 }
 0x4c5   :  { %v6749_v33 = vpop.eup %6748 }
 0x4c6   :  { %741 = vrot.lane.b32.xlu1 %v6749_v33, %s6884_s23 }
 0x52a   :  { %v366_v34 = vpop.permute.xlu0 %365 }
 0x52b   :  { %v7220_v35 = vmul.f32 %v366_v34, %v351_v52 }
 0x52d   :  { %746 = vrot.lane.b32.xlu1 %v7220_v35, %s6885_s24 }
 0x533   :  { %v638_v51 = vpop.permute.xlu0 %637 }
 0x534   :  { %v7224_v37 = vmul.f32 %v638_v51, %v623_v58 }
 0x536   :  { %1025 = vrot.lane.b32.xlu1 %v7224_v37, %s6885_s24 }
 0x538   :  { %v742_v38 = vpop.permute.xlu1 %741 }
 0x539   :  { %v744_v39 = vmul.f32 %v742_v38, %v727_v63 }
 0x53b   :  { %821 = vrot.lane.b32.xlu0 %v744_v39, %s6885_s24 }
 0x59f   :  { %v747_v26 = vpop.permute.xlu1 %746 }
 0x5a0   :  { %5839 = vmatmul.mubr.msk.f32.vlgmr.msra.gmra.mrb[6].mxu1 %vm102_vm4, %v747_v26 }
 0x5a1   :  { %6436 = vmatpush3.bf16.msra.mxu1 %v7027_v16  ;;  %5860 = vmatprep.mubr.msk.f32.mxu1 %vm6882_vm0, %v6883_v8 }
 0x5a2   :  { %6437 = vmatprep.subr.bf16.mxu1 %v6881_v0 }
 0x5a5   :  { %6439 = vmatpush3.bf16.msra.mxu1 %v7042_v19 }
 0x5a6   :  { %6446 = vmatprep.subr.bf16.mxu1 %v6881_v0 }
 0x5a8   :  { %5861 = vmatmul.mubr.msk.f32.vlgmr.msra.gmra.mrb[8].mxu1 %vm102_vm4, %v7149_v24  ;;  %v1026_v24 = vpop.permute.xlu1 %1025 }
 0x5a9   :  { %6448 = vmatpush3.bf16.msra.mxu1 %v7110_v2  ;;  %5882 = vmatprep.mubr.msk.f32.mxu1 %vm6882_vm0, %v6883_v8 }
 0x5aa   :  { %6449 = vmatprep.subr.bf16.mxu1 %v6881_v0 }
 0x5ad   :  { %v822_v40 = vpop.permute.xlu0 %821  ;;  %6451 = vmatpush3.bf16.msra.mxu1 %v7120_v6 }
 0x5ae   :  { %5850 = vmatmul.mubr.msk.f32.vlgmr.msra.gmra.mrb[8].mxu0 %vm102_vm4, %v822_v40  ;;  %6458 = vmatprep.subr.bf16.mxu1 %v6881_v0 }
 0x5af   :  { %6442 = vmatpush3.bf16.msra.mxu0 %v7132_v18  ;;  %5871 = vmatprep.mubr.msk.f32.mxu0 %vm6882_vm0, %v6883_v8 }
 0x5b0   :  { %6443 = vmatprep.subr.bf16.mxu0 %v6881_v0 }
 0x5b3   :  { %6445 = vmatpush3.bf16.msra.mxu0 %v7142_v23 }
 0x5b4   :  { %6452 = vmatprep.subr.bf16.mxu0 %v6881_v0 }
 0x5b6   :  { %5872 = vmatmul.mubr.msk.f32.vlgmr.msra.gmra.mrb[10].mxu0 %vm102_vm4, %v1026_v24 }
 0x5b7   :  { %6454 = vmatpush3.bf16.msra.mxu0 %v6988_v4  ;;  %5893 = vmatprep.mubr.msk.f32.mxu0 %vm6882_vm0, %v6883_v8 }
 0x5b8   :  { %6455 = vmatprep.subr.bf16.mxu0 %v6881_v0 }
 0x5bb   :  { %6457 = vmatpush3.bf16.msra.mxu0 %v7012_v12 }
 0x5bc   :  { %6464 = vmatprep.subr.bf16.mxu0 %v6881_v0 }
 0x5be   :  { %5894 = vmatmul.mubr.msk.f32.vlgmr.msra.gmra.mrb[12].mxu0 %vm102_vm4, %v822_v40 }
 0x5bf   :  { %6466 = vmatpush3.bf16.msra.mxu0 %v7092_v59  ;;  %5915 = vmatprep.mubr.msk.f32.mxu0 %vm6882_vm0, %v6883_v8 }
 0x5c0   :  { %6467 = vmatprep.subr.bf16.mxu0 %v6881_v0 }
 0x5c3   :  { %6469 = vmatpush3.bf16.msra.mxu0 %v7098_v61 }
 0x5c4   :  { %6476 = vmatprep.subr.bf16.mxu0 %v6881_v0 }
 0x673   :  { %v816_v41 = vpop.f32.mrb[6].mxu1 }
 0x674   :  { %v5840_v42 = vpop.f32.mrb[7].mxu1 }
 0x67b   :  { %v996_v44 = vpop.f32.mrb[8].mxu1 }
 0x67c   :  { %v1000_v45 = vadd.f32 %v5387_v43, %v996_v44  ;;  %v5862_v46 = vpop.f32.mrb[9].mxu1 }
 0x67e   :  { %v1001_v47 = vmul.f32 0.5, %v1000_v45 }
 0x680   :  { %v1002_v48 = vsel %vm7057_vm3, %v1000_v45, %v1001_v47 }
 0x681   :  { %6750 = vtanh.f32 %v1002_v48  ;;  %v891_v49 = vpop.f32.mrb[8].mxu0 }
 0x682   :  { %v892_v50 = vadd.f32 %v891_v49, %v816_v41  ;;  %v5851_v52 = vpop.f32.mrb[9].mxu0 }
 0x684   :  { %v895_v53 = vadd.f32 %v7176_v25, %v892_v50 }
 0x686   :  { %v896_v55 = vmul.f32 0.5, %v895_v53 }
 0x688   :  { %v897_v56 = vsel %vm7057_vm3, %v895_v53, %v896_v55 }
 0x689   :  { %6752 = vtanh.f32 %v897_v56  ;;  %v7273_v57 = vpop.f32.mrb[10].mxu0 }
 0x68a   :  { %v5873_v58 = vpop.f32.mrb[11].mxu0 }
 0x68b   :  { %v6751_v60 = vpop.eup %6750 }
 0x68c   :  { %v1004_v62 = vmul.f32 0.5, %v6751_v60 }
 0x68e   :  { %v1005_v63 = vadd.f32 0.5, %v1004_v62 }
 0x690   :  { %v1006_v3 = vsel %vm7057_vm3, %v6751_v60, %v1005_v63 }
 0x691   :  { %v1275_v5 = vpop.f32.mrb[12].mxu0  ;;  %1009 = vrot.lane.b32.xlu0 %v1006_v3, %s6884_s23  ;;  %v1007_v24 = vmul.f32 %v1006_v3, %v7079_v54 }
 0x692   :  { %v1279_v7 = vadd.f32 %v5392_v1, %v1275_v5  ;;  %v5895_v10 = vpop.f32.mrb[13].mxu0 }
 0x693   :  { %v6753_v11 = vpop.eup %6752 }
 0x694   :  { %v1280_v14 = vmul.f32 0.5, %v1279_v7  ;;  %v899_v15 = vmul.f32 0.5, %v6753_v11 }
 0x696   :  { %v1281_v20 = vsel %vm7057_vm3, %v1279_v7, %v1280_v14  ;;  %v900_v21 = vadd.f32 0.5, %v899_v15  ;;  %v5397_v15 = vld [vmem:[%s8200_s6 + $0x10] sm:$0xff] }
 0x697   :  { %6754 = vtanh.f32 %v1281_v20 }
 0x698   :  { %v901_v28 = vsel %vm7057_vm3, %v6753_v11, %v900_v21 }
 0x699   :  { %904 = vrot.lane.b32.xlu1 %v901_v28, %s6884_s23  ;;  %v902_v43 = vmul.f32 %v901_v28, %v7207_v17 }
 0x6a1   :  { %v6755_v29 = vpop.eup %6754 }
 0x6a2   :  { %v1283_v30 = vmul.f32 0.5, %v6755_v29 }
 0x6a4   :  { %v1284_v32 = vadd.f32 0.5, %v1283_v30 }
 0x6a6   :  { %v1285_v33 = vsel %vm7057_vm3, %v6755_v29, %v1284_v32 }
 0x6a7   :  { %1288 = vrot.lane.b32.xlu0 %v1285_v33, %s6884_s23  ;;  %v1286_v48 = vmul.f32 %v1285_v33, %v7215_v31 }
 0x703   :  { %v1010_v34 = vpop.permute.xlu0 %1009 }
 0x704   :  { %v1012_v51 = vmul.f32 %v1010_v34, %v1006_v3 }
 0x706   :  { %1014 = vrot.lane.b32.xlu1 %v1012_v51, %s6885_s24 }
 0x70b   :  { %v905_v38 = vpop.permute.xlu1 %904 }
 0x70c   :  { %v907_v39 = vmul.f32 %v905_v38, %v901_v28 }
 0x70e   :  { %909 = vrot.lane.b32.xlu0 %v907_v39, %s6885_s24 }
 0x719   :  { %v1289_v26 = vpop.permute.xlu0 %1288 }
 0x71a   :  { %v1291_v40 = vmul.f32 %v1289_v26, %v1285_v33 }
 0x71c   :  { %1293 = vrot.lane.b32.xlu1 %v1291_v40, %s6885_s24 }
 0x778   :  { %v1015_v41 = vpop.permute.xlu1 %1014 }
 0x779   :  { %v7293_v42 = vadd.f32 %v1015_v41, %v1007_v24 }
 0x77b   :  { %6756 = vtanh.f32 %v7293_v42 }
 0x780   :  { %v910_v44 = vpop.permute.xlu0 %909 }
 0x781   :  { %v7297_v45 = vadd.f32 %v910_v44, %v902_v43 }
 0x783   :  { %6758 = vtanh.f32 %v7297_v45 }
 0x785   :  { %v6757_v46 = vpop.eup %6756 }
 0x786   :  { %1020 = vrot.lane.b32.xlu0 %v6757_v46, %s6884_s23 }
 0x78d   :  { %v6759_v47 = vpop.eup %6758 }
 0x78e   :  { %v1294_v49 = vpop.permute.xlu1 %1293  ;;  %915 = vrot.lane.b32.xlu1 %v6759_v47, %s6884_s23 }
 0x78f   :  { %v7303_v54 = vadd.f32 %v1294_v49, %v1286_v48 }
 0x791   :  { %6760 = vtanh.f32 %v7303_v54 }
 0x79b   :  { %v6761_v50 = vpop.eup %6760 }
 0x79c   :  { %1299 = vrot.lane.b32.xlu0 %v6761_v50, %s6884_s23 }
 0x7f8   :  { %v1021_v17 = vpop.permute.xlu0 %1020 }
 0x7f9   :  { %v1023_v52 = vmul.f32 %v1021_v17, %v1006_v3 }
 0x7fb   :  { %1100 = vrot.lane.b32.xlu1 %v1023_v52, %s6885_s24 }
 0x800   :  { %v916_v53 = vpop.permute.xlu1 %915 }
 0x801   :  { %v7308_v55 = vmul.f32 %v916_v53, %v901_v28 }
 0x803   :  { %1304 = vrot.lane.b32.xlu0 %v7308_v55, %s6885_s24 }
 0x80e   :  { %v1300_v31 = vpop.permute.xlu0 %1299 }
 0x80f   :  { %v1302_v56 = vmul.f32 %v1300_v31, %v1285_v33 }
 0x811   :  { %1379 = vrot.lane.b32.xlu1 %v1302_v56, %s6885_s24 }
 0x86d   :  { %v1101_v58 = vpop.permute.xlu1 %1100 }
 0x86e   :  { %5883 = vmatmul.mubr.msk.f32.vlgmr.msra.gmra.mrb[10].mxu1 %vm102_vm4, %v1101_v58 }
 0x86f   :  { %6460 = vmatpush3.bf16.msra.mxu1 %v7003_v9  ;;  %5904 = vmatprep.mubr.msk.f32.mxu1 %vm6882_vm0, %v6883_v8 }
 0x870   :  { %6461 = vmatprep.subr.bf16.mxu1 %v6881_v0 }
 0x873   :  { %6463 = vmatpush3.bf16.msra.mxu1 %v7016_v13 }
 0x874   :  { %6470 = vmatprep.subr.bf16.mxu1 %v6881_v0 }
 0x875   :  { %v1305_v60 = vpop.permute.xlu0 %1304 }
 0x876   :  { %5905 = vmatmul.mubr.msk.f32.vlgmr.msra.gmra.mrb[12].mxu1 %vm102_vm4, %v1305_v60 }
 0x877   :  { %6472 = vmatpush3.bf16.msra.mxu1 %v7027_v16  ;;  %5926 = vmatprep.mubr.msk.f32.mxu1 %vm6882_vm0, %v6883_v8 }
 0x878   :  { %6473 = vmatprep.subr.bf16.mxu1 %v6881_v0 }
 0x87b   :  { %6475 = vmatpush3.bf16.msra.mxu1 %v7042_v19 }
 0x87c   :  { %6482 = vmatprep.subr.bf16.mxu1 %v6881_v0 }
 0x87e   :  { %5927 = vmatmul.mubr.msk.f32.vlgmr.msra.gmra.mrb[14].mxu1 %vm102_vm4, %v1101_v58 }
 0x87f   :  { %6484 = vmatpush3.bf16.msra.mxu1 %v7110_v2  ;;  %5948 = vmatprep.mubr.msk.f32.mxu1 %vm6882_vm0, %v6883_v8 }
 0x880   :  { %6485 = vmatprep.subr.bf16.mxu1 %v6881_v0 }
 0x883   :  { %v7332_v62 = vpop.permute.xlu1 %1379  ;;  %6487 = vmatpush3.bf16.msra.mxu1 %v7120_v6 }
 0x884   :  { %5916 = vmatmul.mubr.msk.f32.vlgmr.msra.gmra.mrb[14].mxu0 %vm102_vm4, %v7332_v62  ;;  %6494 = vmatprep.subr.bf16.mxu1 %v6881_v0 }
 0x885   :  { %6478 = vmatpush3.bf16.msra.mxu0 %v7132_v18  ;;  %5937 = vmatprep.mubr.msk.f32.mxu0 %vm6882_vm0, %v6883_v8 }
 0x886   :  { %6479 = vmatprep.subr.bf16.mxu0 %v6881_v0 }
 0x889   :  { %6481 = vmatpush3.bf16.msra.mxu0 %v7142_v23 }
 0x88a   :  { %6488 = vmatprep.subr.bf16.mxu0 %v6881_v0 }
 0x941   :  { %v1170_v63 = vpop.f32.mrb[10].mxu1 }
 0x942   :  { %v1171_v1 = vadd.f32 %v1170_v63, %v7273_v57  ;;  %v5884_v3 = vpop.f32.mrb[11].mxu1 }
 0x944   :  { %v1174_v5 = vadd.f32 %v7185_v36, %v1171_v1 }
 0x946   :  { %v1175_v7 = vmul.f32 0.5, %v1174_v5 }
 0x948   :  { %v1176_v10 = vsel %vm7057_vm3, %v1174_v5, %v1175_v7 }
 0x949   :  { %6762 = vtanh.f32 %v1176_v10  ;;  %v1374_v11 = vpop.f32.mrb[12].mxu1 }
 0x94a   :  { %v5906_v14 = vpop.f32.mrb[13].mxu1 }
 0x951   :  { %v1554_v20 = vpop.f32.mrb[14].mxu1 }
 0x952   :  { %v1558_v21 = vadd.f32 %v5397_v15, %v1554_v20  ;;  %v5928_v28 = vpop.f32.mrb[15].mxu1 }
 0x953   :  { %v6763_v29 = vpop.eup %6762 }
 0x954   :  { %v1559_v30 = vmul.f32 0.5, %v1558_v21  ;;  %v1178_v57 = vmul.f32 0.5, %v6763_v29 }
 0x956   :  { %v1560_v32 = vsel %vm7057_vm3, %v1558_v21, %v1559_v30  ;;  %v1179_v33 = vadd.f32 0.5, %v1178_v57 }
 0x957   :  { %6764 = vtanh.f32 %v1560_v32  ;;  %v1449_v34 = vpop.f32.mrb[14].mxu0 }
 0x958   :  { %v1450_v51 = vadd.f32 %v1449_v34, %v1374_v11  ;;  %v5917_v38 = vpop.f32.mrb[15].mxu0  ;;  %v1180_v39 = vsel %vm7057_vm3, %v6763_v29, %v1179_v33 }
 0x959   :  { %1183 = vrot.lane.b32.xlu0 %v1180_v39, %s6884_s23  ;;  %v1181_v60 = vmul.f32 %v1180_v39, %v7210_v22 }
 0x95a   :  { %v1453_v26 = vadd.f32 %v7176_v25, %v1450_v51  ;;  %v5402_v51 = vld [vmem:[%s8199_s0 + $0x18] sm:$0xff] }
 0x95c   :  { %v1454_v40 = vmul.f32 0.5, %v1453_v26 }
 0x95e   :  { %v1455_v24 = vsel %vm7057_vm3, %v1453_v26, %v1454_v40 }
 0x95f   :  { %6766 = vtanh.f32 %v1455_v24 }
 0x961   :  { %v6765_v41 = vpop.eup %6764 }
 0x962   :  { %v1562_v43 = vmul.f32 0.5, %v6765_v41 }
 0x964   :  { %v1563_v44 = vadd.f32 0.5, %v1562_v43 }
 0x966   :  { %v1564_v46 = vsel %vm7057_vm3, %v6765_v41, %v1563_v44 }
 0x967   :  { %1567 = vrot.lane.b32.xlu1 %v1564_v46, %s6884_s23  ;;  %v1565_v5 = vmul.f32 %v1564_v46, %v7293_v42 }
 0x969   :  { %v6767_v47 = vpop.eup %6766 }
 0x96a   :  { %v1457_v48 = vmul.f32 0.5, %v6767_v47 }
 0x96c   :  { %v1458_v49 = vadd.f32 0.5, %v1457_v48 }
 0x96e   :  { %v1459_v50 = vsel %vm7057_vm3, %v6767_v47, %v1458_v49 }
 0x96f   :  { %1462 = vrot.lane.b32.xlu0 %v1459_v50, %s6884_s23  ;;  %v1460_v11 = vmul.f32 %v1459_v50, %v7297_v45 }
 0x9cb   :  { %v1184_v17 = vpop.permute.xlu0 %1183 }
 0x9cc   :  { %v1186_v52 = vmul.f32 %v1184_v17, %v1180_v39 }
 0x9ce   :  { %1188 = vrot.lane.b32.xlu1 %v1186_v52, %s6885_s24 }
 0x9d9   :  { %v1568_v53 = vpop.permute.xlu1 %1567 }
 0x9da   :  { %v1570_v31 = vmul.f32 %v1568_v53, %v1564_v46 }
 0x9dc   :  { %1572 = vrot.lane.b32.xlu0 %v1570_v31, %s6885_s24  ;;  %v5407_v31 = vld [vmem:[%s8200_s6 + $0x18] sm:$0xff] }
 0x9e1   :  { %v1463_v56 = vpop.permute.xlu0 %1462 }
 0x9e2   :  { %v1465_v58 = vmul.f32 %v1463_v56, %v1459_v50 }
 0x9e4   :  { %1467 = vrot.lane.b32.xlu1 %v1465_v58, %s6885_s24 }
 0xa40   :  { %v1189_v63 = vpop.permute.xlu1 %1188 }
 0xa41   :  { %v7369_v1 = vadd.f32 %v1189_v63, %v1181_v60 }
 0xa43   :  { %6768 = vtanh.f32 %v7369_v1 }
 0xa4d   :  { %v6769_v3 = vpop.eup %6768 }
 0xa4e   :  { %v1573_v7 = vpop.permute.xlu0 %1572  ;;  %1194 = vrot.lane.b32.xlu0 %v6769_v3, %s6884_s23 }
 0xa4f   :  { %v7374_v10 = vadd.f32 %v1573_v7, %v1565_v5 }
 0xa51   :  { %6770 = vtanh.f32 %v7374_v10 }
 0xa56   :  { %v1468_v14 = vpop.permute.xlu1 %1467 }
 0xa57   :  { %v7378_v15 = vadd.f32 %v1468_v14, %v1460_v11 }
 0xa59   :  { %6772 = vtanh.f32 %v7378_v15 }
 0xa5b   :  { %v6771_v22 = vpop.eup %6770 }
 0xa5c   :  { %1578 = vrot.lane.b32.xlu1 %v6771_v22, %s6884_s23 }
 0xa63   :  { %v6773_v20 = vpop.eup %6772 }
 0xa64   :  { %1473 = vrot.lane.b32.xlu0 %v6773_v20, %s6884_s23 }
 0xac0   :  { %v1195_v42 = vpop.permute.xlu0 %1194 }
 0xac1   :  { %v7383_v21 = vmul.f32 %v1195_v42, %v1180_v39 }
 0xac3   :  { %1583 = vrot.lane.b32.xlu1 %v7383_v21, %s6885_s24 }
 0xace   :  { %v1579_v28 = vpop.permute.xlu1 %1578 }
 0xacf   :  { %v1581_v29 = vmul.f32 %v1579_v28, %v1564_v46 }
 0xad1   :  { %1658 = vrot.lane.b32.xlu0 %v1581_v29, %s6885_s24 }
 0xad6   :  { %v1474_v45 = vpop.permute.xlu0 %1473 }
 0xad7   :  { %v7388_v30 = vmul.f32 %v1474_v45, %v1459_v50 }
 0xad9   :  { %1862 = vrot.lane.b32.xlu1 %v7388_v30, %s6885_s24 }
 0xb35   :  { %v1584_v57 = vpop.permute.xlu1 %1583 }
 0xb36   :  { %5938 = vmatmul.mubr.msk.f32.vlgmr.msra.gmra.mrb[16].mxu0 %vm102_vm4, %v1584_v57 }
 0xb37   :  { %6490 = vmatpush3.bf16.msra.mxu0 %v6988_v4  ;;  %5959 = vmatprep.mubr.msk.f32.mxu0 %vm6882_vm0, %v6883_v8 }
 0xb38   :  { %6491 = vmatprep.subr.bf16.mxu0 %v6881_v0 }
 0xb3b   :  { %6493 = vmatpush3.bf16.msra.mxu0 %v7012_v12 }
 0xb3c   :  { %6500 = vmatprep.subr.bf16.mxu0 %v6881_v0 }
 0xb3e   :  { %5960 = vmatmul.mubr.msk.f32.vlgmr.msra.gmra.mrb[18].mxu0 %vm102_vm4, %v7332_v62 }
 0xb3f   :  { %6502 = vmatpush3.bf16.msra.mxu0 %v7092_v59  ;;  %5981 = vmatprep.mubr.msk.f32.mxu0 %vm6882_vm0, %v6883_v8 }
 0xb40   :  { %6503 = vmatprep.subr.bf16.mxu0 %v6881_v0 }
 0xb43   :  { %v1659_v32 = vpop.permute.xlu0 %1658  ;;  %6505 = vmatpush3.bf16.msra.mxu0 %v7098_v61 }
 0xb44   :  { %5949 = vmatmul.mubr.msk.f32.vlgmr.msra.gmra.mrb[16].mxu1 %vm102_vm4, %v1659_v32  ;;  %6512 = vmatprep.subr.bf16.mxu0 %v6881_v0 }
 0xb45   :  { %6496 = vmatpush3.bf16.msra.mxu1 %v7003_v9  ;;  %5970 = vmatprep.mubr.msk.f32.mxu1 %vm6882_vm0, %v6883_v8 }
 0xb46   :  { %6497 = vmatprep.subr.bf16.mxu1 %v6881_v0 }
 0xb49   :  { %6499 = vmatpush3.bf16.msra.mxu1 %v7016_v13 }
 0xb4a   :  { %6506 = vmatprep.subr.bf16.mxu1 %v6881_v0 }
 0xb4b   :  { %v1863_v62 = vpop.permute.xlu1 %1862 }
 0xb4c   :  { %5971 = vmatmul.mubr.msk.f32.vlgmr.msra.gmra.mrb[18].mxu1 %vm102_vm4, %v1863_v62 }
 0xb4d   :  { %6508 = vmatpush3.bf16.msra.mxu1 %v7027_v16  ;;  %5992 = vmatprep.mubr.msk.f32.mxu1 %vm6882_vm0, %v6883_v8 }
 0xb4e   :  { %6509 = vmatprep.subr.bf16.mxu1 %v6881_v0 }
 0xb51   :  { %6511 = vmatpush3.bf16.msra.mxu1 %v7042_v19 }
 0xb52   :  { %6518 = vmatprep.subr.bf16.mxu1 %v6881_v0 }
 0xb54   :  { %5993 = vmatmul.mubr.msk.f32.vlgmr.msra.gmra.mrb[20].mxu1 %vm102_vm4, %v1659_v32 }
 0xb55   :  { %6520 = vmatpush3.bf16.msra.mxu1 %v7110_v2  ;;  %6014 = vmatprep.mubr.msk.f32.mxu1 %vm6882_vm0, %v6883_v8 }
 0xb56   :  { %6521 = vmatprep.subr.bf16.mxu1 %v6881_v0 }
 0xb59   :  { %6523 = vmatpush3.bf16.msra.mxu1 %v7120_v6 }
 0xb5a   :  { %6530 = vmatprep.subr.bf16.mxu1 %v6881_v0 }
 0xc09   :  { %v1653_v33 = vpop.f32.mrb[16].mxu0 }
 0xc0a   :  { %v5939_v34 = vpop.f32.mrb[17].mxu0 }
 0xc11   :  { %v1833_v38 = vpop.f32.mrb[18].mxu0 }
 0xc12   :  { %v1837_v39 = vadd.f32 %v5402_v51, %v1833_v38  ;;  %v5961_v26 = vpop.f32.mrb[19].mxu0 }
 0xc14   :  { %v1838_v40 = vmul.f32 0.5, %v1837_v39 }
 0xc16   :  { %v1839_v24 = vsel %vm7057_vm3, %v1837_v39, %v1838_v40 }
 0xc17   :  { %6774 = vtanh.f32 %v1839_v24  ;;  %v1728_v41 = vpop.f32.mrb[16].mxu1 }
 0xc18   :  { %v1729_v43 = vadd.f32 %v1728_v41, %v1653_v33  ;;  %v5950_v44 = vpop.f32.mrb[17].mxu1 }
 0xc1a   :  { %v1732_v46 = vadd.f32 %v7185_v36, %v1729_v43 }
 0xc1c   :  { %v1733_v47 = vmul.f32 0.5, %v1732_v46 }
 0xc1e   :  { %v1734_v48 = vsel %vm7057_vm3, %v1732_v46, %v1733_v47 }
 0xc1f   :  { %6776 = vtanh.f32 %v1734_v48  ;;  %v7436_v49 = vpop.f32.mrb[18].mxu1 }
 0xc20   :  { %v5972_v50 = vpop.f32.mrb[19].mxu1 }
 0xc21   :  { %v6775_v17 = vpop.eup %6774 }
 0xc22   :  { %v1841_v52 = vmul.f32 0.5, %v6775_v17 }
 0xc24   :  { %v1842_v53 = vadd.f32 0.5, %v1841_v52 }
 0xc26   :  { %v1843_v56 = vsel %vm7057_vm3, %v6775_v17, %v1842_v53 }
 0xc27   :  { %v2112_v58 = vpop.f32.mrb[20].mxu1  ;;  %1846 = vrot.lane.b32.xlu0 %v1843_v56, %s6884_s23  ;;  %v1844_v51 = vmul.f32 %v1843_v56, %v7303_v54 }
 0xc28   :  { %v2116_v60 = vadd.f32 %v5407_v31, %v2112_v58  ;;  %v5994_v63 = vpop.f32.mrb[21].mxu1 }
 0xc29   :  { %v6777_v3 = vpop.eup %6776 }
 0xc2a   :  { %v2117_v5 = vmul.f32 0.5, %v2116_v60  ;;  %v1736_v7 = vmul.f32 0.5, %v6777_v3 }
 0xc2c   :  { %v2118_v11 = vsel %vm7057_vm3, %v2116_v60, %v2117_v5  ;;  %v1737_v14 = vadd.f32 0.5, %v1736_v7 }
 0xc2d   :  { %6778 = vtanh.f32 %v2118_v11 }
 0xc2e   :  { %v1738_v22 = vsel %vm7057_vm3, %v6777_v3, %v1737_v14 }
 0xc2f   :  { %1741 = vrot.lane.b32.xlu1 %v1738_v22, %s6884_s23  ;;  %v1739_v26 = vmul.f32 %v1738_v22, %v7369_v1 }
 0xc37   :  { %v6779_v20 = vpop.eup %6778 }
 0xc38   :  { %v2120_v42 = vmul.f32 0.5, %v6779_v20 }
 0xc3a   :  { %v2121_v28 = vadd.f32 0.5, %v2120_v42 }
 0xc3c   :  { %v2122_v29 = vsel %vm7057_vm3, %v6779_v20, %v2121_v28 }
 0xc3d   :  { %2125 = vrot.lane.b32.xlu0 %v2122_v29, %s6884_s23  ;;  %v2123_v44 = vmul.f32 %v2122_v29, %v7374_v10 }
 0xc99   :  { %v1847_v45 = vpop.permute.xlu0 %1846 }
 0xc9a   :  { %v1849_v57 = vmul.f32 %v1847_v45, %v1843_v56 }
 0xc9c   :  { %1851 = vrot.lane.b32.xlu1 %v1849_v57, %s6885_s24 }
 0xca1   :  { %v1742_v32 = vpop.permute.xlu1 %1741 }
 0xca2   :  { %v1744_v62 = vmul.f32 %v1742_v32, %v1738_v22 }
 0xca4   :  { %1746 = vrot.lane.b32.xlu0 %v1744_v62, %s6885_s24 }
 0xcaf   :  { %v2126_v33 = vpop.permute.xlu0 %2125 }
 0xcb0   :  { %v2128_v34 = vmul.f32 %v2126_v33, %v2122_v29 }
 0xcb2   :  { %2130 = vrot.lane.b32.xlu1 %v2128_v34, %s6885_s24 }
 0xd0e   :  { %v1852_v38 = vpop.permute.xlu1 %1851 }
 0xd0f   :  { %v7456_v39 = vadd.f32 %v1852_v38, %v1844_v51 }
 0xd11   :  { %6780 = vtanh.f32 %v7456_v39 }
 0xd16   :  { %v1747_v40 = vpop.permute.xlu0 %1746 }
 0xd17   :  { %v7460_v24 = vadd.f32 %v1747_v40, %v1739_v26 }
 0xd19   :  { %6782 = vtanh.f32 %v7460_v24 }
 0xd1b   :  { %v6781_v41 = vpop.eup %6780 }
 0xd1c   :  { %1857 = vrot.lane.b32.xlu0 %v6781_v41, %s6884_s23 }
 0xd23   :  { %v6783_v43 = vpop.eup %6782 }
 0xd24   :  { %v2131_v46 = vpop.permute.xlu1 %2130  ;;  %1752 = vrot.lane.b32.xlu1 %v6783_v43, %s6884_s23 }
 0xd25   :  { %v7466_v54 = vadd.f32 %v2131_v46, %v2123_v44 }
 0xd27   :  { %6784 = vtanh.f32 %v7466_v54 }
 0xd31   :  { %v6785_v47 = vpop.eup %6784 }
 0xd32   :  { %2136 = vrot.lane.b32.xlu0 %v6785_v47, %s6884_s23 }
 0xd8e   :  { %v1858_v1 = vpop.permute.xlu0 %1857 }
 0xd8f   :  { %v1860_v48 = vmul.f32 %v1858_v1, %v1843_v56 }
 0xd91   :  { %1937 = vrot.lane.b32.xlu1 %v1860_v48, %s6885_s24 }
 0xd96   :  { %v1753_v50 = vpop.permute.xlu1 %1752 }
 0xd97   :  { %v7471_v17 = vmul.f32 %v1753_v50, %v1738_v22  ;;  %v5412_v22 = vld [vmem:[%s8199_s0 + $0x20] sm:$0xff] }
 0xd99   :  { %2141 = vrot.lane.b32.xlu0 %v7471_v17, %s6885_s24 }
 0xda4   :  { %v2137_v10 = vpop.permute.xlu0 %2136 }
 0xda5   :  { %v2139_v52 = vmul.f32 %v2137_v10, %v2122_v29 }
 0xda7   :  { %2216 = vrot.lane.b32.xlu1 %v2139_v52, %s6885_s24 }
 0xe03   :  { %v1938_v53 = vpop.permute.xlu1 %1937 }
 0xe04   :  { %5982 = vmatmul.mubr.msk.f32.vlgmr.msra.gmra.mrb[20].mxu0 %vm102_vm4, %v1938_v53 }
 0xe05   :  { %6514 = vmatpush3.bf16.msra.mxu0 %v7132_v18  ;;  %6003 = vmatprep.mubr.msk.f32.mxu0 %vm6882_vm0, %v6883_v8 }
 0xe06   :  { %6515 = vmatprep.subr.bf16.mxu0 %v6881_v0 }
 0xe09   :  { %6517 = vmatpush3.bf16.msra.mxu0 %v7142_v23 }
 0xe0a   :  { %6524 = vmatprep.subr.bf16.mxu0 %v6881_v0 }
 0xe0b   :  { %v2142_v31 = vpop.permute.xlu0 %2141 }
 0xe0c   :  { %6004 = vmatmul.mubr.msk.f32.vlgmr.msra.gmra.mrb[22].mxu0 %vm102_vm4, %v2142_v31 }
 0xe0d   :  { %6526 = vmatpush3.bf16.msra.mxu0 %v6988_v4  ;;  %6025 = vmatprep.mubr.msk.f32.mxu0 %vm6882_vm0, %v6883_v8 }
 0xe0e   :  { %6527 = vmatprep.subr.bf16.mxu0 %v6881_v0 }
 0xe11   :  { %6529 = vmatpush3.bf16.msra.mxu0 %v7012_v12 }
 0xe12   :  { %6536 = vmatprep.subr.bf16.mxu0 %v6881_v0 }
 0xe14   :  { %6026 = vmatmul.mubr.msk.f32.vlgmr.msra.gmra.mrb[24].mxu0 %vm102_vm4, %v1938_v53 }
 0xe15   :  { %6538 = vmatpush3.bf16.msra.mxu0 %v7092_v59  ;;  %6047 = vmatprep.mubr.msk.f32.mxu0 %vm6882_vm0, %v6883_v8 }
 0xe16   :  { %6539 = vmatprep.subr.bf16.mxu0 %v6881_v0 }
 0xe19   :  { %v7495_v56 = vpop.permute.xlu1 %2216  ;;  %6541 = vmatpush3.bf16.msra.mxu0 %v7098_v61 }
 0xe1a   :  { %6015 = vmatmul.mubr.msk.f32.vlgmr.msra.gmra.mrb[22].mxu1 %vm102_vm4, %v7495_v56  ;;  %6548 = vmatprep.subr.bf16.mxu0 %v6881_v0 }
 0xe1b   :  { %6532 = vmatpush3.bf16.msra.mxu1 %v7003_v9  ;;  %6036 = vmatprep.mubr.msk.f32.mxu1 %vm6882_vm0, %v6883_v8 }
 0xe1c   :  { %6533 = vmatprep.subr.bf16.mxu1 %v6881_v0 }
 0xe1f   :  { %6535 = vmatpush3.bf16.msra.mxu1 %v7016_v13 }
 0xe20   :  { %6542 = vmatprep.subr.bf16.mxu1 %v6881_v0 }
 0xed7   :  { %v2007_v58 = vpop.f32.mrb[20].mxu0 }
 0xed8   :  { %v2008_v60 = vadd.f32 %v2007_v58, %v7436_v49  ;;  %v5983_v63 = vpop.f32.mrb[21].mxu0 }
 0xeda   :  { %v2011_v3 = vadd.f32 %v7176_v25, %v2008_v60 }
 0xedc   :  { %v2012_v5 = vmul.f32 0.5, %v2011_v3 }
 0xede   :  { %v2013_v7 = vsel %vm7057_vm3, %v2011_v3, %v2012_v5 }
 0xedf   :  { %6786 = vtanh.f32 %v2013_v7  ;;  %v2211_v11 = vpop.f32.mrb[22].mxu0 }
 0xee0   :  { %v6005_v14 = vpop.f32.mrb[23].mxu0 }
 0xee7   :  { %v2391_v20 = vpop.f32.mrb[24].mxu0 }
 0xee8   :  { %v2395_v42 = vadd.f32 %v5412_v22, %v2391_v20  ;;  %v6027_v28 = vpop.f32.mrb[25].mxu0 }
 0xee9   :  { %v6787_v29 = vpop.eup %6786 }
 0xeea   :  { %v2396_v45 = vmul.f32 0.5, %v2395_v42  ;;  %v2015_v49 = vmul.f32 0.5, %v6787_v29 }
 0xeec   :  { %v2397_v25 = vsel %vm7057_vm3, %v2395_v42, %v2396_v45  ;;  %v2016_v57 = vadd.f32 0.5, %v2015_v49 }
 0xeed   :  { %6788 = vtanh.f32 %v2397_v25  ;;  %v2286_v32 = vpop.f32.mrb[22].mxu1 }
 0xeee   :  { %v2287_v62 = vadd.f32 %v2286_v32, %v2211_v11  ;;  %v6016_v33 = vpop.f32.mrb[23].mxu1  ;;  %v2017_v34 = vsel %vm7057_vm3, %v6787_v29, %v2016_v57 }
 0xeef   :  { %2020 = vrot.lane.b32.xlu0 %v2017_v34, %s6884_s23  ;;  %v2018_v58 = vmul.f32 %v2017_v34, %v7378_v15  ;;  %v5417_v33 = vld [vmem:[%s8200_s6 + $0x20] sm:$0xff] }
 0xef0   :  { %v2290_v51 = vadd.f32 %v7185_v36, %v2287_v62 }
 0xef2   :  { %v2291_v38 = vmul.f32 0.5, %v2290_v51 }
 0xef4   :  { %v2292_v26 = vsel %vm7057_vm3, %v2290_v51, %v2291_v38 }
 0xef5   :  { %6790 = vtanh.f32 %v2292_v26 }
 0xef7   :  { %v6789_v40 = vpop.eup %6788 }
 0xef8   :  { %v2399_v41 = vmul.f32 0.5, %v6789_v40 }
 0xefa   :  { %v2400_v43 = vadd.f32 0.5, %v2399_v41 }
 0xefc   :  { %v2401_v44 = vsel %vm7057_vm3, %v6789_v40, %v2400_v43 }
 0xefd   :  { %2404 = vrot.lane.b32.xlu1 %v2401_v44, %s6884_s23  ;;  %v2402_v5 = vmul.f32 %v2401_v44, %v7456_v39 }
 0xeff   :  { %v6791_v46 = vpop.eup %6790 }
 0xf00   :  { %v2294_v47 = vmul.f32 0.5, %v6791_v46 }
 0xf02   :  { %v2295_v1 = vadd.f32 0.5, %v2294_v47 }
 0xf04   :  { %v2296_v48 = vsel %vm7057_vm3, %v6791_v46, %v2295_v1  ;;  %v7599_v46 = vld [vmem:[%s8204_s4] ss:$0 sm:$0xff] }
 0xf05   :  { %2299 = vrot.lane.b32.xlu0 %v2296_v48, %s6884_s23  ;;  %v2297_v14 = vmul.f32 %v2296_v48, %v7460_v24 }
 0xf61   :  { %v2021_v36 = vpop.permute.xlu0 %2020 }
 0xf62   :  { %v2023_v50 = vmul.f32 %v2021_v36, %v2017_v34 }
 0xf64   :  { %2025 = vrot.lane.b32.xlu1 %v2023_v50, %s6885_s24 }
 0xf6f   :  { %v2405_v10 = vpop.permute.xlu1 %2404 }
 0xf70   :  { %v2407_v52 = vmul.f32 %v2405_v10, %v2401_v44 }
 0xf72   :  { %2409 = vrot.lane.b32.xlu0 %v2407_v52, %s6885_s24 }
 0xf77   :  { %v2300_v53 = vpop.permute.xlu0 %2299 }
 0xf78   :  { %v2302_v31 = vmul.f32 %v2300_v53, %v2296_v48 }
 0xf7a   :  { %2304 = vrot.lane.b32.xlu1 %v2302_v31, %s6885_s24  ;;  %v5422_v31 = vld [vmem:[%s8199_s0 + $0x28] sm:$0xff] }
 0xfd6   :  { %v2026_v60 = vpop.permute.xlu1 %2025 }
 0xfd7   :  { %v7532_v63 = vadd.f32 %v2026_v60, %v2018_v58 }
 0xfd9   :  { %6792 = vtanh.f32 %v7532_v63 }
 0xfe3   :  { %v6793_v3 = vpop.eup %6792 }
 0xfe4   :  { %v2410_v7 = vpop.permute.xlu0 %2409  ;;  %2031 = vrot.lane.b32.xlu0 %v6793_v3, %s6884_s23 }
 0xfe5   :  { %v7537_v11 = vadd.f32 %v2410_v7, %v2402_v5 }
 0xfe7   :  { %6794 = vtanh.f32 %v7537_v11 }
 0xfec   :  { %v2305_v22 = vpop.permute.xlu1 %2304 }
 0xfed   :  { %v7541_v20 = vadd.f32 %v2305_v22, %v2297_v14 }
 0xfef   :  { %6796 = vtanh.f32 %v7541_v20 }
 0xff1   :  { %v6795_v15 = vpop.eup %6794 }
 0xff2   :  { %2415 = vrot.lane.b32.xlu1 %v6795_v15, %s6884_s23 }
 0xff9   :  { %v6797_v42 = vpop.eup %6796 }
 0xffa   :  { %2310 = vrot.lane.b32.xlu0 %v6797_v42, %s6884_s23 }
0x1056   :  { %v2032_v39 = vpop.permute.xlu0 %2031 }
0x1057   :  { %v7546_v28 = vmul.f32 %v2032_v39, %v2017_v34 }
0x1059   :  { %2420 = vrot.lane.b32.xlu1 %v7546_v28, %s6885_s24 }
0x1064   :  { %v2416_v29 = vpop.permute.xlu1 %2415 }
0x1065   :  { %v2418_v45 = vmul.f32 %v2416_v29, %v2401_v44 }
0x1067   :  { %2495 = vrot.lane.b32.xlu0 %v2418_v45, %s6885_s24 }
0x106c   :  { %v2311_v24 = vpop.permute.xlu0 %2310 }
0x106d   :  { %v7551_v49 = vmul.f32 %v2311_v24, %v2296_v48 }
0x106f   :  { %2699 = vrot.lane.b32.xlu1 %v7551_v49, %s6885_s24 }
0x10cb   :  { %v2421_v25 = vpop.permute.xlu1 %2420 }
0x10cc   :  { %6037 = vmatmul.mubr.msk.f32.vlgmr.msra.gmra.mrb[24].mxu1 %vm102_vm4, %v2421_v25 }
0x10cd   :  { %6544 = vmatpush3.bf16.msra.mxu1 %v7027_v16  ;;  %6058 = vmatprep.mubr.msk.f32.mxu1 %vm6882_vm0, %v6883_v8 }
0x10ce   :  { %6545 = vmatprep.subr.bf16.mxu1 %v6881_v0 }
0x10d1   :  { %6547 = vmatpush3.bf16.msra.mxu1 %v7042_v19 }
0x10d2   :  { %6554 = vmatprep.subr.bf16.mxu1 %v6881_v0 }
0x10d4   :  { %6059 = vmatmul.mubr.msk.f32.vlgmr.msra.gmra.mrb[26].mxu1 %vm102_vm4, %v7495_v56 }
0x10d5   :  { %6556 = vmatpush3.bf16.msra.mxu1 %v7110_v2  ;;  %6080 = vmatprep.mubr.msk.f32.mxu1 %vm6882_vm0, %v6883_v8 }
0x10d6   :  { %6557 = vmatprep.subr.bf16.mxu1 %v6881_v0 }
0x10d9   :  { %v2496_v57 = vpop.permute.xlu0 %2495  ;;  %6559 = vmatpush3.bf16.msra.mxu1 %v7120_v6 }
0x10da   :  { %6048 = vmatmul.mubr.msk.f32.vlgmr.msra.gmra.mrb[26].mxu0 %vm102_vm4, %v2496_v57  ;;  %6566 = vmatprep.subr.bf16.mxu1 %v6881_v0 }
0x10db   :  { %6550 = vmatpush3.bf16.msra.mxu0 %v7132_v18  ;;  %6069 = vmatprep.mubr.msk.f32.mxu0 %vm6882_vm0, %v6883_v8 }
0x10dc   :  { %6551 = vmatprep.subr.bf16.mxu0 %v6881_v0 }
0x10df   :  { %6553 = vmatpush3.bf16.msra.mxu0 %v7142_v23 }
0x10e0   :  { %6560 = vmatprep.subr.bf16.mxu0 %v6881_v0 }
0x10e1   :  { %v2700_v56 = vpop.permute.xlu1 %2699 }
0x10e2   :  { %6070 = vmatmul.mubr.msk.f32.vlgmr.msra.gmra.mrb[28].mxu0 %vm102_vm4, %v2700_v56 }
0x10e3   :  { %6562 = vmatpush3.bf16.msra.mxu0 %v6988_v4  ;;  %6091 = vmatprep.mubr.msk.f32.mxu0 %vm6882_vm0, %v6883_v8 }
0x10e4   :  { %6563 = vmatprep.subr.bf16.mxu0 %v6881_v0 }
0x10e7   :  { %6565 = vmatpush3.bf16.msra.mxu0 %v7012_v12 }
0x10e8   :  { %6572 = vmatprep.subr.bf16.mxu0 %v6881_v0 }
0x10ea   :  { %6092 = vmatmul.mubr.msk.f32.vlgmr.msra.gmra.mrb[30].mxu0 %vm102_vm4, %v2496_v57 }
0x10eb   :  { %6574 = vmatpush3.bf16.msra.mxu0 %v7092_v59  ;;  %6113 = vmatprep.mubr.msk.f32.mxu0 %vm6882_vm0, %v6883_v8 }
0x10ec   :  { %6575 = vmatprep.subr.bf16.mxu0 %v6881_v0 }
0x10ef   :  { %6577 = vmatpush3.bf16.msra.mxu0 %v7098_v61 }
0x10f0   :  { %6584 = vmatprep.subr.bf16.mxu0 %v6881_v0 }
0x119f   :  { %v2490_v32 = vpop.f32.mrb[24].mxu1 }
0x11a0   :  { %v6038_v62 = vpop.f32.mrb[25].mxu1 }
0x11a7   :  { %v2670_v34 = vpop.f32.mrb[26].mxu1 }
0x11a8   :  { %v2674_v51 = vadd.f32 %v5417_v33, %v2670_v34  ;;  %v6060_v38 = vpop.f32.mrb[27].mxu1 }
0x11aa   :  { %v2675_v26 = vmul.f32 0.5, %v2674_v51 }
0x11ac   :  { %v2676_v40 = vsel %vm7057_vm3, %v2674_v51, %v2675_v26 }
0x11ad   :  { %6798 = vtanh.f32 %v2676_v40  ;;  %v2565_v41 = vpop.f32.mrb[26].mxu0 }
0x11ae   :  { %v2566_v43 = vadd.f32 %v2565_v41, %v2490_v32  ;;  %v6049_v44 = vpop.f32.mrb[27].mxu0 }
0x11b0   :  { %v2569_v47 = vadd.f32 %v7599_v46, %v2566_v43 }
0x11b2   :  { %v2570_v1 = vmul.f32 0.5, %v2569_v47 }
0x11b4   :  { %v2571_v48 = vsel %vm7057_vm3, %v2569_v47, %v2570_v1 }
0x11b5   :  { %6800 = vtanh.f32 %v2571_v48  ;;  %v7604_v36 = vpop.f32.mrb[28].mxu0 }
0x11b6   :  { %v6071_v50 = vpop.f32.mrb[29].mxu0 }
0x11b7   :  { %v6799_v10 = vpop.eup %6798 }
0x11b8   :  { %v2678_v52 = vmul.f32 0.5, %v6799_v10 }
0x11ba   :  { %v2679_v53 = vadd.f32 0.5, %v2678_v52 }
0x11bc   :  { %v2680_v58 = vsel %vm7057_vm3, %v6799_v10, %v2679_v53 }
0x11bd   :  { %v2949_v60 = vpop.f32.mrb[30].mxu0  ;;  %2683 = vrot.lane.b32.xlu0 %v2680_v58, %s6884_s23  ;;  %v2681_v51 = vmul.f32 %v2680_v58, %v7466_v54 }
0x11be   :  { %v2953_v3 = vadd.f32 %v5422_v31, %v2949_v60  ;;  %v6093_v5 = vpop.f32.mrb[31].mxu0 }
0x11bf   :  { %v6801_v7 = vpop.eup %6800 }
0x11c0   :  { %v2954_v14 = vmul.f32 0.5, %v2953_v3  ;;  %v2573_v22 = vmul.f32 0.5, %v6801_v7 }
0x11c2   :  { %v2955_v15 = vsel %vm7057_vm3, %v2953_v3, %v2954_v14  ;;  %v2574_v42 = vadd.f32 0.5, %v2573_v22  ;;  %v7679_v22 = vld [vmem:[%s8205_s10] ss:$0 sm:$0xff] }
0x11c3   :  { %6802 = vtanh.f32 %v2955_v15 }
0x11c4   :  { %v2575_v39 = vsel %vm7057_vm3, %v6801_v7, %v2574_v42 }
0x11c5   :  { %2578 = vrot.lane.b32.xlu1 %v2575_v39, %s6884_s23  ;;  %v2576_v40 = vmul.f32 %v2575_v39, %v7532_v63 }
0x11cd   :  { %v6803_v29 = vpop.eup %6802 }
0x11ce   :  { %v2957_v45 = vmul.f32 0.5, %v6803_v29 }
0x11d0   :  { %v2958_v24 = vadd.f32 0.5, %v2957_v45 }
0x11d2   :  { %v2959_v25 = vsel %vm7057_vm3, %v6803_v29, %v2958_v24  ;;  %v5427_v24 = vld [vmem:[%s8200_s6 + $0x28] sm:$0xff] }
0x11d3   :  { %2962 = vrot.lane.b32.xlu0 %v2959_v25, %s6884_s23  ;;  %v2960_v1 = vmul.f32 %v2959_v25, %v7537_v11 }
0x122f   :  { %v2684_v57 = vpop.permute.xlu0 %2683 }
0x1230   :  { %v2686_v56 = vmul.f32 %v2684_v57, %v2680_v58 }
0x1232   :  { %2688 = vrot.lane.b32.xlu1 %v2686_v56, %s6885_s24 }
0x1237   :  { %v2579_v32 = vpop.permute.xlu1 %2578 }
0x1238   :  { %v2581_v62 = vmul.f32 %v2579_v32, %v2575_v39 }
0x123a   :  { %2583 = vrot.lane.b32.xlu0 %v2581_v62, %s6885_s24 }
0x1245   :  { %v2963_v33 = vpop.permute.xlu0 %2962 }
0x1246   :  { %v2965_v34 = vmul.f32 %v2963_v33, %v2959_v25 }
0x1248   :  { %2967 = vrot.lane.b32.xlu1 %v2965_v34, %s6885_s24 }
0x12a4   :  { %v2689_v38 = vpop.permute.xlu1 %2688 }
0x12a5   :  { %v7624_v26 = vadd.f32 %v2689_v38, %v2681_v51 }
0x12a7   :  { %6804 = vtanh.f32 %v7624_v26 }
0x12ac   :  { %v2584_v41 = vpop.permute.xlu0 %2583 }
0x12ad   :  { %v7628_v43 = vadd.f32 %v2584_v41, %v2576_v40 }
0x12af   :  { %6806 = vtanh.f32 %v7628_v43 }
0x12b1   :  { %v6805_v44 = vpop.eup %6804 }
0x12b2   :  { %2694 = vrot.lane.b32.xlu0 %v6805_v44, %s6884_s23 }
0x12b9   :  { %v6807_v47 = vpop.eup %6806 }
0x12ba   :  { %v2968_v48 = vpop.permute.xlu1 %2967  ;;  %2589 = vrot.lane.b32.xlu1 %v6807_v47, %s6884_s23 }
0x12bb   :  { %v7634_v54 = vadd.f32 %v2968_v48, %v2960_v1 }
0x12bd   :  { %6808 = vtanh.f32 %v7634_v54 }
0x12c7   :  { %v6809_v50 = vpop.eup %6808 }
0x12c8   :  { %2973 = vrot.lane.b32.xlu0 %v6809_v50, %s6884_s23 }
0x1324   :  { %v2695_v63 = vpop.permute.xlu0 %2694 }
0x1325   :  { %v2697_v10 = vmul.f32 %v2695_v63, %v2680_v58 }
0x1327   :  { %2774 = vrot.lane.b32.xlu1 %v2697_v10, %s6885_s24 }
0x132c   :  { %v2590_v52 = vpop.permute.xlu1 %2589 }
0x132d   :  { %v7639_v53 = vmul.f32 %v2590_v52, %v2575_v39 }
0x132f   :  { %2978 = vrot.lane.b32.xlu0 %v7639_v53, %s6885_s24 }
0x133a   :  { %v2974_v11 = vpop.permute.xlu0 %2973 }
0x133b   :  { %v2976_v31 = vmul.f32 %v2974_v11, %v2959_v25 }
0x133d   :  { %3053 = vrot.lane.b32.xlu1 %v2976_v31, %s6885_s24 }
0x1399   :  { %v2775_v60 = vpop.permute.xlu1 %2774 }
0x139a   :  { %6081 = vmatmul.mubr.msk.f32.vlgmr.msra.gmra.mrb[28].mxu1 %vm102_vm4, %v2775_v60 }
0x139b   :  { %6568 = vmatpush3.bf16.msra.mxu1 %v7003_v9  ;;  %6102 = vmatprep.mubr.msk.f32.mxu1 %vm6882_vm0, %v6883_v8 }
0x139c   :  { %6569 = vmatprep.subr.bf16.mxu1 %v6881_v0 }
0x139f   :  { %6571 = vmatpush3.bf16.msra.mxu1 %v7016_v13 }
0x13a0   :  { %6578 = vmatprep.subr.bf16.mxu1 %v6881_v0 }
0x13a1   :  { %v2979_v58 = vpop.permute.xlu0 %2978 }
0x13a2   :  { %6103 = vmatmul.mubr.msk.f32.vlgmr.msra.gmra.mrb[30].mxu1 %vm102_vm4, %v2979_v58 }
0x13a3   :  { %6580 = vmatpush3.bf16.msra.mxu1 %v7027_v16  ;;  %6124 = vmatprep.mubr.msk.f32.mxu1 %vm6882_vm0, %v6883_v8 }
0x13a4   :  { %6581 = vmatprep.subr.bf16.mxu1 %v6881_v0 }
0x13a7   :  { %6583 = vmatpush3.bf16.msra.mxu1 %v7042_v19 }
0x13a8   :  { %6590 = vmatprep.subr.bf16.mxu1 %v6881_v0 }
0x13aa   :  { %6125 = vmatmul.mubr.msk.f32.vlgmr.msra.gmra.mrb[32].mxu1 %vm102_vm4, %v2775_v60 }
0x13ab   :  { %6592 = vmatpush3.bf16.msra.mxu1 %v7110_v2  ;;  %6146 = vmatprep.mubr.msk.f32.mxu1 %vm6882_vm0, %v6883_v8 }
0x13ac   :  { %6593 = vmatprep.subr.bf16.mxu1 %v6881_v0 }
0x13af   :  { %v7663_v3 = vpop.permute.xlu1 %3053  ;;  %6595 = vmatpush3.bf16.msra.mxu1 %v7120_v6 }
0x13b0   :  { %6114 = vmatmul.mubr.msk.f32.vlgmr.msra.gmra.mrb[32].mxu0 %vm102_vm4, %v7663_v3  ;;  %6602 = vmatprep.subr.bf16.mxu1 %v6881_v0 }
0x13b1   :  { %6586 = vmatpush3.bf16.msra.mxu0 %v7132_v18  ;;  %6135 = vmatprep.mubr.msk.f32.mxu0 %vm6882_vm0, %v6883_v8 }
0x13b2   :  { %6587 = vmatprep.subr.bf16.mxu0 %v6881_v0 }
0x13b5   :  { %6589 = vmatpush3.bf16.msra.mxu0 %v7142_v23 }
0x13b6   :  { %6596 = vmatprep.subr.bf16.mxu0 %v6881_v0 }
0x146d   :  { %v2844_v5 = vpop.f32.mrb[28].mxu1 }
0x146e   :  { %v2845_v7 = vadd.f32 %v2844_v5, %v7604_v36  ;;  %v6082_v14 = vpop.f32.mrb[29].mxu1 }
0x1470   :  { %v2848_v15 = vadd.f32 %v7679_v22, %v2845_v7 }
0x1472   :  { %v2849_v42 = vmul.f32 0.5, %v2848_v15 }
0x1474   :  { %v2850_v39 = vsel %vm7057_vm3, %v2848_v15, %v2849_v42 }
0x1475   :  { %6810 = vtanh.f32 %v2850_v39  ;;  %v3048_v29 = vpop.f32.mrb[30].mxu1 }
0x1476   :  { %v6104_v45 = vpop.f32.mrb[31].mxu1 }
0x147d   :  { %v3228_v36 = vpop.f32.mrb[32].mxu1 }
0x147e   :  { %v3232_v25 = vadd.f32 %v5427_v24, %v3228_v36  ;;  %v6126_v57 = vpop.f32.mrb[33].mxu1 }
0x147f   :  { %v6811_v56 = vpop.eup %6810 }
0x1480   :  { %v3233_v32 = vmul.f32 0.5, %v3232_v25  ;;  %v2852_v62 = vmul.f32 0.5, %v6811_v56 }
0x1482   :  { %v3234_v33 = vsel %vm7057_vm3, %v3232_v25, %v3233_v32  ;;  %v2853_v34 = vadd.f32 0.5, %v2852_v62 }
0x1483   :  { %6812 = vtanh.f32 %v3234_v33  ;;  %v3123_v51 = vpop.f32.mrb[32].mxu0 }
0x1484   :  { %v3124_v38 = vadd.f32 %v3123_v51, %v3048_v29  ;;  %v6115_v40 = vpop.f32.mrb[33].mxu0  ;;  %v2854_v41 = vsel %vm7057_vm3, %v6811_v56, %v2853_v34 }
0x1485   :  { %2857 = vrot.lane.b32.xlu0 %v2854_v41, %s6884_s23  ;;  %v2855_v39 = vmul.f32 %v2854_v41, %v7541_v20 }
0x1486   :  { %v3127_v44 = vadd.f32 %v7599_v46, %v3124_v38 }
0x1488   :  { %v3128_v47 = vmul.f32 0.5, %v3127_v44 }
0x148a   :  { %v3129_v1 = vsel %vm7057_vm3, %v3127_v44, %v3128_v47 }
0x148b   :  { %6814 = vtanh.f32 %v3129_v1 }
0x148d   :  { %v6813_v48 = vpop.eup %6812 }
0x148e   :  { %v3236_v50 = vmul.f32 0.5, %v6813_v48 }
0x1490   :  { %v3237_v63 = vadd.f32 0.5, %v3236_v50 }
0x1492   :  { %v3238_v10 = vsel %vm7057_vm3, %v6813_v48, %v3237_v63  ;;  %v5432_v48 = vld [vmem:[%s8199_s0 + $0x30] sm:$0xff] }
0x1493   :  { %3241 = vrot.lane.b32.xlu1 %v3238_v10, %s6884_s23  ;;  %v3239_v36 = vmul.f32 %v3238_v10, %v7624_v26 }
0x1495   :  { %v6815_v52 = vpop.eup %6814 }
0x1496   :  { %v3131_v11 = vmul.f32 0.5, %v6815_v52 }
0x1498   :  { %v3132_v31 = vadd.f32 0.5, %v3131_v11 }
0x149a   :  { %v3133_v60 = vsel %vm7057_vm3, %v6815_v52, %v3132_v31 }
0x149b   :  { %3136 = vrot.lane.b32.xlu0 %v3133_v60, %s6884_s23  ;;  %v3134_v56 = vmul.f32 %v3133_v60, %v7628_v43 }
0x14f7   :  { %v2858_v58 = vpop.permute.xlu0 %2857 }
0x14f8   :  { %v2860_v5 = vmul.f32 %v2858_v58, %v2854_v41 }
0x14fa   :  { %2862 = vrot.lane.b32.xlu1 %v2860_v5, %s6885_s24 }
0x1505   :  { %v3242_v7 = vpop.permute.xlu1 %3241 }
0x1506   :  { %v3244_v14 = vmul.f32 %v3242_v7, %v3238_v10 }
0x1508   :  { %3246 = vrot.lane.b32.xlu0 %v3244_v14, %s6885_s24 }
0x150d   :  { %v3137_v15 = vpop.permute.xlu0 %3136 }
0x150e   :  { %v3139_v42 = vmul.f32 %v3137_v15, %v3133_v60 }
0x1510   :  { %3141 = vrot.lane.b32.xlu1 %v3139_v42, %s6885_s24 }
0x156c   :  { %v2863_v29 = vpop.permute.xlu1 %2862 }
0x156d   :  { %v7705_v45 = vadd.f32 %v2863_v29, %v2855_v39 }
0x156f   :  { %6816 = vtanh.f32 %v7705_v45 }
0x1579   :  { %v6817_v24 = vpop.eup %6816 }
0x157a   :  { %v3247_v25 = vpop.permute.xlu0 %3246  ;;  %2868 = vrot.lane.b32.xlu0 %v6817_v24, %s6884_s23 }
0x157b   :  { %v7710_v57 = vadd.f32 %v3247_v25, %v3239_v36  ;;  %v5437_v36 = vld [vmem:[%s8200_s6 + $0x30] sm:$0xff] }
0x157d   :  { %6818 = vtanh.f32 %v7710_v57 }
0x1582   :  { %v3142_v32 = vpop.permute.xlu1 %3141 }
0x1583   :  { %v7714_v62 = vadd.f32 %v3142_v32, %v3134_v56 }
0x1585   :  { %6820 = vtanh.f32 %v7714_v62 }
0x1587   :  { %v6819_v20 = vpop.eup %6818 }
0x1588   :  { %3252 = vrot.lane.b32.xlu1 %v6819_v20, %s6884_s23 }
0x158f   :  { %v6821_v33 = vpop.eup %6820 }
0x1590   :  { %3147 = vrot.lane.b32.xlu0 %v6821_v33, %s6884_s23 }
0x15ec   :  { %v2869_v26 = vpop.permute.xlu0 %2868 }
0x15ed   :  { %v7719_v34 = vmul.f32 %v2869_v26, %v2854_v41 }
0x15ef   :  { %3257 = vrot.lane.b32.xlu1 %v7719_v34, %s6885_s24 }
0x15fa   :  { %v3253_v51 = vpop.permute.xlu1 %3252 }
0x15fb   :  { %v3255_v38 = vmul.f32 %v3253_v51, %v3238_v10 }
0x15fd   :  { %3332 = vrot.lane.b32.xlu0 %v3255_v38, %s6885_s24 }
0x1602   :  { %v3148_v43 = vpop.permute.xlu0 %3147 }
0x1603   :  { %v7724_v40 = vmul.f32 %v3148_v43, %v3133_v60 }
0x1605   :  { %3536 = vrot.lane.b32.xlu1 %v7724_v40, %s6885_s24 }
0x1661   :  { %v3258_v44 = vpop.permute.xlu1 %3257 }
0x1662   :  { %6136 = vmatmul.mubr.msk.f32.vlgmr.msra.gmra.mrb[34].mxu0 %vm102_vm4, %v3258_v44 }
0x1663   :  { %6598 = vmatpush3.bf16.msra.mxu0 %v6988_v4  ;;  %6157 = vmatprep.mubr.msk.f32.mxu0 %vm6882_vm0, %v6883_v8 }
0x1664   :  { %6599 = vmatprep.subr.bf16.mxu0 %v6881_v0 }
0x1667   :  { %6601 = vmatpush3.bf16.msra.mxu0 %v7012_v12 }
0x1668   :  { %6608 = vmatprep.subr.bf16.mxu0 %v6881_v0 }
0x166a   :  { %6158 = vmatmul.mubr.msk.f32.vlgmr.msra.gmra.mrb[36].mxu0 %vm102_vm4, %v7663_v3 }
0x166b   :  { %6610 = vmatpush3.bf16.msra.mxu0 %v7092_v59  ;;  %6179 = vmatprep.mubr.msk.f32.mxu0 %vm6882_vm0, %v6883_v8 }
0x166c   :  { %6611 = vmatprep.subr.bf16.mxu0 %v6881_v0 }
0x166f   :  { %v3333_v41 = vpop.permute.xlu0 %3332  ;;  %6613 = vmatpush3.bf16.msra.mxu0 %v7098_v61 }
0x1670   :  { %6147 = vmatmul.mubr.msk.f32.vlgmr.msra.gmra.mrb[34].mxu1 %vm102_vm4, %v3333_v41  ;;  %6620 = vmatprep.subr.bf16.mxu0 %v6881_v0 }
0x1671   :  { %6604 = vmatpush3.bf16.msra.mxu1 %v7003_v9  ;;  %6168 = vmatprep.mubr.msk.f32.mxu1 %vm6882_vm0, %v6883_v8 }
0x1672   :  { %6605 = vmatprep.subr.bf16.mxu1 %v6881_v0 }
0x1675   :  { %6607 = vmatpush3.bf16.msra.mxu1 %v7016_v13 }
0x1676   :  { %6614 = vmatprep.subr.bf16.mxu1 %v6881_v0 }
0x1677   :  { %v3537_v3 = vpop.permute.xlu1 %3536 }
0x1678   :  { %6169 = vmatmul.mubr.msk.f32.vlgmr.msra.gmra.mrb[36].mxu1 %vm102_vm4, %v3537_v3 }
0x1679   :  { %6616 = vmatpush3.bf16.msra.mxu1 %v7027_v16  ;;  %6190 = vmatprep.mubr.msk.f32.mxu1 %vm6882_vm0, %v6883_v8 }
0x167a   :  { %6617 = vmatprep.subr.bf16.mxu1 %v6881_v0 }
0x167d   :  { %6619 = vmatpush3.bf16.msra.mxu1 %v7042_v19 }
0x167e   :  { %6626 = vmatprep.subr.bf16.mxu1 %v6881_v0 }
0x1680   :  { %6191 = vmatmul.mubr.msk.f32.vlgmr.msra.gmra.mrb[38].mxu1 %vm102_vm4, %v3333_v41 }
0x1681   :  { %6628 = vmatpush3.bf16.msra.mxu1 %v7110_v2  ;;  %6212 = vmatprep.mubr.msk.f32.mxu1 %vm6882_vm0, %v6883_v8 }
0x1682   :  { %6629 = vmatprep.subr.bf16.mxu1 %v6881_v0 }
0x1685   :  { %6631 = vmatpush3.bf16.msra.mxu1 %v7120_v6 }
0x1686   :  { %6638 = vmatprep.subr.bf16.mxu1 %v6881_v0 }
0x1735   :  { %v3327_v47 = vpop.f32.mrb[34].mxu0 }
0x1736   :  { %v6137_v1 = vpop.f32.mrb[35].mxu0 }
0x173d   :  { %v3507_v50 = vpop.f32.mrb[36].mxu0 }
0x173e   :  { %v3511_v63 = vadd.f32 %v5432_v48, %v3507_v50  ;;  %v6159_v10 = vpop.f32.mrb[37].mxu0 }
0x1740   :  { %v3512_v52 = vmul.f32 0.5, %v3511_v63 }
0x1742   :  { %v3513_v11 = vsel %vm7057_vm3, %v3511_v63, %v3512_v52 }
0x1743   :  { %6822 = vtanh.f32 %v3513_v11  ;;  %v3402_v31 = vpop.f32.mrb[34].mxu1 }
0x1744   :  { %v3403_v60 = vadd.f32 %v3402_v31, %v3327_v47  ;;  %v6148_v58 = vpop.f32.mrb[35].mxu1 }
0x1746   :  { %v3406_v5 = vadd.f32 %v7679_v22, %v3403_v60 }
0x1748   :  { %v3407_v7 = vmul.f32 0.5, %v3406_v5 }
0x174a   :  { %v3408_v14 = vsel %vm7057_vm3, %v3406_v5, %v3407_v7 }
0x174b   :  { %6824 = vtanh.f32 %v3408_v14  ;;  %v7772_v15 = vpop.f32.mrb[36].mxu1 }
0x174c   :  { %v6170_v42 = vpop.f32.mrb[37].mxu1 }
0x174d   :  { %v6823_v39 = vpop.eup %6822 }
0x174e   :  { %v3515_v29 = vmul.f32 0.5, %v6823_v39 }
0x1750   :  { %v3516_v24 = vadd.f32 0.5, %v3515_v29 }
0x1752   :  { %v3517_v25 = vsel %vm7057_vm3, %v6823_v39, %v3516_v24 }
0x1753   :  { %v3786_v56 = vpop.f32.mrb[38].mxu1  ;;  %3520 = vrot.lane.b32.xlu0 %v3517_v25, %s6884_s23  ;;  %v3518_v31 = vmul.f32 %v3517_v25, %v7634_v54 }
0x1754   :  { %v3790_v32 = vadd.f32 %v5437_v36, %v3786_v56  ;;  %v6192_v20 = vpop.f32.mrb[39].mxu1 }
0x1755   :  { %v6825_v33 = vpop.eup %6824 }
0x1756   :  { %v3791_v26 = vmul.f32 0.5, %v3790_v32  ;;  %v3410_v51 = vmul.f32 0.5, %v6825_v33 }
0x1758   :  { %v3792_v38 = vsel %vm7057_vm3, %v3790_v32, %v3791_v26  ;;  %v3411_v43 = vadd.f32 0.5, %v3410_v51 }
0x1759   :  { %6826 = vtanh.f32 %v3792_v38 }
0x175a   :  { %v3412_v44 = vsel %vm7057_vm3, %v6825_v33, %v3411_v43 }
0x175b   :  { %3415 = vrot.lane.b32.xlu1 %v3412_v44, %s6884_s23  ;;  %v3413_v5 = vmul.f32 %v3412_v44, %v7705_v45 }
0x1763   :  { %v6827_v41 = vpop.eup %6826 }
0x1764   :  { %v3794_v3 = vmul.f32 0.5, %v6827_v41 }
0x1766   :  { %v3795_v47 = vadd.f32 0.5, %v3794_v3 }
0x1768   :  { %v3796_v1 = vsel %vm7057_vm3, %v6827_v41, %v3795_v47 }
0x1769   :  { %3799 = vrot.lane.b32.xlu0 %v3796_v1, %s6884_s23  ;;  %v3797_v29 = vmul.f32 %v3796_v1, %v7710_v57 }
0x17c5   :  { %v3521_v48 = vpop.permute.xlu0 %3520 }
0x17c6   :  { %v3523_v50 = vmul.f32 %v3521_v48, %v3517_v25 }
0x17c8   :  { %3525 = vrot.lane.b32.xlu1 %v3523_v50, %s6885_s24  ;;  %v5442_v50 = vld [vmem:[%s8199_s0 + $0x38] sm:$0xff] }
0x17cd   :  { %v3416_v63 = vpop.permute.xlu1 %3415 }
0x17ce   :  { %v3418_v10 = vmul.f32 %v3416_v63, %v3412_v44 }
0x17d0   :  { %3420 = vrot.lane.b32.xlu0 %v3418_v10, %s6885_s24 }
0x17db   :  { %v3800_v52 = vpop.permute.xlu0 %3799 }
0x17dc   :  { %v3802_v11 = vmul.f32 %v3800_v52, %v3796_v1 }
0x17de   :  { %3804 = vrot.lane.b32.xlu1 %v3802_v11, %s6885_s24 }
0x183a   :  { %v3526_v60 = vpop.permute.xlu1 %3525 }
0x183b   :  { %v7792_v58 = vadd.f32 %v3526_v60, %v3518_v31 }
0x183d   :  { %6828 = vtanh.f32 %v7792_v58 }
0x1842   :  { %v3421_v7 = vpop.permute.xlu0 %3420 }
0x1843   :  { %v7796_v14 = vadd.f32 %v3421_v7, %v3413_v5 }
0x1845   :  { %6830 = vtanh.f32 %v7796_v14 }
0x1847   :  { %v6829_v42 = vpop.eup %6828 }
0x1848   :  { %3531 = vrot.lane.b32.xlu0 %v6829_v42, %s6884_s23 }
0x184f   :  { %v6831_v39 = vpop.eup %6830 }
0x1850   :  { %v3805_v24 = vpop.permute.xlu1 %3804  ;;  %3426 = vrot.lane.b32.xlu1 %v6831_v39, %s6884_s23 }
0x1851   :  { %v7802_v54 = vadd.f32 %v3805_v24, %v3797_v29 }
0x1853   :  { %6832 = vtanh.f32 %v7802_v54 }
0x185d   :  { %v6833_v36 = vpop.eup %6832 }
0x185e   :  { %3810 = vrot.lane.b32.xlu0 %v6833_v36, %s6884_s23 }
0x18ba   :  { %v3532_v45 = vpop.permute.xlu0 %3531 }
0x18bb   :  { %v3534_v56 = vmul.f32 %v3532_v45, %v3517_v25 }
0x18bd   :  { %3611 = vrot.lane.b32.xlu1 %v3534_v56, %s6885_s24 }
0x18c2   :  { %v3427_v32 = vpop.permute.xlu1 %3426 }
0x18c3   :  { %v7807_v20 = vmul.f32 %v3427_v32, %v3412_v44 }
0x18c5   :  { %3815 = vrot.lane.b32.xlu0 %v7807_v20, %s6885_s24 }
0x18d0   :  { %v3811_v57 = vpop.permute.xlu0 %3810 }
0x18d1   :  { %v3813_v33 = vmul.f32 %v3811_v57, %v3796_v1 }
0x18d3   :  { %3890 = vrot.lane.b32.xlu1 %v3813_v33, %s6885_s24 }
0x192f   :  { %v3612_v26 = vpop.permute.xlu1 %3611 }
0x1930   :  { %6180 = vmatmul.mubr.msk.f32.vlgmr.msra.gmra.mrb[38].mxu0 %vm102_vm4, %v3612_v26 }
0x1931   :  { %6622 = vmatpush3.bf16.msra.mxu0 %v7132_v18  ;;  %6201 = vmatprep.mubr.msk.f32.mxu0 %vm6882_vm0, %v6883_v8 }
0x1932   :  { %6623 = vmatprep.subr.bf16.mxu0 %v6881_v0 }
0x1935   :  { %6625 = vmatpush3.bf16.msra.mxu0 %v7142_v23 }
0x1936   :  { %6632 = vmatprep.subr.bf16.mxu0 %v6881_v0 }
0x1937   :  { %v3816_v25 = vpop.permute.xlu0 %3815 }
0x1938   :  { %6202 = vmatmul.mubr.msk.f32.vlgmr.msra.gmra.mrb[40].mxu0 %vm102_vm4, %v3816_v25 }
0x1939   :  { %6634 = vmatpush3.bf16.msra.mxu0 %v6988_v4  ;;  %6223 = vmatprep.mubr.msk.f32.mxu0 %vm6882_vm0, %v6883_v8 }
0x193a   :  { %6635 = vmatprep.subr.bf16.mxu0 %v6881_v0 }
0x193d   :  { %6637 = vmatpush3.bf16.msra.mxu0 %v7012_v12 }
0x193e   :  { %6644 = vmatprep.subr.bf16.mxu0 %v6881_v0 }
0x1940   :  { %6224 = vmatmul.mubr.msk.f32.vlgmr.msra.gmra.mrb[42].mxu0 %vm102_vm4, %v3612_v26 }
0x1941   :  { %6646 = vmatpush3.bf16.msra.mxu0 %v7092_v59  ;;  %6245 = vmatprep.mubr.msk.f32.mxu0 %vm6882_vm0, %v6883_v8 }
0x1942   :  { %6647 = vmatprep.subr.bf16.mxu0 %v6881_v0 }
0x1945   :  { %v7831_v51 = vpop.permute.xlu1 %3890  ;;  %6649 = vmatpush3.bf16.msra.mxu0 %v7098_v61 }
0x1946   :  { %6213 = vmatmul.mubr.msk.f32.vlgmr.msra.gmra.mrb[40].mxu1 %vm102_vm4, %v7831_v51  ;;  %6656 = vmatprep.subr.bf16.mxu0 %v6881_v0 }
0x1947   :  { %6640 = vmatpush3.bf16.msra.mxu1 %v7003_v9  ;;  %6234 = vmatprep.mubr.msk.f32.mxu1 %vm6882_vm0, %v6883_v8 }
0x1948   :  { %6641 = vmatprep.subr.bf16.mxu1 %v6881_v0 }
0x194b   :  { %6643 = vmatpush3.bf16.msra.mxu1 %v7016_v13 }
0x194c   :  { %6650 = vmatprep.subr.bf16.mxu1 %v6881_v0 }
0x1a03   :  { %v3681_v38 = vpop.f32.mrb[38].mxu0 }
0x1a04   :  { %v3682_v43 = vadd.f32 %v3681_v38, %v7772_v15  ;;  %v6181_v44 = vpop.f32.mrb[39].mxu0 }
0x1a06   :  { %v3685_v41 = vadd.f32 %v7599_v46, %v3682_v43 }
0x1a08   :  { %v3686_v3 = vmul.f32 0.5, %v3685_v41 }
0x1a0a   :  { %v3687_v47 = vsel %vm7057_vm3, %v3685_v41, %v3686_v3 }
0x1a0b   :  { %6834 = vtanh.f32 %v3687_v47  ;;  %v3885_v1 = vpop.f32.mrb[40].mxu0 }
0x1a0c   :  { %v6203_v48 = vpop.f32.mrb[41].mxu0 }
0x1a13   :  { %v4065_v63 = vpop.f32.mrb[42].mxu0 }
0x1a14   :  { %v4069_v10 = vadd.f32 %v5442_v50, %v4065_v63  ;;  %v6225_v52 = vpop.f32.mrb[43].mxu0 }
0x1a15   :  { %v6835_v11 = vpop.eup %6834 }
0x1a16   :  { %v4070_v31 = vmul.f32 0.5, %v4069_v10  ;;  %v3689_v15 = vmul.f32 0.5, %v6835_v11 }
0x1a18   :  { %v4071_v60 = vsel %vm7057_vm3, %v4069_v10, %v4070_v31  ;;  %v3690_v5 = vadd.f32 0.5, %v3689_v15 }
0x1a19   :  { %6836 = vtanh.f32 %v4071_v60  ;;  %v3960_v7 = vpop.f32.mrb[40].mxu1 }
0x1a1a   :  { %v3961_v42 = vadd.f32 %v3960_v7, %v3885_v1  ;;  %v6214_v39 = vpop.f32.mrb[41].mxu1  ;;  %v3691_v29 = vsel %vm7057_vm3, %v6835_v11, %v3690_v5 }
0x1a1b   :  { %3694 = vrot.lane.b32.xlu0 %v3691_v29, %s6884_s23  ;;  %v3692_v50 = vmul.f32 %v3691_v29, %v7714_v62 }
0x1a1c   :  { %v3964_v24 = vadd.f32 %v7679_v22, %v3961_v42 }
0x1a1e   :  { %v3965_v36 = vmul.f32 0.5, %v3964_v24 }
0x1a20   :  { %v3966_v45 = vsel %vm7057_vm3, %v3964_v24, %v3965_v36 }
0x1a21   :  { %6838 = vtanh.f32 %v3966_v45 }
0x1a23   :  { %v6837_v56 = vpop.eup %6836 }
0x1a24   :  { %v4073_v32 = vmul.f32 0.5, %v6837_v56 }
0x1a26   :  { %v4074_v57 = vadd.f32 0.5, %v4073_v32 }
0x1a28   :  { %v4075_v33 = vsel %vm7057_vm3, %v6837_v56, %v4074_v57 }
0x1a29   :  { %4078 = vrot.lane.b32.xlu1 %v4075_v33, %s6884_s23  ;;  %v4076_v11 = vmul.f32 %v4075_v33, %v7792_v58 }
0x1a2b   :  { %v6839_v26 = vpop.eup %6838 }
0x1a2c   :  { %v3968_v25 = vmul.f32 0.5, %v6839_v26 }
0x1a2e   :  { %v3969_v38 = vadd.f32 0.5, %v3968_v25 }
0x1a30   :  { %v3970_v43 = vsel %vm7057_vm3, %v6839_v26, %v3969_v38 }
0x1a31   :  { %3973 = vrot.lane.b32.xlu0 %v3970_v43, %s6884_s23  ;;  %v3971_v60 = vmul.f32 %v3970_v43, %v7796_v14 }
0x1a8d   :  { %v3695_v44 = vpop.permute.xlu0 %3694 }
0x1a8e   :  { %v3697_v41 = vmul.f32 %v3695_v44, %v3691_v29 }
0x1a90   :  { %3699 = vrot.lane.b32.xlu1 %v3697_v41, %s6885_s24 }
0x1a9b   :  { %v4079_v3 = vpop.permute.xlu1 %4078 }
0x1a9c   :  { %v4081_v47 = vmul.f32 %v4079_v3, %v4075_v33 }
0x1a9e   :  { %4083 = vrot.lane.b32.xlu0 %v4081_v47, %s6885_s24 }
0x1aa3   :  { %v3974_v1 = vpop.permute.xlu0 %3973 }
0x1aa4   :  { %v3976_v48 = vmul.f32 %v3974_v1, %v3970_v43 }
0x1aa6   :  { %3978 = vrot.lane.b32.xlu1 %v3976_v48, %s6885_s24 }
0x1b02   :  { %v3700_v63 = vpop.permute.xlu1 %3699 }
0x1b03   :  { %v7868_v10 = vadd.f32 %v3700_v63, %v3692_v50  ;;  %v5452_v50 = vld [vmem:[%s8199_s0 + $0x40] sm:$0xff] }
0x1b05   :  { %6840 = vtanh.f32 %v7868_v10 }
0x1b0f   :  { %v6841_v52 = vpop.eup %6840 }
0x1b10   :  { %v4084_v31 = vpop.permute.xlu0 %4083  ;;  %3705 = vrot.lane.b32.xlu0 %v6841_v52, %s6884_s23 }
0x1b11   :  { %v7873_v15 = vadd.f32 %v4084_v31, %v4076_v11 }
0x1b13   :  { %6842 = vtanh.f32 %v7873_v15 }
0x1b18   :  { %v3979_v5 = vpop.permute.xlu1 %3978 }
0x1b19   :  { %v7877_v7 = vadd.f32 %v3979_v5, %v3971_v60 }
0x1b1b   :  { %6844 = vtanh.f32 %v7877_v7 }
0x1b1d   :  { %v6843_v62 = vpop.eup %6842 }
0x1b1e   :  { %4089 = vrot.lane.b32.xlu1 %v6843_v62, %s6884_s23 }
0x1b25   :  { %v6845_v42 = vpop.eup %6844 }
0x1b26   :  { %3984 = vrot.lane.b32.xlu0 %v6845_v42, %s6884_s23 }
0x1b82   :  { %v3706_v58 = vpop.permute.xlu0 %3705 }
0x1b83   :  { %v7882_v39 = vmul.f32 %v3706_v58, %v3691_v29 }
0x1b85   :  { %4094 = vrot.lane.b32.xlu1 %v7882_v39, %s6885_s24 }
0x1b90   :  { %v4090_v24 = vpop.permute.xlu1 %4089 }
0x1b91   :  { %v4092_v36 = vmul.f32 %v4090_v24, %v4075_v33 }
0x1b93   :  { %4169 = vrot.lane.b32.xlu0 %v4092_v36, %s6885_s24 }
0x1b98   :  { %v3985_v14 = vpop.permute.xlu0 %3984 }
0x1b99   :  { %v7887_v45 = vmul.f32 %v3985_v14, %v3970_v43 }
0x1b9b   :  { %4373 = vrot.lane.b32.xlu1 %v7887_v45, %s6885_s24 }
0x1bf7   :  { %v4095_v56 = vpop.permute.xlu1 %4094 }
0x1bf8   :  { %6235 = vmatmul.mubr.msk.f32.vlgmr.msra.gmra.mrb[42].mxu1 %vm102_vm4, %v4095_v56 }
0x1bf9   :  { %6652 = vmatpush3.bf16.msra.mxu1 %v7027_v16  ;;  %6256 = vmatprep.mubr.msk.f32.mxu1 %vm6882_vm0, %v6883_v8 }
0x1bfa   :  { %6653 = vmatprep.subr.bf16.mxu1 %v6881_v0 }
0x1bfd   :  { %6655 = vmatpush3.bf16.msra.mxu1 %v7042_v19 }
0x1bfe   :  { %6662 = vmatprep.subr.bf16.mxu1 %v6881_v0 }
0x1c00   :  { %6257 = vmatmul.mubr.msk.f32.vlgmr.msra.gmra.mrb[44].mxu1 %vm102_vm4, %v7831_v51 }
0x1c01   :  { %6664 = vmatpush3.bf16.msra.mxu1 %v7110_v2  ;;  %6278 = vmatprep.mubr.msk.f32.mxu1 %vm6882_vm0, %v6883_v8 }
0x1c02   :  { %6665 = vmatprep.subr.bf16.mxu1 %v6881_v0 }
0x1c05   :  { %v4170_v16 = vpop.permute.xlu0 %4169  ;;  %6667 = vmatpush3.bf16.msra.mxu1 %v7120_v6 }
0x1c06   :  { %6246 = vmatmul.mubr.msk.f32.vlgmr.msra.gmra.mrb[44].mxu0 %vm102_vm4, %v4170_v16  ;;  %6674 = vmatprep.subr.bf16.mxu1 %v6881_v0 }
0x1c07   :  { %6658 = vmatpush3.bf16.msra.mxu0 %v7132_v18  ;;  %6267 = vmatprep.mubr.msk.f32.mxu0 %vm6882_vm0, %v6883_v8  ;;  %v5447_v18 = vld [vmem:[%s8200_s6 + $0x38] sm:$0xff] }
0x1c08   :  { %6659 = vmatprep.subr.bf16.mxu0 %v6881_v0 }
0x1c0b   :  { %6661 = vmatpush3.bf16.msra.mxu0 %v7142_v23 }
0x1c0c   :  { %6668 = vmatprep.subr.bf16.mxu0 %v6881_v0 }
0x1c0d   :  { %v4374_v19 = vpop.permute.xlu1 %4373 }
0x1c0e   :  { %6268 = vmatmul.mubr.msk.f32.vlgmr.msra.gmra.mrb[46].mxu0 %vm102_vm4, %v4374_v19 }
0x1c0f   :  { %6670 = vmatpush3.bf16.msra.mxu0 %v6988_v4  ;;  %6289 = vmatprep.mubr.msk.f32.mxu0 %vm6882_vm0, %v6883_v8 }
0x1c10   :  { %6671 = vmatprep.subr.bf16.mxu0 %v6881_v0 }
0x1c13   :  { %6673 = vmatpush3.bf16.msra.mxu0 %v7012_v12 }
0x1c14   :  { %6680 = vmatprep.subr.bf16.mxu0 %v6881_v0 }
0x1c16   :  { %6290 = vmatmul.mubr.msk.f32.vlgmr.msra.gmra.mrb[48].mxu0 %vm102_vm4, %v4170_v16 }
0x1c17   :  { %6682 = vmatpush3.bf16.msra.mxu0 %v7092_v59  ;;  %6311 = vmatprep.mubr.msk.f32.mxu0 %vm6882_vm0, %v6883_v8 }
0x1c18   :  { %6683 = vmatprep.subr.bf16.mxu0 %v6881_v0 }
0x1c1b   :  { %6685 = vmatpush3.bf16.msra.mxu0 %v7098_v61 }
0x1c1c   :  { %6692 = vmatprep.subr.bf16.mxu0 %v6881_v0 }
0x1ccb   :  { %v4164_v2 = vpop.f32.mrb[42].mxu1 }
0x1ccc   :  { %v6236_v6 = vpop.f32.mrb[43].mxu1 }
0x1cd3   :  { %v4344_v23 = vpop.f32.mrb[44].mxu1 }
0x1cd4   :  { %v4348_v51 = vadd.f32 %v5447_v18, %v4344_v23  ;;  %v6258_v29 = vpop.f32.mrb[45].mxu1 }
0x1cd6   :  { %v4349_v32 = vmul.f32 0.5, %v4348_v51 }
0x1cd8   :  { %v4350_v57 = vsel %vm7057_vm3, %v4348_v51, %v4349_v32 }
0x1cd9   :  { %6846 = vtanh.f32 %v4350_v57  ;;  %v4239_v33 = vpop.f32.mrb[44].mxu0 }
0x1cda   :  { %v4240_v26 = vadd.f32 %v4239_v33, %v4164_v2  ;;  %v6247_v25 = vpop.f32.mrb[45].mxu0 }
0x1cdc   :  { %v4243_v38 = vadd.f32 %v7599_v46, %v4240_v26 }
0x1cde   :  { %v4244_v43 = vmul.f32 0.5, %v4243_v38 }
0x1ce0   :  { %v4245_v44 = vsel %vm7057_vm3, %v4243_v38, %v4244_v43 }
0x1ce1   :  { %6848 = vtanh.f32 %v4245_v44  ;;  %v7935_v41 = vpop.f32.mrb[46].mxu0 }
0x1ce2   :  { %v6269_v3 = vpop.f32.mrb[47].mxu0 }
0x1ce3   :  { %v6847_v47 = vpop.eup %6846 }
0x1ce4   :  { %v4352_v1 = vmul.f32 0.5, %v6847_v47 }
0x1ce6   :  { %v4353_v48 = vadd.f32 0.5, %v4352_v1 }
0x1ce8   :  { %v4354_v63 = vsel %vm7057_vm3, %v6847_v47, %v4353_v48 }
0x1ce9   :  { %v4623_v52 = vpop.f32.mrb[48].mxu0  ;;  %4357 = vrot.lane.b32.xlu0 %v4354_v63, %s6884_s23  ;;  %v4355_v51 = vmul.f32 %v4354_v63, %v7802_v54 }
0x1cea   :  { %v4627_v46 = vadd.f32 %v5452_v50, %v4623_v52  ;;  %v6291_v11 = vpop.f32.mrb[49].mxu0 }
0x1ceb   :  { %v6849_v31 = vpop.eup %6848 }
0x1cec   :  { %v4628_v60 = vmul.f32 0.5, %v4627_v46  ;;  %v4247_v5 = vmul.f32 0.5, %v6849_v31 }
0x1cee   :  { %v4629_v62 = vsel %vm7057_vm3, %v4627_v46, %v4628_v60  ;;  %v4248_v42 = vadd.f32 0.5, %v4247_v5 }
0x1cef   :  { %6850 = vtanh.f32 %v4629_v62 }
0x1cf0   :  { %v4249_v58 = vsel %vm7057_vm3, %v6849_v31, %v4248_v42  ;;  %v5457_v31 = vld [vmem:[%s8199_s0 + $0x48] sm:$0xff] }
0x1cf1   :  { %4252 = vrot.lane.b32.xlu1 %v4249_v58, %s6884_s23  ;;  %v4250_v57 = vmul.f32 %v4249_v58, %v7868_v10 }
0x1cf9   :  { %v6851_v24 = vpop.eup %6850 }
0x1cfa   :  { %v4631_v36 = vmul.f32 0.5, %v6851_v24 }
0x1cfc   :  { %v4632_v14 = vadd.f32 0.5, %v4631_v36 }
0x1cfe   :  { %v4633_v56 = vsel %vm7057_vm3, %v6851_v24, %v4632_v14 }
0x1cff   :  { %4636 = vrot.lane.b32.xlu0 %v4633_v56, %s6884_s23  ;;  %v4634_v43 = vmul.f32 %v4633_v56, %v7873_v15 }
0x1d5b   :  { %v4358_v16 = vpop.permute.xlu0 %4357 }
0x1d5c   :  { %v4360_v19 = vmul.f32 %v4358_v16, %v4354_v63 }
0x1d5e   :  { %4362 = vrot.lane.b32.xlu1 %v4360_v19, %s6885_s24 }
0x1d63   :  { %v4253_v2 = vpop.permute.xlu1 %4252 }
0x1d64   :  { %v4255_v6 = vmul.f32 %v4253_v2, %v4249_v58 }
0x1d66   :  { %4257 = vrot.lane.b32.xlu0 %v4255_v6, %s6885_s24 }
0x1d71   :  { %v4637_v18 = vpop.permute.xlu0 %4636 }
0x1d72   :  { %v4639_v23 = vmul.f32 %v4637_v18, %v4633_v56 }
0x1d74   :  { %4641 = vrot.lane.b32.xlu1 %v4639_v23, %s6885_s24 }
0x1dd0   :  { %v4363_v29 = vpop.permute.xlu1 %4362 }
0x1dd1   :  { %v4365_v32 = vadd.f32 %v4363_v29, %v4355_v51 }
0x1dd3   :  { %6852 = vtanh.f32 %v4365_v32 }
0x1dd8   :  { %v4258_v33 = vpop.permute.xlu0 %4257 }
0x1dd9   :  { %v7956_v26 = vadd.f32 %v4258_v33, %v4250_v57 }
0x1ddb   :  { %6854 = vtanh.f32 %v7956_v26 }
0x1ddd   :  { %v6853_v25 = vpop.eup %6852 }
0x1dde   :  { %4368 = vrot.lane.b32.xlu0 %v6853_v25, %s6884_s23 }
0x1de5   :  { %v6855_v38 = vpop.eup %6854 }
0x1de6   :  { %v4642_v44 = vpop.permute.xlu1 %4641  ;;  %4263 = vrot.lane.b32.xlu1 %v6855_v38, %s6884_s23 }
0x1de7   :  { %v7962_v54 = vadd.f32 %v4642_v44, %v4634_v43 }
0x1de9   :  { %6856 = vtanh.f32 %v7962_v54 }
0x1df3   :  { %v6857_v3 = vpop.eup %6856 }
0x1df4   :  { %4647 = vrot.lane.b32.xlu0 %v6857_v3, %s6884_s23 }
0x1e50   :  { %v4369_v10 = vpop.permute.xlu0 %4368 }
0x1e51   :  { %v4371_v47 = vmul.f32 %v4369_v10, %v4354_v63 }
0x1e53   :  { %4448 = vrot.lane.b32.xlu1 %v4371_v47, %s6885_s24 }
0x1e58   :  { %v4264_v1 = vpop.permute.xlu1 %4263 }
0x1e59   :  { %v7967_v48 = vmul.f32 %v4264_v1, %v4249_v58  ;;  %v8007_v58 = vld [vmem:[%s8204_s4] ss:$0 sm:$0xff] }
0x1e5b   :  { %4652 = vrot.lane.b32.xlu0 %v7967_v48, %s6885_s24 }
0x1e66   :  { %v4648_v15 = vpop.permute.xlu0 %4647 }
0x1e67   :  { %v4650_v50 = vmul.f32 %v4648_v15, %v4633_v56 }
0x1e69   :  { %4727 = vrot.lane.b32.xlu1 %v4650_v50, %s6885_s24 }
0x1ec5   :  { %v4449_v52 = vpop.permute.xlu1 %4448 }
0x1ec6   :  { %6279 = vmatmul.mubr.msk.f32.vlgmr.msra.gmra.mrb[46].mxu1 %vm102_vm4, %v4449_v52 }
0x1ec7   :  { %6676 = vmatpush3.bf16.msra.mxu1 %v7003_v9  ;;  %6300 = vmatprep.mubr.msk.f32.mxu1 %vm6882_vm0, %v6883_v8 }
0x1ec8   :  { %6677 = vmatprep.subr.bf16.mxu1 %v6881_v0 }
0x1ecb   :  { %6679 = vmatpush3.bf16.msra.mxu1 %v7016_v13 }
0x1ecc   :  { %6686 = vmatprep.subr.bf16.mxu1 %v6881_v0 }
0x1ecd   :  { %v4653_v63 = vpop.permute.xlu0 %4652 }
0x1ece   :  { %6301 = vmatmul.mubr.msk.f32.vlgmr.msra.gmra.mrb[48].mxu1 %vm102_vm4, %v4653_v63  ;;  %v6886_v63 = vmov 0  }
0x1ecf   :  { %6688 = vmatpush3.bf16.msra.mxu1 %v6988_v4  ;;  %6322 = vmatprep.mubr.msk.f32.mxu1 %vm6882_vm0, %v6883_v8 }
0x1ed0   :  { %6689 = vmatprep.subr.bf16.mxu1 %v6881_v0  ;;  %6728 = vset.pattern.permute.xlu0 %v6886_v63 }
0x1ed1   :  { %6729 = vset.pattern.permute.xlu1 %v6886_v63  ;;  %v5441_v63 = vld [vmem:[%s8207_s11 + $0x30] sm:$0xff] }
0x1ed3   :  { %6691 = vmatpush3.bf16.msra.mxu1 %v7012_v12 }
0x1ed4   :  { %6698 = vmatprep.subr.bf16.mxu1 %v6881_v0 }
0x1edb   :  { %v4728_v46 = vpop.permute.xlu1 %4727 }
0x1edc   :  { %6312 = vmatmul.mubr.msk.f32.vlgmr.msra.gmra.mrb[50].mxu0 %vm102_vm4, %v4728_v46  ;;  %6323 = vmatmul.mubr.msk.f32.vlgmr.msra.gmra.mrb[50].mxu1 %vm102_vm4, %v4728_v46 }
0x1edd   :  { %6700 = vmatpush3.bf16.msra.mxu1 %v7092_v59  ;;  %6694 = vmatpush3.bf16.msra.mxu0 %v7003_v9 }
0x1ede   :  { %6701 = vmatprep.subr.bf16.mxu1 %v6881_v0  ;;  %6695 = vmatprep.subr.bf16.mxu0 %v6881_v0 }
0x1edf   :  { %6344 = vmatprep.mubr.msk.f32.mxu1 %vm6882_vm0, %v6883_v8  ;;  %6333 = vmatprep.mubr.msk.f32.mxu0 %vm6882_vm0, %v6883_v8 }
0x1ee1   :  { %6703 = vmatpush3.bf16.msra.mxu1 %v7098_v61  ;;  %6697 = vmatpush3.bf16.msra.mxu0 %v7016_v13 }
0x1ee2   :  { %6704 = vmatprep.subr.bf16.mxu0 %v6881_v0  ;;  %6710 = vmatprep.subr.bf16.mxu1 %v6881_v0 }
0x1f99   :  { %v4518_v4 = vpop.f32.mrb[46].mxu1 }
0x1f9a   :  { %v4519_v9 = vadd.f32 %v4518_v4, %v7935_v41  ;;  %v6280_v12 = vpop.f32.mrb[47].mxu1 }
0x1f9c   :  { %v4522_v50 = vadd.f32 %v7679_v22, %v4519_v9 }
0x1f9e   :  { %v4523_v52 = vmul.f32 0.5, %v4522_v50 }
0x1fa1   :  { %v4722_v59 = vpop.f32.mrb[48].mxu1 }
0x1fa2   :  { %v6302_v11 = vpop.f32.mrb[49].mxu1 }
0x1faf   :  { %v4797_v60 = vpop.f32.mrb[50].mxu0  ;;  %v4902_v5 = vpop.f32.mrb[50].mxu1 }
0x1fb0   :  { %v4798_v62 = vadd.f32 %v4797_v60, %v4722_v59  ;;  %v4906_v61 = vadd.f32 %v5457_v31, %v4902_v5  ;;  %v6313_v42 = vpop.f32.mrb[51].mxu0  ;;  %v6324_v13 = vpop.f32.mrb[51].mxu1 }
0x1fb1   :  { %v641_v42 = vld [vmem:[%s8207_s11] sm:$0xff]  ;;  %v5406_v13 = vld [vmem:[%s8206_s5 + $0x18] sm:$0xff] }
0x1fb2   :  { %v4801_v41 = vadd.f32 %v8007_v58, %v4798_v62  ;;  %v4907_v24 = vmul.f32 0.5, %v4906_v61 }
0x1fb4   :  { %v4802_v36 = vmul.f32 0.5, %v4801_v41  ;;  %v4908_v14 = vsel %vm7057_vm3, %v4906_v61, %v4907_v24  ;;  %v369_v61 = vld [vmem:[%s8206_s5] sm:$0xff]  ;;  %v5426_v24 = vld [vmem:[%s8206_s5 + $0x28] sm:$0xff] }
0x1fb5   :  { %6858 = vtanh.f32 %v4908_v14  ;;  %v5446_v14 = vld [vmem:[%s8206_s5 + $0x38] sm:$0xff] }
0x1fb6   :  { %v4803_v56 = vsel %vm7057_vm3, %v4801_v41, %v4802_v36  ;;  %v5416_v41 = vld [vmem:[%s8206_s5 + $0x20] sm:$0xff]  ;;  %v5436_v36 = vld [vmem:[%s8206_s5 + $0x30] sm:$0xff] }
0x1fb7   :  { %6860 = vtanh.f32 %v4803_v56  ;;  %v5456_v56 = vld [vmem:[%s8206_s5 + $0x40] sm:$0xff] }
0x1fbf   :  { %v6859_v16 = vpop.eup %6858 }
0x1fc0   :  { %v4910_v19 = vmul.f32 0.5, %v6859_v16 }
0x1fc1   :  { %v6861_v2 = vpop.eup %6860 }
0x1fc2   :  { %v4911_v6 = vadd.f32 0.5, %v4910_v19  ;;  %v4805_v18 = vmul.f32 0.5, %v6861_v2 }
0x1fc4   :  { %v4912_v23 = vsel %vm7057_vm3, %v6859_v16, %v4911_v6  ;;  %v4806_v51 = vadd.f32 0.5, %v4805_v18 }
0x1fc5   :  { %4915 = vrot.lane.b32.xlu1 %v4912_v23, %s6884_s23  ;;  %v4913_v38 = vmul.f32 %v4912_v23, %v7962_v54  ;;  %v4524_v54 = vsel %vm7057_vm3, %v4522_v50, %v4523_v52 }
0x1fc6   :  { %v4807_v29 = vsel %vm7057_vm3, %v6861_v2, %v4806_v51 }
0x1fc7   :  { %4810 = vrot.lane.b32.xlu0 %v4807_v29, %s6884_s23  ;;  %v4808_v3 = vmul.f32 %v4807_v29, %v7956_v26 }
0x2037   :  { %v4916_v32 = vpop.permute.xlu1 %4915 }
0x2038   :  { %v4918_v57 = vmul.f32 %v4916_v32, %v4912_v23 }
0x2039   :  { %v4811_v33 = vpop.permute.xlu0 %4810 }
0x203a   :  { %v4813_v25 = vmul.f32 %v4811_v33, %v4807_v29  ;;  %4920 = vrot.lane.b32.xlu1 %v4918_v57, %s6885_s24 }
0x203c   :  { %4815 = vrot.lane.b32.xlu0 %v4813_v25, %s6885_s24 }
0x20ac   :  { %v4921_v43 = vpop.permute.xlu1 %4920 }
0x20ad   :  { %v4923_v44 = vadd.f32 %v4921_v43, %v4913_v38  ;;  %v5461_v38 = vld [vmem:[%s8206_s5 + $0x48] sm:$0xff] }
0x20ae   :  { %v4816_v10 = vpop.permute.xlu0 %4815 }
0x20af   :  { %6862 = vtanh.f32 %v4923_v44  ;;  %v8024_v47 = vadd.f32 %v4816_v10, %v4808_v3  ;;  %v5386_v44 = vld [vmem:[%s8206_s5 + $0x8] sm:$0xff]  ;;  %v5401_v10 = vld [vmem:[%s8207_s11 + $0x10] sm:$0xff] }
0x20b0   :  { %v5391_v3 = vld [vmem:[%s8207_s11 + $0x8] sm:$0xff] }
0x20b1   :  { %6864 = vtanh.f32 %v8024_v47 }
0x20b2   :  { %6866 = vtanh.f32 %v4524_v54 }
0x20b9   :  { %v6863_v1 = vpop.eup %6862 }
0x20ba   :  { %4926 = vrot.lane.b32.xlu1 %v6863_v1, %s6884_s23  ;;  %v5411_v1 = vld [vmem:[%s8207_s11 + $0x18] sm:$0xff] }
0x20bb   :  { %v6865_v15 = vpop.eup %6864 }
0x20bc   :  { %4821 = vrot.lane.b32.xlu0 %v6865_v15, %s6884_s23  ;;  %v6867_v26 = vpop.eup %6866  ;;  %v5421_v15 = vld [vmem:[%s8207_s11 + $0x20] sm:$0xff] }
0x20bd   :  { %v4526_v4 = vmul.f32 0.5, %v6867_v26 }
0x20bf   :  { %v4527_v31 = vadd.f32 0.5, %v4526_v4 }
0x20c1   :  { %v8039_v22 = vsel %vm7057_vm3, %v6867_v26, %v4527_v31  ;;  %v5431_v26 = vld [vmem:[%s8207_s11 + $0x28] sm:$0xff]  ;;  %v5117_v31 = vld [vmem:[%s8208_s13] sm:$0xff] }
0x20c2   :  { %v4529_v52 = vmul.f32 %v8039_v22, %v7877_v7 }
0x212c   :  { %v4927_v46 = vpop.permute.xlu1 %4926 }
0x212d   :  { %v4929_v12 = vmul.f32 %v4927_v46, %v4912_v23  ;;  %v5451_v46 = vld [vmem:[%s8207_s11 + $0x38] sm:$0xff] }
0x212e   :  { %v4822_v59 = vpop.permute.xlu0 %4821 }
0x212f   :  { %v8032_v11 = vmul.f32 %v4822_v59, %v4807_v29  ;;  %5006 = vrot.lane.b32.xlu1 %v4929_v12, %s6885_s24 }
0x2131   :  { %4931 = vrot.lane.b32.xlu0 %v8032_v11, %s6885_s24 }
0x2135   :  { %4531 = vrot.lane.b32.xlu0 %v8039_v22, %s6884_s23 }
0x21a1   :  { %v5007_v9 = vpop.permute.xlu1 %5006 }
0x21a2   :  { %6345 = vmatmul.mubr.msk.f32.vlgmr.msra.gmra.mrb[52].mxu1 %vm102_vm4, %v5007_v9  ;;  %v5118_v9 = vld [vmem:[%s8208_s13 + $0x8] sm:$0xff] }
0x21a3   :  { %v4932_v60 = vpop.permute.xlu0 %4931  ;;  %6366 = vmatprep.mubr.msk.f32.mxu1 %vm6882_vm0, %v6883_v8 }
0x21a4   :  { %6334 = vmatmul.mubr.msk.f32.vlgmr.msra.gmra.mrb[52].mxu0 %vm102_vm4, %v4932_v60  ;;  %v5119_v60 = vld [vmem:[%s8208_s13 + $0x10] sm:$0xff] }
0x21a5   :  { %6355 = vmatprep.mubr.msk.f32.mxu0 %vm6882_vm0, %v6883_v8 }
0x21a7   :  { %v4532_v5 = vpop.permute.xlu0 %4531 }
0x21a8   :  { %v4534_v62 = vmul.f32 %v4532_v5, %v8039_v22  ;;  %v6705_v5 = vpack.c.bf16 %v5118_v9, %v5117_v31 }
0x21aa   :  { %4536 = vrot.lane.b32.xlu0 %v4534_v62, %s6885_s24  ;;  %6706 = vmatpush3.bf16.msra.mxu0 %v6705_v5 }
0x21ab   :  { %6707 = vmatprep.subr.bf16.mxu0 %v6881_v0 }
0x21ae   :  { %372 = vperm.xlu0 %6728, %v369_v61  }
0x21b2   :  { %644 = vperm.xlu0 %6728, %v641_v42  }
0x21b6   :  { %2039 = vperm.xlu0 %6728, %v5406_v13  }
0x21ba   :  { %2597 = vperm.xlu0 %6728, %v5416_v41  }
0x21be   :  { %3155 = vperm.xlu0 %6728, %v5426_v24  }
0x21c2   :  { %3713 = vperm.xlu0 %6728, %v5436_v36  }
0x21c6   :  { %4271 = vperm.xlu0 %6728, %v5446_v14  }
0x21ca   :  { %4829 = vperm.xlu0 %6728, %v5456_v56  }
0x21ce   :  { %5108 = vperm.xlu0 %6728, %v5461_v38  }
0x221c   :  { %v4537_v50 = vpop.permute.xlu0 %4536 }
0x221d   :  { %v4539_v54 = vadd.f32 %v4537_v50, %v4529_v52 }
0x222d   :  { %v373_v42 = vpop.permute.xlu0 %372 }
0x222e   :  { %v375_v41 = vmul.f32 %v373_v42, %v7220_v35 }
0x2275   :  { %v5076_v16 = vpop.f32.mrb[52].mxu1 }
0x2276   :  { %v6346_v19 = vpop.f32.mrb[53].mxu1 }
0x2277   :  { %v5001_v2 = vpop.f32.mrb[52].mxu0 }
0x2278   :  { %v5077_v6 = vadd.f32 %v5076_v16, %v5001_v2  ;;  %v6335_v18 = vpop.f32.mrb[53].mxu0 }
0x227a   :  { %v5080_v23 = vadd.f32 %v8007_v58, %v5077_v6 }
0x227c   :  { %v5081_v51 = vmul.f32 0.5, %v5080_v23 }
0x227e   :  { %v5082_v29 = vsel %vm7057_vm3, %v5080_v23, %v5081_v51  ;;  %v645_v23 = vpop.permute.xlu0 %644 }
0x227f   :  { %6868 = vtanh.f32 %v5082_v29 }
0x2280   :  { %6870 = vtanh.f32 %v4539_v54 }
0x2289   :  { %v6869_v32 = vpop.eup %6868 }
0x228a   :  { %v5084_v57 = vmul.f32 0.5, %v6869_v32  ;;  %v6871_v4 = vpop.eup %6870 }
0x228c   :  { %v5085_v33 = vadd.f32 0.5, %v5084_v57 }
0x228e   :  { %v8080_v25 = vsel %vm7057_vm3, %v6869_v32, %v5085_v33  ;;  %v647_v32 = vmul.f32 %v645_v23, %v7224_v37  ;;  %v5115_v37 = vld [vmem:[%s8209_s12 + $0x10] sm:$0xff] }
0x228f   :  { %5089 = vrot.lane.b32.xlu1 %v8080_v25, %s6884_s23  ;;  %v5087_v7 = vmul.f32 %v8080_v25, %v8024_v47  ;;  %v5120_v47 = vld [vmem:[%s8208_s13 + $0x18] sm:$0xff] }
0x2290   :  { %v6708_v62 = vpack.c.bf16 %v5120_v47, %v5119_v60 }
0x2292   :  { %6709 = vmatpush3.bf16.msra.mxu0 %v6708_v62 }
0x2293   :  { %6716 = vmatprep.subr.bf16.mxu0 %v6881_v0 }
0x2301   :  { %v5090_v58 = vpop.permute.xlu1 %5089 }
0x2302   :  { %v5092_v43 = vmul.f32 %v5090_v58, %v8080_v25  ;;  %v5113_v58 = vld [vmem:[%s8209_s12] sm:$0xff] }
0x2304   :  { %5094 = vrot.lane.b32.xlu1 %v5092_v43, %s6885_s24  ;;  %v5114_v43 = vld [vmem:[%s8209_s12 + $0x8] sm:$0xff] }
0x2308   :  { %923 = vperm.xlu1 %6729, %v5386_v44  }
0x230c   :  { %1481 = vperm.xlu1 %6729, %v5396_v27  }
0x2310   :  { %1202 = vperm.xlu1 %6729, %v5391_v3  }
0x2314   :  { %1760 = vperm.xlu1 %6729, %v5401_v10  }
0x2318   :  { %2318 = vperm.xlu1 %6729, %v5411_v1  }
0x231c   :  { %2876 = vperm.xlu1 %6729, %v5421_v15  }
0x2320   :  { %3434 = vperm.xlu1 %6729, %v5431_v26  }
0x2324   :  { %3992 = vperm.xlu1 %6729, %v5441_v63   ;;  %v2040_v63 = vpop.permute.xlu0 %2039 }
0x2328   :  { %4550 = vperm.xlu1 %6729, %v5451_v46   ;;  %v2598_v46 = vpop.permute.xlu0 %2597 }
0x232c   :  { %4542 = vrot.lane.b32.xlu1 %v6871_v4, %s6884_s23 }
0x2376   :  { %v5095_v12 = vpop.permute.xlu1 %5094 }
0x2377   :  { %v5097_v59 = vadd.f32 %v5095_v12, %v5087_v7  ;;  %v2042_v7 = vmul.f32 %v2040_v63, %v7546_v28 }
0x2379   :  { %6872 = vtanh.f32 %v5097_v59 }
0x2383   :  { %v6873_v61 = vpop.eup %6872 }
0x2384   :  { %5100 = vrot.lane.b32.xlu0 %v6873_v61, %s6884_s23 }
0x2387   :  { %v924_v13 = vpop.permute.xlu1 %923 }
0x2388   :  { %v926_v24 = vmul.f32 %v924_v13, %v7308_v55 }
0x238a   :  { %v927_v36 = vadd.f32 %v926_v24, %v375_v41 }
0x238b   :  { %v1482_v14 = vpop.permute.xlu1 %1481 }
0x238c   :  { %v1484_v56 = vmul.f32 %v1482_v14, %v7388_v30  ;;  %v5284_v14 = vld [vmem:[%s8210_s15 + $0x10] sm:$0xff] }
0x238e   :  { %v1485_v16 = vadd.f32 %v1484_v56, %v927_v36 }
0x238f   :  { %v1203_v19 = vpop.permute.xlu1 %1202 }
0x2390   :  { %v1205_v29 = vmul.f32 %v1203_v19, %v7383_v21  ;;  %v2043_v12 = vadd.f32 %v2042_v7, %v1485_v16  ;;  %v22_v16 = vstv %s8211_s16 }
0x2391   :  { %23 = vst [vmem:[#allocation2] sm:$0x1] %v22_v16 }
0x2392   :  { %v1206_v33 = vadd.f32 %v1205_v29, %v647_v32 }
0x2393   :  { %v1761_v2 = vpop.permute.xlu1 %1760 }
0x2394   :  { %v1763_v57 = vmul.f32 %v1761_v2, %v7471_v17  ;;  %v6711_v17 = vpack.c.bf16 %v5114_v43, %v5113_v58 }
0x2396   :  { %v1764_v38 = vadd.f32 %v1763_v57, %v1206_v33  ;;  %6712 = vmatpush3.bf16.msra.mxu1 %v6711_v17 }
0x2397   :  { %v2319_v6 = vpop.permute.xlu1 %2318  ;;  %6713 = vmatprep.subr.bf16.mxu1 %v6881_v0 }
0x2398   :  { %v2321_v55 = vmul.f32 %v2319_v6, %v7551_v49  ;;  %v5116_v49 = vld [vmem:[%s8209_s12 + $0x18] sm:$0xff]  ;;  %v5465_v57 = vld [vmem:[#allocation2] ss:$0 sm:$0xff] }
0x2399   :  { %v6714_v27 = vpack.c.bf16 %v5116_v49, %v5115_v37 }
0x239a   :  { %v2322_v44 = vadd.f32 %v2321_v55, %v1764_v38 }
0x239b   :  { %v2877_v18 = vpop.permute.xlu1 %2876  ;;  %6715 = vmatpush3.bf16.msra.mxu1 %v6714_v27 }
0x239c   :  { %v2879_v30 = vmul.f32 %v2877_v18, %v7719_v34 }
0x239e   :  { %v2880_v3 = vadd.f32 %v2879_v30, %v2322_v44 }
0x239f   :  { %v3435_v51 = vpop.permute.xlu1 %3434 }
0x23a0   :  { %v3437_v34 = vmul.f32 %v3435_v51, %v7807_v20  ;;  %v3156_v20 = vpop.permute.xlu0 %3155 }
0x23a1   :  { %v3158_v9 = vmul.f32 %v3156_v20, %v7724_v40 }
0x23a2   :  { %v3438_v15 = vadd.f32 %v3437_v34, %v2880_v3 }
0x23a3   :  { %v3993_v35 = vpop.permute.xlu1 %3992 }
0x23a4   :  { %v3995_v10 = vmul.f32 %v3993_v35, %v7887_v45  ;;  %v3714_v4 = vpop.permute.xlu0 %3713  ;;  %v2600_v45 = vmul.f32 %v2598_v46, %v7639_v53 }
0x23a5   :  { %v3716_v5 = vmul.f32 %v3714_v4, %v7882_v39 }
0x23a6   :  { %v3996_v52 = vadd.f32 %v3995_v10, %v3438_v15  ;;  %v2601_v31 = vadd.f32 %v2600_v45, %v2043_v12 }
0x23a7   :  { %v4551_v21 = vpop.permute.xlu1 %4550 }
0x23a8   :  { %v4272_v59 = vpop.permute.xlu0 %4271 }
0x23a9   :  { %v4274_v61 = vmul.f32 %v4272_v59, %v7967_v48  ;;  %v5282_v48 = vld [vmem:[%s8210_s15] sm:$0xff] }
0x23ab   :  { %v4543_v1 = vpop.permute.xlu1 %4542 }
0x23ac   :  { %v4545_v50 = vmul.f32 %v4543_v1, %v8039_v22  ;;  %v3159_v22 = vadd.f32 %v3158_v9, %v2601_v31  ;;  %v4830_v60 = vpop.permute.xlu0 %4829 }
0x23ad   :  { %v4832_v41 = vmul.f32 %v4830_v60, %v8032_v11  ;;  %v5283_v11 = vld [vmem:[%s8210_s15 + $0x8] sm:$0xff] }
0x23ae   :  { %v4553_v54 = vmul.f32 %v4551_v21, %v4545_v50  ;;  %v3717_v47 = vadd.f32 %v3716_v5, %v3159_v22 }
0x23b0   :  { %v4554_v26 = vadd.f32 %v4553_v54, %v3996_v52  ;;  %v5109_v62 = vpop.permute.xlu0 %5108  ;;  %v4275_v42 = vadd.f32 %v4274_v61, %v3717_v47 }
0x23b2   :  { %5122 = vrot.lane.b32.xlu1 %v4554_v26, %s6885_s24  ;;  %v4833_v24 = vadd.f32 %v4832_v41, %v4275_v42 }
0x23f6   :  { %v5101_v13 = vpop.permute.xlu0 %5100 }
0x23f7   :  { %v5103_v28 = vmul.f32 %v5101_v13, %v8080_v25  ;;  %v6717_v25 = vpack.c.bf16 %v5283_v11, %v5282_v48 }
0x23f9   :  { %v5111_v53 = vmul.f32 %v5109_v62, %v5103_v28 }
0x23fb   :  { %v5112_v36 = vadd.f32 %v5111_v53, %v4833_v24 }
0x23fd   :  { %5197 = vrot.lane.b32.xlu0 %v5112_v36, %s6885_s24 }
0x2424   :  { %v5123_v40 = vpop.permute.xlu1 %5122 }
0x2425   :  { %6356 = vmatmul.mubr.msk.f32.vlgmr.msra.gmra.mrb[54].mxu0 %vm102_vm4, %v5123_v40 }
0x2426   :  { %6377 = vmatprep.mubr.msk.f32.mxu0 %vm6882_vm0, %v6883_v8  ;;  %6718 = vmatpush3.bf16.msra.mxu0 %v6717_v25  ;;  %v5285_v8 = vld [vmem:[%s8210_s15 + $0x18] sm:$0xff] }
0x2427   :  { %6719 = vmatprep.subr.bf16.mxu0 %v6881_v0  ;;  %v6720_v56 = vpack.c.bf16 %v5285_v8, %v5284_v14  ;;  %v5464_v0 = vld [vmem:[%s8212_s14] ss:$0 sm:$0xff] }
0x242a   :  { %6721 = vmatpush3.bf16.msra.mxu0 %v6720_v56 }
0x246f   :  { %v5198_v39 = vpop.permute.xlu0 %5197 }
0x2470   :  { %6367 = vmatmul.mubr.msk.f32.vlgmr.msra.gmra.mrb[54].mxu1 %vm102_vm4, %v5198_v39 }
0x24f8   :  { %v5192_v19 = vpop.f32.mrb[54].mxu0 }
0x24f9   :  { %v6357_v2 = vpop.f32.mrb[55].mxu0 }
0x2543   :  { %v5267_v6 = vpop.f32.mrb[54].mxu1 }
0x2544   :  { %v5268_v18 = vadd.f32 %v5267_v6, %v5192_v19  ;;  %v6368_v23 = vpop.f32.mrb[55].mxu1 }
0x2546   :  { %v5278_v51 = vadd.f32 %v5464_v0, %v5268_v18 }
0x2548   :  { %vm5279_vm5 = vcmp.gt.f32.partialorder %v5278_v51, 0.0  ;;  %v5280_v29 = vmul.f32 0.01, %v5278_v51 }
0x254a   :  { %v5281_v32 = vsel %vm5279_vm5, %v5278_v51, %v5280_v29 }
0x254b   :  { %6378 = vmatmul.mubr.msk.f32.vlgmr.msra.gmra.mrb[56].mxu0 %vm102_vm4, %v5281_v32 }
0x261e   :  { %v5362_v35 = vpop.f32.mrb[56].mxu0 }
0x261f   :  { %v5363_v33 = vadd.f32 %v5465_v57, %v5362_v35  ;;  %v6379_v55 = vpop.f32.mrb[57].mxu0 }
0x2621   :  { %v5467_v38 = vmul.f32 -1.442695, %v5363_v33 }
0x2623   :  { %6874 = vpow2.f32 %v5467_v38 }
0x262d   :  { %v6875_v30 = vpop.eup %6874 }
0x262e   :  { %v5369_v58 = vadd.f32 1.0, %v6875_v30 }
0x2630   :  { %6876 = vrcp.f32 %v5369_v58 }
0x263a   :  { %v6877_v43 = vpop.eup %6876 }
0x263b   :  { %5373 = vst.msk [vmem:[%s8213_s17] sm:$0xff] %vm5372_vm6, %v6877_v43 }

</bundles_post_ra>
